<compile_context>
chip_gen: v7x
topology: tpu7x:2x2x1
jax: 0.10.0
libtpu: 0.0.40
codegen_flags: <defaults>
</compile_context>

<pallas_src>
import numpy as np
import jax
import jax.numpy as jnp
from jax import lax
from jax.experimental import pallas as pl
from jax.experimental.pallas import tpu as pltpu

DEPTH = 3
R = 2 ** DEPTH          # pixel-shuffle upscale factor


def _make_pixel_shuffle_kernel(r, c_blk, H, W):
    K = r * r
    Wr = W * r

    def kernel(t_ref, x_ref, o_ref):
        # t_ref : (r, W, Wr) bf16 one-hot, T[j, w, q] = 1 iff q == w*r + j   (hoisted, constant)
        # x_ref : (c_blk*K, H, W) input channels for this block of output channels
        # o_ref : (c_blk, H, r*Wr) -> reshaped (free) to (c_blk, H*r, W*r) outside
        t = t_ref[...]

        def channel_body(c, carry):
            rows = []
            for i in range(r):                                  # static unroll over the r row-groups
                start = pl.multiple_of(c * K + i * r, r)
                xi = x_ref[pl.ds(start, r)].astype(jnp.float32)  # (r, H, W)
                # Exact 3-limb bf16 split: xi == a + b + c_  (exact for normal-range values;
                # bf16-denormal / inf inputs would lose the guarantee).
                a = xi.astype(jnp.bfloat16)
                res = xi - a.astype(jnp.float32)
                b = res.astype(jnp.bfloat16)
                res = res - b.astype(jnp.float32)
                c_ = res.astype(jnp.bfloat16)
                # One bf16 DEFAULT-precision pass per limb: contract over w, batch over j.
                # Each output lane q receives exactly one one-hot term, accumulated in f32 -> exact.
                dn = (((2,), (1,)), ((0,), (0,)))
                u = (lax.dot_general(a, t, dn, preferred_element_type=jnp.float32)
                     + lax.dot_general(b, t, dn, preferred_element_type=jnp.float32)
                     + lax.dot_general(c_, t, dn, preferred_element_type=jnp.float32))
                # u[j, h, q] is nonzero only where q % r == j, so the j-sum just collapses it.
                rows.append(jnp.sum(u, axis=0))                  # (H, Wr) f32
            # Lane-major assembly: slab[h, i*Wr + q] = rows[i][h, q]  -> one dense store/channel.
            slab = jnp.concatenate(rows, axis=-1)                # (H, r*Wr)
            o_ref[c] = slab.astype(o_ref.dtype)
            return carry

        lax.fori_loop(0, c_blk, channel_body, 0)

    return kernel


def decoder_forward(feats, depth=DEPTH, c_blk=None):
    """Pallas TPU implementation of Decoder.forward (PixelShuffle(2**depth))."""
    r = 2 ** depth
    K = r * r
    B, C, H, W = feats.shape
    assert C % K == 0, "channels must be divisible by (2**depth)**2"
    C_out = C // K
    Wr = W * r
    itemsize = feats.dtype.itemsize

    # --- block sizing: multi-MiB steps, double-buffered blocks safe for v7x's 64 MiB VMEM ----
    per_chan_bytes = 2 * K * H * W * itemsize            # input + output bytes per output channel
    if c_blk is None:
        budget = 8 << 20                                  # per-step payload target (x2 double-buffer)
        divisors = [d for d in range(1, C_out + 1) if C_out % d == 0]
        c_blk = 1
        for d in divisors:
            if d * per_chan_bytes <= budget:
                c_blk = d
        # keep at least 2 grid steps so both v7x TensorCores / the pipeline get work
        if B * (C_out // c_blk) < 2:
            for d in reversed(divisors):
                if d < c_blk and B * (C_out // d) >= 2:
                    c_blk = d
                    break
    assert C_out % c_blk == 0

    # --- hoisted one-hot width-interleave matrix (bf16, exact 0/1 values) ----------------------
    jj = jnp.arange(r, dtype=jnp.int32)[:, None, None]
    ww = jnp.arange(W, dtype=jnp.int32)[None, :, None]
    qq = jnp.arange(Wr, dtype=jnp.int32)[None, None, :]
    t_onehot = (qq == ww * r + jj).astype(jnp.bfloat16)   # (r, W, Wr)

    in_block = c_blk * K * H * W * itemsize
    out_block = c_blk * K * H * W * itemsize
    onehot_bytes = int(t_onehot.size) * 2
    vmem_needed = 2 * (in_block + out_block) + 2 * onehot_bytes + (1 << 20)
    vmem_limit = int(min(max(vmem_needed, 32 << 20), 48 << 20))

    kernel = _make_pixel_shuffle_kernel(r, c_blk, H, W)

    out4 = pl.pallas_call(
        kernel,
        out_shape=jax.ShapeDtypeStruct((B, C_out, H, r * Wr), feats.dtype),
        grid=(B, C_out // c_blk),
        in_specs=[
            # Constant index_map -> fetched into VMEM once for the whole grid.
            pl.BlockSpec((r, W, Wr), lambda b, cb: (0, 0, 0)),
            # None == pl.Squeezed(): kernel ref is (c_blk*K, H, W) directly.
            pl.BlockSpec((None, c_blk * K, H, W), lambda b, cb: (b, cb, 0, 0)),
        ],
        out_specs=pl.BlockSpec((None, c_blk, H, r * Wr), lambda b, cb: (b, cb, 0, 0)),
        compiler_params=pltpu.CompilerParams(
            dimension_semantics=("parallel", "parallel"),
            vmem_limit_bytes=vmem_limit),
        cost_estimate=pl.CostEstimate(
            flops=B * C * H * W,                              # ~pure data movement
            transcendentals=0,
            bytes_accessed=2 * B * C * H * W * itemsize + onehot_bytes),
    )(t_onehot, feats)

    # (H, r*Wr) -> (H*r, Wr) is a contiguous (free) reshape; no transpose happens here.
    return out4.reshape(B, C_out, H * r, W * r)


if __name__ == "__main__":
    key = jax.random.PRNGKey(0)
    # depth=3 -> r=8 -> input channels must be divisible by 64.
    # H=W=16 keeps the output lane-dense (W*r = 128) and the input sublane-dense (H >= 8).
    B, C, H, W = 2, 128, 16, 16
    feats = jax.random.normal(key, (B, C, H, W), dtype=jnp.float32)

    out = jax.block_until_ready(decoder_forward(feats, depth=DEPTH))

    # Pure-JAX reference of PixelShuffle(r) for verification.
    r = R
    C_out = C // (r * r)
    ref = (feats.reshape(B, C_out, r, r, H, W)
                .transpose(0, 1, 4, 2, 5, 3)
                .reshape(B, C_out, H * r, W * r))

    assert out.shape == ref.shape
    np.testing.assert_allclose(np.asarray(out), np.asarray(ref), rtol=1e-6, atol=1e-6)
    print("KERNEL_OK")
</pallas_src>

<mosaic_0001>
module attributes {stable_mosaic.version = 11 : i64} {
  func.func @kernel(%arg0: i32, %arg1: i32, %arg2: memref<8x16x128xbf16, #tpu.memory_space<vmem>>, %arg3: memref<1x128x16x16xf32, #tpu.memory_space<vmem>>, %arg4: memref<1x2x16x1024xf32, #tpu.memory_space<vmem>>) attributes {dimension_semantics = [#tpu.dimension_semantics<parallel>, #tpu.dimension_semantics<parallel>], iteration_bounds = array<i64: 2, 1>, scalar_prefetch = 0 : i64, scratch_operands = 0 : i64, tpu.core_type = #tpu.core_type<tc>, window_params = [{pipeline_mode = #tpu.pipeline_mode<synchronous>, transform_indices = @transform_0, window_bounds = array<i64: 8, 16, 128>}, {transform_indices = @transform_1, window_bounds = array<i64: 1, 128, 16, 16>}, {transform_indices = @transform_2, window_bounds = array<i64: 1, 2, 16, 1024>}]} {
    %c0 = arith.constant 0 : index
    %c0_0 = arith.constant 0 : index
    %c0_1 = arith.constant 0 : index
    %0 = vector.load %arg2[%c0, %c0_0, %c0_1] : memref<8x16x128xbf16, #tpu.memory_space<vmem>>, vector<8x16x128xbf16>
    %c0_i32 = arith.constant 0 : i32
    %c2_i32 = arith.constant 2 : i32
    %1 = arith.addi %c0_i32, %c2_i32 : i32
    %c1_i32 = arith.constant 1 : i32
    scf.for %arg5 = %c0_i32 to %1 step %c1_i32  : i32 {
      %c64_i32 = arith.constant 64 : i32
      %2 = arith.muli %arg5, %c64_i32 : i32
      %c0_i32_3 = arith.constant 0 : i32
      %3 = arith.addi %2, %c0_i32_3 : i32
      %4 = tpu.assume_multiple %3, 8 : i32
      %c0_4 = arith.constant 0 : index
      %5 = arith.index_cast %4 : i32 to index
      %c0_5 = arith.constant 0 : index
      %c0_6 = arith.constant 0 : index
      %6 = vector.load %arg3[%c0_4, %5, %c0_5, %c0_6] : memref<1x128x16x16xf32, #tpu.memory_space<vmem>>, vector<1x8x16x16xf32>
      %7 = vector.shape_cast %6 : vector<1x8x16x16xf32> to vector<8x16x16xf32>
      %8 = arith.truncf %7 : vector<8x16x16xf32> to vector<8x16x16xbf16>
      %9 = arith.extf %8 : vector<8x16x16xbf16> to vector<8x16x16xf32>
      %10 = arith.subf %7, %9 : vector<8x16x16xf32>
      %11 = arith.truncf %10 : vector<8x16x16xf32> to vector<8x16x16xbf16>
      %12 = arith.extf %11 : vector<8x16x16xbf16> to vector<8x16x16xf32>
      %13 = arith.subf %10, %12 : vector<8x16x16xf32>
      %14 = arith.truncf %13 : vector<8x16x16xf32> to vector<8x16x16xbf16>
      %cst = arith.constant dense<0.000000e+00> : vector<8x16x128xf32>
      %15 = tpu.matmul %8, %0, %cst {dimension_numbers = #tpu.dot_dimension_numbers<[2], [1], [1], [2], [0, 0, 0, 1, 1, 2], [0], [0]>} : vector<8x16x16xbf16>, vector<8x16x128xbf16>, vector<8x16x128xf32> -> vector<8x16x128xf32>
      %cst_7 = arith.constant dense<0.000000e+00> : vector<8x16x128xf32>
      %16 = tpu.matmul %11, %0, %cst_7 {dimension_numbers = #tpu.dot_dimension_numbers<[2], [1], [1], [2], [0, 0, 0, 1, 1, 2], [0], [0]>} : vector<8x16x16xbf16>, vector<8x16x128xbf16>, vector<8x16x128xf32> -> vector<8x16x128xf32>
      %17 = arith.addf %15, %16 : vector<8x16x128xf32>
      %cst_8 = arith.constant dense<0.000000e+00> : vector<8x16x128xf32>
      %18 = tpu.matmul %14, %0, %cst_8 {dimension_numbers = #tpu.dot_dimension_numbers<[2], [1], [1], [2], [0, 0, 0, 1, 1, 2], [0], [0]>} : vector<8x16x16xbf16>, vector<8x16x128xbf16>, vector<8x16x128xf32> -> vector<8x16x128xf32>
      %19 = arith.addf %17, %18 : vector<8x16x128xf32>
      %cst_9 = arith.constant dense<0.000000e+00> : vector<16x128xf32>
      %20 = vector.multi_reduction <add>, %19, %cst_9 [0] : vector<8x16x128xf32> to vector<16x128xf32>
      %c64_i32_10 = arith.constant 64 : i32
      %21 = arith.muli %arg5, %c64_i32_10 : i32
      %c8_i32 = arith.constant 8 : i32
      %22 = arith.addi %21, %c8_i32 : i32
      %23 = tpu.assume_multiple %22, 8 : i32
      %c0_11 = arith.constant 0 : index
      %24 = arith.index_cast %23 : i32 to index
      %c0_12 = arith.constant 0 : index
      %c0_13 = arith.constant 0 : index
      %25 = vector.load %arg3[%c0_11, %24, %c0_12, %c0_13] : memref<1x128x16x16xf32, #tpu.memory_space<vmem>>, vector<1x8x16x16xf32>
      %26 = vector.shape_cast %25 : vector<1x8x16x16xf32> to vector<8x16x16xf32>
      %27 = arith.truncf %26 : vector<8x16x16xf32> to vector<8x16x16xbf16>
      %28 = arith.extf %27 : vector<8x16x16xbf16> to vector<8x16x16xf32>
      %29 = arith.subf %26, %28 : vector<8x16x16xf32>
      %30 = arith.truncf %29 : vector<8x16x16xf32> to vector<8x16x16xbf16>
      %31 = arith.extf %30 : vector<8x16x16xbf16> to vector<8x16x16xf32>
      %32 = arith.subf %29, %31 : vector<8x16x16xf32>
      %33 = arith.truncf %32 : vector<8x16x16xf32> to vector<8x16x16xbf16>
      %cst_14 = arith.constant dense<0.000000e+00> : vector<8x16x128xf32>
      %34 = tpu.matmul %27, %0, %cst_14 {dimension_numbers = #tpu.dot_dimension_numbers<[2], [1], [1], [2], [0, 0, 0, 1, 1, 2], [0], [0]>} : vector<8x16x16xbf16>, vector<8x16x128xbf16>, vector<8x16x128xf32> -> vector<8x16x128xf32>
      %cst_15 = arith.constant dense<0.000000e+00> : vector<8x16x128xf32>
      %35 = tpu.matmul %30, %0, %cst_15 {dimension_numbers = #tpu.dot_dimension_numbers<[2], [1], [1], [2], [0, 0, 0, 1, 1, 2], [0], [0]>} : vector<8x16x16xbf16>, vector<8x16x128xbf16>, vector<8x16x128xf32> -> vector<8x16x128xf32>
      %36 = arith.addf %34, %35 : vector<8x16x128xf32>
      %cst_16 = arith.constant dense<0.000000e+00> : vector<8x16x128xf32>
      %37 = tpu.matmul %33, %0, %cst_16 {dimension_numbers = #tpu.dot_dimension_numbers<[2], [1], [1], [2], [0, 0, 0, 1, 1, 2], [0], [0]>} : vector<8x16x16xbf16>, vector<8x16x128xbf16>, vector<8x16x128xf32> -> vector<8x16x128xf32>
      %38 = arith.addf %36, %37 : vector<8x16x128xf32>
      %cst_17 = arith.constant dense<0.000000e+00> : vector<16x128xf32>
      %39 = vector.multi_reduction <add>, %38, %cst_17 [0] : vector<8x16x128xf32> to vector<16x128xf32>
      %c64_i32_18 = arith.constant 64 : i32
      %40 = arith.muli %arg5, %c64_i32_18 : i32
      %c16_i32 = arith.constant 16 : i32
      %41 = arith.addi %40, %c16_i32 : i32
      %42 = tpu.assume_multiple %41, 8 : i32
      %c0_19 = arith.constant 0 : index
      %43 = arith.index_cast %42 : i32 to index
      %c0_20 = arith.constant 0 : index
      %c0_21 = arith.constant 0 : index
      %44 = vector.load %arg3[%c0_19, %43, %c0_20, %c0_21] : memref<1x128x16x16xf32, #tpu.memory_space<vmem>>, vector<1x8x16x16xf32>
      %45 = vector.shape_cast %44 : vector<1x8x16x16xf32> to vector<8x16x16xf32>
      %46 = arith.truncf %45 : vector<8x16x16xf32> to vector<8x16x16xbf16>
      %47 = arith.extf %46 : vector<8x16x16xbf16> to vector<8x16x16xf32>
      %48 = arith.subf %45, %47 : vector<8x16x16xf32>
      %49 = arith.truncf %48 : vector<8x16x16xf32> to vector<8x16x16xbf16>
      %50 = arith.extf %49 : vector<8x16x16xbf16> to vector<8x16x16xf32>
      %51 = arith.subf %48, %50 : vector<8x16x16xf32>
      %52 = arith.truncf %51 : vector<8x16x16xf32> to vector<8x16x16xbf16>
      %cst_22 = arith.constant dense<0.000000e+00> : vector<8x16x128xf32>
      %53 = tpu.matmul %46, %0, %cst_22 {dimension_numbers = #tpu.dot_dimension_numbers<[2], [1], [1], [2], [0, 0, 0, 1, 1, 2], [0], [0]>} : vector<8x16x16xbf16>, vector<8x16x128xbf16>, vector<8x16x128xf32> -> vector<8x16x128xf32>
      %cst_23 = arith.constant dense<0.000000e+00> : vector<8x16x128xf32>
      %54 = tpu.matmul %49, %0, %cst_23 {dimension_numbers = #tpu.dot_dimension_numbers<[2], [1], [1], [2], [0, 0, 0, 1, 1, 2], [0], [0]>} : vector<8x16x16xbf16>, vector<8x16x128xbf16>, vector<8x16x128xf32> -> vector<8x16x128xf32>
      %55 = arith.addf %53, %54 : vector<8x16x128xf32>
      %cst_24 = arith.constant dense<0.000000e+00> : vector<8x16x128xf32>
      %56 = tpu.matmul %52, %0, %cst_24 {dimension_numbers = #tpu.dot_dimension_numbers<[2], [1], [1], [2], [0, 0, 0, 1, 1, 2], [0], [0]>} : vector<8x16x16xbf16>, vector<8x16x128xbf16>, vector<8x16x128xf32> -> vector<8x16x128xf32>
      %57 = arith.addf %55, %56 : vector<8x16x128xf32>
      %cst_25 = arith.constant dense<0.000000e+00> : vector<16x128xf32>
      %58 = vector.multi_reduction <add>, %57, %cst_25 [0] : vector<8x16x128xf32> to vector<16x128xf32>
      %c64_i32_26 = arith.constant 64 : i32
      %59 = arith.muli %arg5, %c64_i32_26 : i32
      %c24_i32 = arith.constant 24 : i32
      %60 = arith.addi %59, %c24_i32 : i32
      %61 = tpu.assume_multiple %60, 8 : i32
      %c0_27 = arith.constant 0 : index
      %62 = arith.index_cast %61 : i32 to index
      %c0_28 = arith.constant 0 : index
      %c0_29 = arith.constant 0 : index
      %63 = vector.load %arg3[%c0_27, %62, %c0_28, %c0_29] : memref<1x128x16x16xf32, #tpu.memory_space<vmem>>, vector<1x8x16x16xf32>
      %64 = vector.shape_cast %63 : vector<1x8x16x16xf32> to vector<8x16x16xf32>
      %65 = arith.truncf %64 : vector<8x16x16xf32> to vector<8x16x16xbf16>
      %66 = arith.extf %65 : vector<8x16x16xbf16> to vector<8x16x16xf32>
      %67 = arith.subf %64, %66 : vector<8x16x16xf32>
      %68 = arith.truncf %67 : vector<8x16x16xf32> to vector<8x16x16xbf16>
      %69 = arith.extf %68 : vector<8x16x16xbf16> to vector<8x16x16xf32>
      %70 = arith.subf %67, %69 : vector<8x16x16xf32>
      %71 = arith.truncf %70 : vector<8x16x16xf32> to vector<8x16x16xbf16>
      %cst_30 = arith.constant dense<0.000000e+00> : vector<8x16x128xf32>
      %72 = tpu.matmul %65, %0, %cst_30 {dimension_numbers = #tpu.dot_dimension_numbers<[2], [1], [1], [2], [0, 0, 0, 1, 1, 2], [0], [0]>} : vector<8x16x16xbf16>, vector<8x16x128xbf16>, vector<8x16x128xf32> -> vector<8x16x128xf32>
      %cst_31 = arith.constant dense<0.000000e+00> : vector<8x16x128xf32>
      %73 = tpu.matmul %68, %0, %cst_31 {dimension_numbers = #tpu.dot_dimension_numbers<[2], [1], [1], [2], [0, 0, 0, 1, 1, 2], [0], [0]>} : vector<8x16x16xbf16>, vector<8x16x128xbf16>, vector<8x16x128xf32> -> vector<8x16x128xf32>
      %74 = arith.addf %72, %73 : vector<8x16x128xf32>
      %cst_32 = arith.constant dense<0.000000e+00> : vector<8x16x128xf32>
      %75 = tpu.matmul %71, %0, %cst_32 {dimension_numbers = #tpu.dot_dimension_numbers<[2], [1], [1], [2], [0, 0, 0, 1, 1, 2], [0], [0]>} : vector<8x16x16xbf16>, vector<8x16x128xbf16>, vector<8x16x128xf32> -> vector<8x16x128xf32>
      %76 = arith.addf %74, %75 : vector<8x16x128xf32>
      %cst_33 = arith.constant dense<0.000000e+00> : vector<16x128xf32>
      %77 = vector.multi_reduction <add>, %76, %cst_33 [0] : vector<8x16x128xf32> to vector<16x128xf32>
      %c64_i32_34 = arith.constant 64 : i32
      %78 = arith.muli %arg5, %c64_i32_34 : i32
      %c32_i32 = arith.constant 32 : i32
      %79 = arith.addi %78, %c32_i32 : i32
      %80 = tpu.assume_multiple %79, 8 : i32
      %c0_35 = arith.constant 0 : index
      %81 = arith.index_cast %80 : i32 to index
      %c0_36 = arith.constant 0 : index
      %c0_37 = arith.constant 0 : index
      %82 = vector.load %arg3[%c0_35, %81, %c0_36, %c0_37] : memref<1x128x16x16xf32, #tpu.memory_space<vmem>>, vector<1x8x16x16xf32>
      %83 = vector.shape_cast %82 : vector<1x8x16x16xf32> to vector<8x16x16xf32>
      %84 = arith.truncf %83 : vector<8x16x16xf32> to vector<8x16x16xbf16>
      %85 = arith.extf %84 : vector<8x16x16xbf16> to vector<8x16x16xf32>
      %86 = arith.subf %83, %85 : vector<8x16x16xf32>
      %87 = arith.truncf %86 : vector<8x16x16xf32> to vector<8x16x16xbf16>
      %88 = arith.extf %87 : vector<8x16x16xbf16> to vector<8x16x16xf32>
      %89 = arith.subf %86, %88 : vector<8x16x16xf32>
      %90 = arith.truncf %89 : vector<8x16x16xf32> to vector<8x16x16xbf16>
      %cst_38 = arith.constant dense<0.000000e+00> : vector<8x16x128xf32>
      %91 = tpu.matmul %84, %0, %cst_38 {dimension_numbers = #tpu.dot_dimension_numbers<[2], [1], [1], [2], [0, 0, 0, 1, 1, 2], [0], [0]>} : vector<8x16x16xbf16>, vector<8x16x128xbf16>, vector<8x16x128xf32> -> vector<8x16x128xf32>
      %cst_39 = arith.constant dense<0.000000e+00> : vector<8x16x128xf32>
      %92 = tpu.matmul %87, %0, %cst_39 {dimension_numbers = #tpu.dot_dimension_numbers<[2], [1], [1], [2], [0, 0, 0, 1, 1, 2], [0], [0]>} : vector<8x16x16xbf16>, vector<8x16x128xbf16>, vector<8x16x128xf32> -> vector<8x16x128xf32>
      %93 = arith.addf %91, %92 : vector<8x16x128xf32>
      %cst_40 = arith.constant dense<0.000000e+00> : vector<8x16x128xf32>
      %94 = tpu.matmul %90, %0, %cst_40 {dimension_numbers = #tpu.dot_dimension_numbers<[2], [1], [1], [2], [0, 0, 0, 1, 1, 2], [0], [0]>} : vector<8x16x16xbf16>, vector<8x16x128xbf16>, vector<8x16x128xf32> -> vector<8x16x128xf32>
      %95 = arith.addf %93, %94 : vector<8x16x128xf32>
      %cst_41 = arith.constant dense<0.000000e+00> : vector<16x128xf32>
      %96 = vector.multi_reduction <add>, %95, %cst_41 [0] : vector<8x16x128xf32> to vector<16x128xf32>
      %c64_i32_42 = arith.constant 64 : i32
      %97 = arith.muli %arg5, %c64_i32_42 : i32
      %c40_i32 = arith.constant 40 : i32
      %98 = arith.addi %97, %c40_i32 : i32
      %99 = tpu.assume_multiple %98, 8 : i32
      %c0_43 = arith.constant 0 : index
      %100 = arith.index_cast %99 : i32 to index
      %c0_44 = arith.constant 0 : index
      %c0_45 = arith.constant 0 : index
      %101 = vector.load %arg3[%c0_43, %100, %c0_44, %c0_45] : memref<1x128x16x16xf32, #tpu.memory_space<vmem>>, vector<1x8x16x16xf32>
      %102 = vector.shape_cast %101 : vector<1x8x16x16xf32> to vector<8x16x16xf32>
      %103 = arith.truncf %102 : vector<8x16x16xf32> to vector<8x16x16xbf16>
      %104 = arith.extf %103 : vector<8x16x16xbf16> to vector<8x16x16xf32>
      %105 = arith.subf %102, %104 : vector<8x16x16xf32>
      %106 = arith.truncf %105 : vector<8x16x16xf32> to vector<8x16x16xbf16>
      %107 = arith.extf %106 : vector<8x16x16xbf16> to vector<8x16x16xf32>
      %108 = arith.subf %105, %107 : vector<8x16x16xf32>
      %109 = arith.truncf %108 : vector<8x16x16xf32> to vector<8x16x16xbf16>
      %cst_46 = arith.constant dense<0.000000e+00> : vector<8x16x128xf32>
      %110 = tpu.matmul %103, %0, %cst_46 {dimension_numbers = #tpu.dot_dimension_numbers<[2], [1], [1], [2], [0, 0, 0, 1, 1, 2], [0], [0]>} : vector<8x16x16xbf16>, vector<8x16x128xbf16>, vector<8x16x128xf32> -> vector<8x16x128xf32>
      %cst_47 = arith.constant dense<0.000000e+00> : vector<8x16x128xf32>
      %111 = tpu.matmul %106, %0, %cst_47 {dimension_numbers = #tpu.dot_dimension_numbers<[2], [1], [1], [2], [0, 0, 0, 1, 1, 2], [0], [0]>} : vector<8x16x16xbf16>, vector<8x16x128xbf16>, vector<8x16x128xf32> -> vector<8x16x128xf32>
      %112 = arith.addf %110, %111 : vector<8x16x128xf32>
      %cst_48 = arith.constant dense<0.000000e+00> : vector<8x16x128xf32>
      %113 = tpu.matmul %109, %0, %cst_48 {dimension_numbers = #tpu.dot_dimension_numbers<[2], [1], [1], [2], [0, 0, 0, 1, 1, 2], [0], [0]>} : vector<8x16x16xbf16>, vector<8x16x128xbf16>, vector<8x16x128xf32> -> vector<8x16x128xf32>
      %114 = arith.addf %112, %113 : vector<8x16x128xf32>
      %cst_49 = arith.constant dense<0.000000e+00> : vector<16x128xf32>
      %115 = vector.multi_reduction <add>, %114, %cst_49 [0] : vector<8x16x128xf32> to vector<16x128xf32>
      %c64_i32_50 = arith.constant 64 : i32
      %116 = arith.muli %arg5, %c64_i32_50 : i32
      %c48_i32 = arith.constant 48 : i32
      %117 = arith.addi %116, %c48_i32 : i32
      %118 = tpu.assume_multiple %117, 8 : i32
      %c0_51 = arith.constant 0 : index
      %119 = arith.index_cast %118 : i32 to index
      %c0_52 = arith.constant 0 : index
      %c0_53 = arith.constant 0 : index
      %120 = vector.load %arg3[%c0_51, %119, %c0_52, %c0_53] : memref<1x128x16x16xf32, #tpu.memory_space<vmem>>, vector<1x8x16x16xf32>
      %121 = vector.shape_cast %120 : vector<1x8x16x16xf32> to vector<8x16x16xf32>
      %122 = arith.truncf %121 : vector<8x16x16xf32> to vector<8x16x16xbf16>
      %123 = arith.extf %122 : vector<8x16x16xbf16> to vector<8x16x16xf32>
      %124 = arith.subf %121, %123 : vector<8x16x16xf32>
      %125 = arith.truncf %124 : vector<8x16x16xf32> to vector<8x16x16xbf16>
      %126 = arith.extf %125 : vector<8x16x16xbf16> to vector<8x16x16xf32>
      %127 = arith.subf %124, %126 : vector<8x16x16xf32>
      %128 = arith.truncf %127 : vector<8x16x16xf32> to vector<8x16x16xbf16>
      %cst_54 = arith.constant dense<0.000000e+00> : vector<8x16x128xf32>
      %129 = tpu.matmul %122, %0, %cst_54 {dimension_numbers = #tpu.dot_dimension_numbers<[2], [1], [1], [2], [0, 0, 0, 1, 1, 2], [0], [0]>} : vector<8x16x16xbf16>, vector<8x16x128xbf16>, vector<8x16x128xf32> -> vector<8x16x128xf32>
      %cst_55 = arith.constant dense<0.000000e+00> : vector<8x16x128xf32>
      %130 = tpu.matmul %125, %0, %cst_55 {dimension_numbers = #tpu.dot_dimension_numbers<[2], [1], [1], [2], [0, 0, 0, 1, 1, 2], [0], [0]>} : vector<8x16x16xbf16>, vector<8x16x128xbf16>, vector<8x16x128xf32> -> vector<8x16x128xf32>
      %131 = arith.addf %129, %130 : vector<8x16x128xf32>
      %cst_56 = arith.constant dense<0.000000e+00> : vector<8x16x128xf32>
      %132 = tpu.matmul %128, %0, %cst_56 {dimension_numbers = #tpu.dot_dimension_numbers<[2], [1], [1], [2], [0, 0, 0, 1, 1, 2], [0], [0]>} : vector<8x16x16xbf16>, vector<8x16x128xbf16>, vector<8x16x128xf32> -> vector<8x16x128xf32>
      %133 = arith.addf %131, %132 : vector<8x16x128xf32>
      %cst_57 = arith.constant dense<0.000000e+00> : vector<16x128xf32>
      %134 = vector.multi_reduction <add>, %133, %cst_57 [0] : vector<8x16x128xf32> to vector<16x128xf32>
      %c64_i32_58 = arith.constant 64 : i32
      %135 = arith.muli %arg5, %c64_i32_58 : i32
      %c56_i32 = arith.constant 56 : i32
      %136 = arith.addi %135, %c56_i32 : i32
      %137 = tpu.assume_multiple %136, 8 : i32
      %c0_59 = arith.constant 0 : index
      %138 = arith.index_cast %137 : i32 to index
      %c0_60 = arith.constant 0 : index
      %c0_61 = arith.constant 0 : index
      %139 = vector.load %arg3[%c0_59, %138, %c0_60, %c0_61] : memref<1x128x16x16xf32, #tpu.memory_space<vmem>>, vector<1x8x16x16xf32>
      %140 = vector.shape_cast %139 : vector<1x8x16x16xf32> to vector<8x16x16xf32>
      %141 = arith.truncf %140 : vector<8x16x16xf32> to vector<8x16x16xbf16>
      %142 = arith.extf %141 : vector<8x16x16xbf16> to vector<8x16x16xf32>
      %143 = arith.subf %140, %142 : vector<8x16x16xf32>
      %144 = arith.truncf %143 : vector<8x16x16xf32> to vector<8x16x16xbf16>
      %145 = arith.extf %144 : vector<8x16x16xbf16> to vector<8x16x16xf32>
      %146 = arith.subf %143, %145 : vector<8x16x16xf32>
      %147 = arith.truncf %146 : vector<8x16x16xf32> to vector<8x16x16xbf16>
      %cst_62 = arith.constant dense<0.000000e+00> : vector<8x16x128xf32>
      %148 = tpu.matmul %141, %0, %cst_62 {dimension_numbers = #tpu.dot_dimension_numbers<[2], [1], [1], [2], [0, 0, 0, 1, 1, 2], [0], [0]>} : vector<8x16x16xbf16>, vector<8x16x128xbf16>, vector<8x16x128xf32> -> vector<8x16x128xf32>
      %cst_63 = arith.constant dense<0.000000e+00> : vector<8x16x128xf32>
      %149 = tpu.matmul %144, %0, %cst_63 {dimension_numbers = #tpu.dot_dimension_numbers<[2], [1], [1], [2], [0, 0, 0, 1, 1, 2], [0], [0]>} : vector<8x16x16xbf16>, vector<8x16x128xbf16>, vector<8x16x128xf32> -> vector<8x16x128xf32>
      %150 = arith.addf %148, %149 : vector<8x16x128xf32>
      %cst_64 = arith.constant dense<0.000000e+00> : vector<8x16x128xf32>
      %151 = tpu.matmul %147, %0, %cst_64 {dimension_numbers = #tpu.dot_dimension_numbers<[2], [1], [1], [2], [0, 0, 0, 1, 1, 2], [0], [0]>} : vector<8x16x16xbf16>, vector<8x16x128xbf16>, vector<8x16x128xf32> -> vector<8x16x128xf32>
      %152 = arith.addf %150, %151 : vector<8x16x128xf32>
      %cst_65 = arith.constant dense<0.000000e+00> : vector<16x128xf32>
      %153 = vector.multi_reduction <add>, %152, %cst_65 [0] : vector<8x16x128xf32> to vector<16x128xf32>
      %154 = tpu.concatenate %20, %39, %58, %77, %96, %115, %134, %153 in 1 : vector<16x128xf32>, vector<16x128xf32>, vector<16x128xf32>, vector<16x128xf32>, vector<16x128xf32>, vector<16x128xf32>, vector<16x128xf32>, vector<16x128xf32> -> vector<16x1024xf32>
      %c0_66 = arith.constant 0 : index
      %155 = arith.index_cast %arg5 : i32 to index
      %c0_67 = arith.constant 0 : index
      %c0_68 = arith.constant 0 : index
      %156 = vector.load %arg4[%c0_66, %155, %c0_67, %c0_68] : memref<1x2x16x1024xf32, #tpu.memory_space<vmem>>, vector<1x1x16x1024xf32>
      %157 = vector.shape_cast %156 : vector<1x1x16x1024xf32> to vector<16x1024xf32>
      %158 = vector.shape_cast %154 : vector<16x1024xf32> to vector<1x1x16x1024xf32>
      tpu.vector_store %arg4[%c0_66, %155, %c0_67, %c0_68], %158 {strides = array<i32>} : memref<1x2x16x1024xf32, #tpu.memory_space<vmem>>, vector<1x1x16x1024xf32>,
    }
    %c2_i32_2 = arith.constant 2 : i32
    return
  }
  func.func @transform_0(%arg0: i32, %arg1: i32) -> (i32, i32, i32) {
    %c0_i32 = arith.constant 0 : i32
    %c0_i32_0 = arith.constant 0 : i32
    %c0_i32_1 = arith.constant 0 : i32
    %c0_i32_2 = arith.constant 0 : i32
    return %c0_i32, %c0_i32_0, %c0_i32_1 : i32, i32, i32
  }
  func.func @transform_1(%arg0: i32, %arg1: i32) -> (i32, i32, i32, i32) {
    %c0_i32 = arith.constant 0 : i32
    %c0_i32_0 = arith.constant 0 : i32
    %c0_i32_1 = arith.constant 0 : i32
    return %arg0, %arg1, %c0_i32, %c0_i32_0 : i32, i32, i32, i32
  }
  func.func @transform_2(%arg0: i32, %arg1: i32) -> (i32, i32, i32, i32) {
    %c0_i32 = arith.constant 0 : i32
    %c0_i32_0 = arith.constant 0 : i32
    %c0_i32_1 = arith.constant 0 : i32
    return %arg0, %arg1, %c0_i32, %c0_i32_0 : i32, i32, i32, i32
  }
}

</mosaic_0001>

<bundles_post_ra>
// kernel: tpu_custom_call.1
= control target key start
LH: loop header
LB: loop body
LE: loop exit
PB: predicated region body
PF: predicated region fallthrough
CT: control target
= control target key end

     0   :  { %7 = vsyncpa [#allocation3], 0  ;;  %s15251_s0 = inlined_call_operand.vmem [shape: bf16[8,16,128], index: 0, kind: input, shape index: {}]   ;;  %s15252_s1 = inlined_call_operand.vmem [shape: f32[2,128,16,16], index: 1, kind: input, shape index: {}]   ;;  %s15253_s2 = inlined_call_operand.hbm [shape: f32[2,2,16,1024], index: 2, kind: output, shape index: {}]  }
   0x1   :  { %9 = vsyncpa [#allocation3 + $0x1], 0  ;;  %s12748_s9 = smov 0   ;;  %s12750_s10 = smov 0  }
   0x2   :  { %s12752_s11 = smov 0   ;;  %s12754_s12 = smov 0  }
   0x3   :  { %s12756_s13 = smov 0   ;;  %s12758_s14 = smov 0  }
   0x4 LB: > { %s9947_s15 = sadd.s32 4294967295, %s12722_s14   ;;  %s9948_s16 = sadd.s32 4294967294, %s12722_s14   ;;  %s12722_s14 = sphi %s12758_s14, %s15_s14   ;;  %s12718_s13 = sphi %s12756_s13, %s15508_s13   ;;  %s12714_s12 = sphi %s12754_s12, %s15507_s12   ;;  %s12710_s11 = sphi %s12752_s11, %s15506_s11   ;;  %s12706_s10 = sphi %s12750_s10, %s15505_s10   ;;  %s12702_s9 = sphi %s12748_s9, %s15504_s9  }
   0x5   : > { %s27_s17 = sadd.s32 1, %s12718_s13  ;;  %s85_s18 = sadd.s32 1, %s12710_s11 }
   0x6   : > { %p29_p0 = scmp.ge.s32.totalorder %s27_s17, 2  ;;  %p95_p1 = scmp.ne.s32.totalorder %s12710_s11, %s12706_s10 }
   0x7   : > { %p96_p2 = scmp.eq.s32.totalorder %s9947_s15, 1  ;;  %p101_p3 = scmp.ne.s32.totalorder %s12706_s10, %s12702_s9 }
   0x8   : > { %s15510_s17 = smov (%p29_p0, %s27_s17), 0  ;;  %p102_p5 = scmp.eq.s32.totalorder %s9948_s16, 1 }
   0x9   : > { %p12788_p4 = por %p96_p2, %p95_p1  ;;  %s80_s20 = ssub.s32 %s12718_s13, %s15510_s17 }
   0xa   : > { %p9951_p6 = scmp.ge.s32.totalorder %s12722_s14, 1  ;;  %p83_p7 = scmp.eq.s32.totalorder %s80_s20, 0 }
   0xb   : > { %p12795_p8 = por %p102_p5, %p101_p3  ;;  %p137_p9 = scmp.lt.s32.totalorder %s12722_s14, 3 }
   0xc   : > { %s12801_s22 = scalar_select %p83_p7, %s12710_s11, %s85_s18  }
   0xd   : > { %p138_p10 = pnand %p9951_p6, %p137_p9 }
   0xf   : > { %141 = sbr.rel (%p138_p10) target bundleno = 1401 (0x579), region = 28 }
  0x16   : > { %s161_s23 = sand.u32 1, %s12706_s10   ;;  %p165_p11 = scmp.lt.s32.totalorder %s12714_s12, 1  ;;  %v12808_v0 = vld [vmem:[%s15251_s0] sm:$0xf]  ;;  %v12813_v1 = vld [vmem:[%s15251_s0 + $0x4] sm:$0xf] }
  0x17   : > { %15338 = vst [vmem:[#allocation5_spill] sm:$0xff] %v12808_v0  ;;  %15339 = vst [vmem:[#allocation6_spill] sm:$0xff] %v12813_v1  ;;  %s12817_s28 = sshll.u32 %s161_s23, 8  ;;  %v12822_v2 = vld [vmem:[%s15251_s0 + $0x8] sm:$0xf]  ;;  %s12896_s3 = smov 0  }
  0x18   : > { %15340 = vst [vmem:[#allocation7_spill] sm:$0xff] %v12822_v2  ;;  %v12827_v3 = vld [vmem:[%s15251_s0 + $0xc] sm:$0xf]  ;;  %v12832_v4 = vld [vmem:[%s15251_s0 + $0x10] sm:$0xf]  ;;  %s166_s15 = scalar_select %p165_p11, %s12714_s12, 1 }
  0x19   : > { %15341 = vst [vmem:[#allocation8_spill] sm:$0xff] %v12827_v3  ;;  %15342 = vst [vmem:[#allocation9_spill] sm:$0xff] %v12832_v4  ;;  %v12837_v5 = vld [vmem:[%s15251_s0 + $0x14] sm:$0xf]  ;;  %v12843_v6 = vld [vmem:[%s15251_s0 + $0x18] sm:$0xf] }
  0x1a   : > { %15343 = vst [vmem:[#allocation10_spill] sm:$0xff] %v12837_v5  ;;  %15344 = vst [vmem:[#allocation11_spill] sm:$0xff] %v12843_v6  ;;  %v12848_v7 = vld [vmem:[%s15251_s0 + $0x1c] sm:$0xf]  ;;  %v12853_v8 = vld [vmem:[%s15251_s0 + $0x20] sm:$0xf] }
  0x1b   : > { %15345 = vst [vmem:[#allocation12_spill] sm:$0xff] %v12848_v7  ;;  %15346 = vst [vmem:[#allocation13_spill] sm:$0xff] %v12853_v8  ;;  %v12858_v9 = vld [vmem:[%s15251_s0 + $0x24] sm:$0xf]  ;;  %v12863_v10 = vld [vmem:[%s15251_s0 + $0x28] sm:$0xf] }
  0x1c   : > { %15347 = vst [vmem:[#allocation14_spill] sm:$0xff] %v12858_v9  ;;  %15348 = vst [vmem:[#allocation15_spill] sm:$0xff] %v12863_v10  ;;  %s10290_s4 = sshll.u32 %s166_s15, 11  ;;  %v12868_v11 = vld [vmem:[%s15251_s0 + $0x2c] sm:$0xf]  ;;  %s163_s30 = scalar_lea.vmem [#allocation2], %s12817_s28 }
  0x1d   : > { %15349 = vst [vmem:[#allocation16_spill] sm:$0xff] %v12868_v11  ;;  %v12873_v12 = vld [vmem:[%s15251_s0 + $0x30] sm:$0xf]  ;;  %s12878_s20 = scalar_lea.vmem %s15252_s1, %s10290_s4  ;;  %v12883_v13 = vld [vmem:[%s15251_s0 + $0x34] sm:$0xf] }
  0x1e   : > { %15350 = vst [vmem:[#allocation17_spill] sm:$0xff] %v12873_v12  ;;  %15351 = vst [vmem:[#allocation18_spill] sm:$0xff] %v12883_v13  ;;  %v12888_v14 = vld [vmem:[%s15251_s0 + $0x38] sm:$0xf]  ;;  %v12893_v15 = vld [vmem:[%s15251_s0 + $0x3c] sm:$0xf] }
  0x1f   : > { %15352 = vst [vmem:[#allocation19_spill] sm:$0xff] %v12888_v14  ;;  %15353 = vst [vmem:[#allocation20_spill] sm:$0xff] %v12893_v15 }
  0x20 LB: >> { %v15354_v1 = vld [vmem:[#allocation6_spill] sm:$0xff]  ;;  %v15355_v0 = vld [vmem:[#allocation5_spill] sm:$0xff]  ;;  %v12728_v17 = vmov 0.0   ;;  %s10291_s4 = sshll.u32 %s12726_s3, 10  ;;  %vm12729_vm0 = vmmov 0   ;;  %vm312_vm1 = vcmask 130048   ;;  %s12726_s3 = sphi %s12896_s3, %s198_s3  }
  0x21   : >> { %v12903_v16 = vcombine.low %v15355_v0, %v15354_v1  ;;  %10685 = vmatprep.subr.bf16.mxu0 %v12728_v17  ;;  %10829 = vmatprep.subr.bf16.mxu1 %v12728_v17  ;;  %s12914_s5 = scalar_lea.vmem %s12878_s20, %s10291_s4  ;;  %v15356_v3 = vld [vmem:[#allocation8_spill] sm:$0xff]  ;;  %v15357_v2 = vld [vmem:[#allocation7_spill] sm:$0xff]  ;;  %v15358_v5 = vld [vmem:[#allocation10_spill] sm:$0xff]  ;;  %s10299_s6 = sshll.u32 %s12726_s3, 7 }
  0x22   : >> { %10687 = vmatprep.mubr.msk.bf16.mxu0 %vm12729_vm0, %v12728_v17  ;;  %10831 = vmatprep.mubr.msk.bf16.mxu1 %vm12729_vm0, %v12728_v17  ;;  %v202_v18 = vld [vmem:[%s12914_s5] sm:$0xff]  ;;  %v203_v19 = vld [vmem:[%s12914_s5 + $0x8] sm:$0xff]  ;;  %v204_v24 = vld [vmem:[%s12914_s5 + $0x10] sm:$0xff]  ;;  %v12939_v35 = vcombine.low %v15357_v2, %v15356_v3  ;;  %s13944_s7 = scalar_lea.vmem %s163_s30, %s10299_s6 [#allocation2]  ;;  %s198_s3 = sadd.s32 1, %s12726_s3  }
  0x23   : >> { %10686 = vmatpush3.bf16.msra.mxu0 %v12903_v16  ;;  %10830 = vmatpush3.bf16.msra.mxu1 %v12903_v16  ;;  %v9991_v20 = vld [vmem:[%s12914_s5 + $0x80] sm:$0xff]  ;;  %v12922_v21 = vpack.c.bf16 %v203_v19, %v202_v18  ;;  %v9992_v22 = vld [vmem:[%s12914_s5 + $0x88] sm:$0xff]  ;;  %v205_v25 = vld [vmem:[%s12914_s5 + $0x18] sm:$0xff]  ;;  %p195_p12 = scmp.ge.s32.totalorder %s198_s3, 2  }
  0x24   : >> { %10691 = vmatprep.subr.bf16.mxu0 %v12728_v17  ;;  %10835 = vmatprep.subr.bf16.mxu1 %v12728_v17  ;;  %v12925_v23 = vpack.c.bf16 %v9992_v22, %v9991_v20  ;;  %v9993_v28 = vld [vmem:[%s12914_s5 + $0x90] sm:$0xff]  ;;  %v9994_v29 = vld [vmem:[%s12914_s5 + $0x98] sm:$0xff]  ;;  %v12935_v34 = vpack.c.bf16 %v205_v25, %v204_v24  ;;  %v206_v57 = vld [vmem:[%s12914_s5 + $0x20] sm:$0xff]  ;;  %s10300_s8 = sshll.u32 (%p195_p12), %s12714_s12, 12  ;;  %s9828_s25 = sshll.u32 (%p195_p12), %s163_s30, 4  ;;  %s15201_s25 = int_to_ptr.vmem [resolvable:$true] %s9828_s25 }
  0x25   : >> { %v226_v26 = vunpack.c.l.bf16 %v12922_v21  ;;  %v227_v27 = vunpack.c.h.bf16 %v12922_v21  ;;  %v12941_v38 = vpack.c.bf16 %v9994_v29, %v9993_v28  ;;  %v207_v58 = vld [vmem:[%s12914_s5 + $0x28] sm:$0xff]  ;;  %v9995_v59 = vld [vmem:[%s12914_s5 + $0xa0] sm:$0xff]  ;;  %v15360_v7 = vld [vmem:[#allocation12_spill] sm:$0xff]  ;;  %s15197_s24 = scalar_lea.hbm (%p195_p12), %s15253_s2, %s10300_s8  ;;  %s15205_s15 = scalar_lea.sflag (%p195_p12), [#allocation3], %s161_s23 }
  0x26   : >> { %v1468_v30 = vunpack.c.l.bf16 %v12925_v23  ;;  %v1469_v31 = vunpack.c.h.bf16 %v12925_v23  ;;  %v228_v43 = vunpack.c.l.bf16 %v12935_v34  ;;  %v229_v44 = vunpack.c.h.bf16 %v12935_v34  ;;  %v9996_v60 = vld [vmem:[%s12914_s5 + $0xa8] sm:$0xff]  ;;  %v15359_v4 = vld [vmem:[#allocation9_spill] sm:$0xff]  ;;  %v15361_v6 = vld [vmem:[#allocation11_spill] sm:$0xff]  ;;  %s12640_s20 = scalar_lea.vmem (%p195_p12), %s15201_s25, 4096  ;;  %s12730_s12 = smov (%p195_p12), [#allocation2]  }
  0x27   : >> { %v242_v32 = vsub.f32 %v202_v18, %v226_v26  ;;  %v243_v33 = vsub.f32 %v203_v19, %v227_v27  ;;  %v1470_v47 = vunpack.c.l.bf16 %v12941_v38  ;;  %v1471_v48 = vunpack.c.h.bf16 %v12941_v38  ;;  %v15363_v9 = vld [vmem:[#allocation14_spill] sm:$0xff]  ;;  %v15364_v8 = vld [vmem:[#allocation13_spill] sm:$0xff]  ;;  %v212_v2 = vld [vmem:[%s12914_s5 + $0x50] sm:$0xff]  ;;  %p12641_p13 = scmp.ne.s32.totalorder (%p195_p12), %s15201_s25, %s12640_s20  ;;  %s12644_s26 = sshll.u32 (%p195_p12), %s12730_s12, 4  ;;  %s12645_s26 = int_to_ptr.vmem [resolvable:$false] %s12644_s26 }
  0x28   : >> { %v1484_v36 = vsub.f32 %v9991_v20, %v1468_v30  ;;  %v1485_v37 = vsub.f32 %v9992_v22, %v1469_v31  ;;  %v12965_v53 = vsub.f32 %v204_v24, %v228_v43  ;;  %v12967_v54 = vsub.f32 %v205_v25, %v229_v44  ;;  %v208_v30 = vld [vmem:[%s12914_s5 + $0x30] sm:$0xff]  ;;  %v209_v31 = vld [vmem:[%s12914_s5 + $0x38] sm:$0xff]  ;;  %v15378_v13 = vld [vmem:[#allocation18_spill] sm:$0xff]  ;;  %s12646_s27 = scalar_lea.vmem (%p195_p12), %s12645_s26, 8192  ;;  %p12647_p2 = scmp.lt.s32.totalorder (%p195_p12), %s15201_s25, %s12645_s26 }
  0x29   : >> { %v258_v39 = vpack.c.bf16 %v243_v33, %v242_v32  ;;  %v12969_v55 = vsub.f32 %v9993_v28, %v1470_v47  ;;  %v12971_v56 = vsub.f32 %v9994_v29, %v1471_v48  ;;  %v12981_v62 = vpack.c.bf16 %v207_v58, %v206_v57  ;;  %v213_v3 = vld [vmem:[%s12914_s5 + $0x58] sm:$0xff]  ;;  %v15371_v10 = vld [vmem:[#allocation15_spill] sm:$0xff]  ;;  %v15379_v12 = vld [vmem:[#allocation17_spill] sm:$0xff]  ;;  %p12642_p0 = pnand (%p195_p12), %p12641_p13, %p12788_p4  ;;  %p12648_p3 = scmp.lt.s32.totalorder (%p195_p12), %s12646_s27, %s12640_s20 }
  0x2a   : >> { %v1500_v40 = vpack.c.bf16 %v1485_v37, %v1484_v36  ;;  %v12979_v61 = vpack.c.bf16 %v12967_v54, %v12965_v53  ;;  %v12985_v63 = vcombine.low %v15359_v4, %v15358_v5  ;;  %v12991_v19 = vpack.c.bf16 %v9996_v60, %v9995_v59  ;;  %v10001_v4 = vld [vmem:[%s12914_s5 + $0xd0] sm:$0xff]  ;;  %v10002_v5 = vld [vmem:[%s12914_s5 + $0xd8] sm:$0xff] }
  0x2b   : >> { %v266_v41 = vunpack.c.l.bf16 %v258_v39  ;;  %v267_v42 = vunpack.c.h.bf16 %v258_v39  ;;  %10688 = vmatmul.mubr.msk.bf16.vlgmr.msra.gmra.mrb[0].mxu0 %vm312_vm1, %v258_v39  ;;  %v12989_v18 = vpack.c.bf16 %v12971_v56, %v12969_v55  ;;  %v230_v20 = vunpack.c.l.bf16 %v12981_v62  ;;  %v15370_v11 = vld [vmem:[#allocation16_spill] sm:$0xff]  ;;  %v15384_v14 = vld [vmem:[#allocation19_spill] sm:$0xff]  ;;  %p12643_p1 = pneg (%p195_p12), %p12642_p0  ;;  %p12649_p5 = por (%p195_p12), %p12648_p3, %p12647_p2 }
  0x2c   : >> { %10692 = vmatpush3.bf16.msra.mxu0 %v12939_v35  ;;  %v1508_v45 = vunpack.c.l.bf16 %v1500_v40  ;;  %v1509_v46 = vunpack.c.h.bf16 %v1500_v40  ;;  %10832 = vmatmul.mubr.msk.bf16.vlgmr.msra.gmra.mrb[0].mxu1 %vm312_vm1, %v1500_v40  ;;  %v231_v22 = vunpack.c.h.bf16 %v12981_v62  ;;  %v1472_v24 = vunpack.c.l.bf16 %v12991_v19  ;;  %v15383_v15 = vld [vmem:[#allocation20_spill] sm:$0xff] }
  0x2d   : >> { %v12950_v49 = vsub.f32 %v242_v32, %v266_v41  ;;  %v12952_v50 = vsub.f32 %v243_v33, %v267_v42  ;;  %10836 = vmatpush3.bf16.msra.mxu1 %v12939_v35  ;;  %10693 = vmatprep.mubr.msk.bf16.mxu0 %vm12729_vm0, %v12728_v17  ;;  %v1473_v25 = vunpack.c.h.bf16 %v12991_v19  ;;  %v13009_v26 = vsub.f32 %v206_v57, %v230_v20  ;;  %v9997_v32 = vld [vmem:[%s12914_s5 + $0xb0] sm:$0xff]  ;;  %v9998_v33 = vld [vmem:[%s12914_s5 + $0xb8] sm:$0xff]  ;;  %v10000_v20 = vld [vmem:[%s12914_s5 + $0xc8] sm:$0xff]  ;;  %p12650_p6 = pnand (%p195_p12), %p12649_p5, %p12643_p1 }
  0x2e   : >> { %v12957_v51 = vsub.f32 %v1484_v36, %v1508_v45  ;;  %v12959_v52 = vsub.f32 %v1485_v37, %v1509_v46  ;;  %10697 = vmatprep.subr.bf16.mxu0 %v12728_v17  ;;  %10837 = vmatprep.mubr.msk.bf16.mxu1 %vm12729_vm0, %v12728_v17  ;;  %v13011_v27 = vsub.f32 %v207_v58, %v231_v22  ;;  %v210_v58 = vld [vmem:[%s12914_s5 + $0x40] sm:$0xff] }
  0x2f   : >> { %10841 = vmatprep.subr.bf16.mxu1 %v12728_v17  ;;  %v13013_v28 = vsub.f32 %v9995_v59, %v1472_v24  ;;  %v13015_v29 = vsub.f32 %v9996_v60, %v1473_v25  ;;  %v13025_v37 = vpack.c.bf16 %v209_v31, %v208_v30  ;;  %v13029_v39 = vcombine.low %v15361_v6, %v15360_v7  ;;  %v211_v59 = vld [vmem:[%s12914_s5 + $0x48] sm:$0xff]  ;;  %v9999_v60 = vld [vmem:[%s12914_s5 + $0xc0] sm:$0xff] }
  0x30   : >> { %v13023_v36 = vpack.c.bf16 %v13011_v27, %v13009_v26  ;;  %v13035_v41 = vpack.c.bf16 %v9998_v33, %v9997_v32  ;;  %v13069_v24 = vpack.c.bf16 %v211_v59, %v210_v58  ;;  %v13073_v25 = vcombine.low %v15364_v8, %v15363_v9 }
  0x31   : >> { %v13033_v40 = vpack.c.bf16 %v13015_v29, %v13013_v28  ;;  %v232_v42 = vunpack.c.l.bf16 %v13025_v37  ;;  %v233_v43 = vunpack.c.h.bf16 %v13025_v37  ;;  %v13113_v7 = vpack.c.bf16 %v213_v3, %v212_v2 }
  0x32   : >> { %v1474_v44 = vunpack.c.l.bf16 %v13035_v41  ;;  %v1475_v45 = vunpack.c.h.bf16 %v13035_v41 }
  0x33   : >> { %v13053_v46 = vsub.f32 %v208_v30, %v232_v42  ;;  %v13055_v47 = vsub.f32 %v209_v31, %v233_v43  ;;  %v13079_v31 = vpack.c.bf16 %v10000_v20, %v9999_v60 }
  0x34   : >> { %v13057_v48 = vsub.f32 %v9997_v32, %v1474_v44  ;;  %v13059_v57 = vsub.f32 %v9998_v33, %v1475_v45  ;;  %v234_v32 = vunpack.c.l.bf16 %v13069_v24  ;;  %v235_v33 = vunpack.c.h.bf16 %v13069_v24 }
  0x35   : >> { %v13067_v22 = vpack.c.bf16 %v13055_v47, %v13053_v46  ;;  %v1476_v42 = vunpack.c.l.bf16 %v13079_v31  ;;  %v1477_v43 = vunpack.c.h.bf16 %v13079_v31 }
  0x36   : >> { %15362 = vst [vmem:[#allocation21_spill] sm:$0xff] %v13059_v57  ;;  %v13077_v30 = vpack.c.bf16 %v13059_v57, %v13057_v48  ;;  %v13097_v44 = vsub.f32 %v210_v58, %v234_v32  ;;  %v13099_v45 = vsub.f32 %v211_v59, %v235_v33  ;;  %v13117_v58 = vcombine.low %v15371_v10, %v15370_v11  ;;  %v214_v11 = vld [vmem:[%s12914_s5 + $0x60] sm:$0xff] }
  0x37   : >> { %10694 = vmatmul.mubr.msk.bf16.vlgmr.msra.gmra.mrb[0].mxu0 %vm312_vm1, %v12979_v61  ;;  %v13101_v0 = vsub.f32 %v9999_v60, %v1476_v42  ;;  %v13103_v1 = vsub.f32 %v10000_v20, %v1477_v43  ;;  %v13123_v60 = vpack.c.bf16 %v10002_v5, %v10001_v4  ;;  %v236_v20 = vunpack.c.l.bf16 %v13113_v7 }
  0x38   : >> { %10698 = vmatpush3.bf16.msra.mxu0 %v12985_v63  ;;  %10838 = vmatmul.mubr.msk.bf16.vlgmr.msra.gmra.mrb[0].mxu1 %vm312_vm1, %v12989_v18  ;;  %15365 = vst [vmem:[#allocation22_spill] sm:$0xff] %v13097_v44  ;;  %15366 = vst [vmem:[#allocation23_spill] sm:$0xff] %v13099_v45  ;;  %v13111_v6 = vpack.c.bf16 %v13099_v45, %v13097_v44  ;;  %v237_v32 = vunpack.c.h.bf16 %v13113_v7  ;;  %v10004_v45 = vld [vmem:[%s12914_s5 + $0xe8] sm:$0xff] }
  0x39   : >> { %10842 = vmatpush3.bf16.msra.mxu1 %v12985_v63  ;;  %10699 = vmatprep.mubr.msk.bf16.mxu0 %vm12729_vm0, %v12728_v17  ;;  %15367 = vst [vmem:[#allocation24_spill] sm:$0xff] %v13101_v0  ;;  %15368 = vst [vmem:[#allocation25_spill] sm:$0xff] %v13103_v1  ;;  %v13121_v59 = vpack.c.bf16 %v13103_v1, %v13101_v0  ;;  %v1478_v33 = vunpack.c.l.bf16 %v13123_v60  ;;  %v1479_v42 = vunpack.c.h.bf16 %v13123_v60  ;;  %v215_v1 = vld [vmem:[%s12914_s5 + $0x68] sm:$0xff]  ;;  %v10003_v0 = vld [vmem:[%s12914_s5 + $0xe0] sm:$0xff] }
  0x3a   : >> { %10703 = vmatprep.subr.bf16.mxu0 %v12728_v17  ;;  %10843 = vmatprep.mubr.msk.bf16.mxu1 %vm12729_vm0, %v12728_v17  ;;  %15369 = vst [vmem:[#allocation26_spill] sm:$0xff] %v13111_v6  ;;  %v13141_v43 = vsub.f32 %v212_v2, %v236_v20  ;;  %v13143_v8 = vsub.f32 %v213_v3, %v237_v32 }
  0x3b   : >> { %10847 = vmatprep.subr.bf16.mxu1 %v12728_v17  ;;  %15372 = vst [vmem:[#allocation27_spill] sm:$0xff] %v13121_v59  ;;  %v13145_v9 = vsub.f32 %v10001_v4, %v1478_v33  ;;  %v13147_v10 = vsub.f32 %v10002_v5, %v1479_v42  ;;  %v13163_v3 = vcombine.low %v15379_v12, %v15378_v13 }
  0x3c   : >> { %15373 = vst [vmem:[#allocation28_spill] sm:$0xff] %v13141_v43  ;;  %15374 = vst [vmem:[#allocation29_spill] sm:$0xff] %v13143_v8  ;;  %v13155_v44 = vpack.c.bf16 %v13143_v8, %v13141_v43  ;;  %v13169_v5 = vpack.c.bf16 %v10004_v45, %v10003_v0  ;;  %v216_v8 = vld [vmem:[%s12914_s5 + $0x70] sm:$0xff]  ;;  %v217_v43 = vld [vmem:[%s12914_s5 + $0x78] sm:$0xff] }
  0x3d   : >> { %15375 = vst [vmem:[#allocation30_spill] sm:$0xff] %v13145_v9  ;;  %15376 = vst [vmem:[#allocation31_spill] sm:$0xff] %v13147_v10  ;;  %v13167_v4 = vpack.c.bf16 %v13147_v10, %v13145_v9  ;;  %v13205_v57 = vpack.c.bf16 %v217_v43, %v216_v8 }
  0x3e   : >> { %15377 = vst [vmem:[#allocation32_spill] sm:$0xff] %v13155_v44  ;;  %v1480_v33 = vunpack.c.l.bf16 %v13169_v5  ;;  %v1481_v42 = vunpack.c.h.bf16 %v13169_v5 }
  0x3f   : >> { %15380 = vst [vmem:[#allocation33_spill] sm:$0xff] %v13167_v4 }
  0x40   : >> { %v13193_v10 = vsub.f32 %v10003_v0, %v1480_v33  ;;  %v13195_v9 = vsub.f32 %v10004_v45, %v1481_v42  ;;  %v240_v45 = vunpack.c.l.bf16 %v13205_v57 }
  0x42   : >> { %15381 = vst [vmem:[#allocation34_spill] sm:$0xff] %v13193_v10  ;;  %15382 = vst [vmem:[#allocation35_spill] sm:$0xff] %v13195_v9  ;;  %v13213_v0 = vpack.c.bf16 %v13195_v9, %v13193_v10  ;;  %v13233_v42 = vsub.f32 %v216_v8, %v240_v45  ;;  %v268_v8 = vunpack.c.l.bf16 %v12979_v61  ;;  %v15391_v45 = vld [vmem:[#allocation23_spill] sm:$0xff] }
  0x43   : >> { %10700 = vmatmul.mubr.msk.bf16.vlgmr.msra.gmra.mrb[0].mxu0 %vm312_vm1, %v13023_v36 }
  0x44   : >> { %10704 = vmatpush3.bf16.msra.mxu0 %v13029_v39  ;;  %10844 = vmatmul.mubr.msk.bf16.vlgmr.msra.gmra.mrb[0].mxu1 %vm312_vm1, %v13033_v40 }
  0x45   : >> { %10848 = vmatpush3.bf16.msra.mxu1 %v13029_v39  ;;  %10705 = vmatprep.mubr.msk.bf16.mxu0 %vm12729_vm0, %v12728_v17 }
  0x46   : >> { %10709 = vmatprep.subr.bf16.mxu0 %v12728_v17  ;;  %10849 = vmatprep.mubr.msk.bf16.mxu1 %vm12729_vm0, %v12728_v17 }
  0x47   : >> { %10853 = vmatprep.subr.bf16.mxu1 %v12728_v17 }
  0x4f   : >> { %10706 = vmatmul.mubr.msk.bf16.vlgmr.msra.gmra.mrb[0].mxu0 %vm312_vm1, %v13067_v22 }
  0x50   : >> { %10710 = vmatpush3.bf16.msra.mxu0 %v13073_v25  ;;  %10850 = vmatmul.mubr.msk.bf16.vlgmr.msra.gmra.mrb[0].mxu1 %vm312_vm1, %v13077_v30 }
  0x51   : >> { %10854 = vmatpush3.bf16.msra.mxu1 %v13073_v25  ;;  %10711 = vmatprep.mubr.msk.bf16.mxu0 %vm12729_vm0, %v12728_v17 }
  0x52   : >> { %10715 = vmatprep.subr.bf16.mxu0 %v12728_v17  ;;  %10855 = vmatprep.mubr.msk.bf16.mxu1 %vm12729_vm0, %v12728_v17 }
  0x53   : >> { %10859 = vmatprep.subr.bf16.mxu1 %v12728_v17 }
  0x5b   : >> { %10712 = vmatmul.mubr.msk.bf16.vlgmr.msra.gmra.mrb[0].mxu0 %vm312_vm1, %v13111_v6 }
  0x5c   : >> { %10716 = vmatpush3.bf16.msra.mxu0 %v13117_v58  ;;  %10856 = vmatmul.mubr.msk.bf16.vlgmr.msra.gmra.mrb[0].mxu1 %vm312_vm1, %v13121_v59  ;;  %v13157_v59 = vpack.c.bf16 %v215_v1, %v214_v11 }
  0x5d   : >> { %10860 = vmatpush3.bf16.msra.mxu1 %v13117_v58  ;;  %10717 = vmatprep.mubr.msk.bf16.mxu0 %vm12729_vm0, %v12728_v17 }
  0x5e   : >> { %10721 = vmatprep.subr.bf16.mxu0 %v12728_v17  ;;  %10861 = vmatprep.mubr.msk.bf16.mxu1 %vm12729_vm0, %v12728_v17  ;;  %v238_v20 = vunpack.c.l.bf16 %v13157_v59  ;;  %v239_v32 = vunpack.c.h.bf16 %v13157_v59 }
  0x5f   : >> { %10865 = vmatprep.subr.bf16.mxu1 %v12728_v17 }
  0x60   : >> { %v13189_v12 = vsub.f32 %v214_v11, %v238_v20  ;;  %v13191_v13 = vsub.f32 %v215_v1, %v239_v32  ;;  %v13209_v11 = vcombine.low %v15384_v14, %v15383_v15  ;;  %v241_v20 = vunpack.c.h.bf16 %v13205_v57 }
  0x62   : >> { %v13203_v6 = vpack.c.bf16 %v13191_v13, %v13189_v12  ;;  %v13235_v2 = vsub.f32 %v217_v43, %v241_v20 }
  0x64   : >> { %v13243_v9 = vpack.c.bf16 %v13235_v2, %v13233_v42 }
  0x67   : >> { %10718 = vmatmul.mubr.msk.bf16.vlgmr.msra.gmra.mrb[0].mxu0 %vm312_vm1, %v13155_v44  ;;  %v10006_v44 = vld [vmem:[%s12914_s5 + $0xf8] sm:$0xff] }
  0x68   : >> { %10722 = vmatpush3.bf16.msra.mxu0 %v13163_v3  ;;  %10862 = vmatmul.mubr.msk.bf16.vlgmr.msra.gmra.mrb[0].mxu1 %vm312_vm1, %v13167_v4  ;;  %v10005_v4 = vld [vmem:[%s12914_s5 + $0xf0] sm:$0xff] }
  0x69   : >> { %10866 = vmatpush3.bf16.msra.mxu1 %v13163_v3  ;;  %10723 = vmatprep.mubr.msk.bf16.mxu0 %vm12729_vm0, %v12728_v17  ;;  %v13215_v1 = vpack.c.bf16 %v10006_v44, %v10005_v4 }
  0x6a   : >> { %10727 = vmatprep.subr.bf16.mxu0 %v12728_v17  ;;  %10867 = vmatprep.mubr.msk.bf16.mxu1 %vm12729_vm0, %v12728_v17 }
  0x6b   : >> { %10871 = vmatprep.subr.bf16.mxu1 %v12728_v17  ;;  %v1482_v32 = vunpack.c.l.bf16 %v13215_v1  ;;  %v1483_v33 = vunpack.c.h.bf16 %v13215_v1 }
  0x6d   : >> { %v13237_v14 = vsub.f32 %v10005_v4, %v1482_v32  ;;  %v13239_v15 = vsub.f32 %v10006_v44, %v1483_v33  ;;  %v15392_v32 = vld [vmem:[#allocation24_spill] sm:$0xff] }
  0x6f   : >> { %v13247_v10 = vpack.c.bf16 %v13239_v15, %v13237_v14 }
  0x73   : >> { %10724 = vmatmul.mubr.msk.bf16.vlgmr.msra.gmra.mrb[0].mxu0 %vm312_vm1, %v13203_v6 }
  0x74   : >> { %10728 = vmatpush3.bf16.msra.mxu0 %v13209_v11  ;;  %10868 = vmatmul.mubr.msk.bf16.vlgmr.msra.gmra.mrb[0].mxu1 %vm312_vm1, %v13213_v0 }
  0x75   : >> { %10872 = vmatpush3.bf16.msra.mxu1 %v13209_v11  ;;  %10729 = vmatprep.mubr.msk.bf16.mxu0 %vm12729_vm0, %v12728_v17 }
  0x76   : >> { %10733 = vmatprep.subr.bf16.mxu0 %v12728_v17  ;;  %10873 = vmatprep.mubr.msk.bf16.mxu1 %vm12729_vm0, %v12728_v17 }
  0x77   : >> { %10877 = vmatprep.subr.bf16.mxu1 %v12728_v17 }
  0x7f   : >> { %10730 = vmatmul.mubr.msk.bf16.vlgmr.msra.gmra.mrb[0].mxu0 %vm312_vm1, %v13243_v9 }
  0x80   : >> { %10734 = vmatpush3.bf16.msra.mxu0 %v12903_v16  ;;  %10874 = vmatmul.mubr.msk.bf16.vlgmr.msra.gmra.mrb[0].mxu1 %vm312_vm1, %v13247_v10 }
  0x81   : >> { %10878 = vmatpush3.bf16.msra.mxu1 %v12903_v16  ;;  %10735 = vmatprep.mubr.msk.bf16.mxu0 %vm12729_vm0, %v12728_v17 }
  0x82   : >> { %10739 = vmatprep.subr.bf16.mxu0 %v12728_v17  ;;  %10879 = vmatprep.mubr.msk.bf16.mxu1 %vm12729_vm0, %v12728_v17 }
  0x83   : >> { %10883 = vmatprep.subr.bf16.mxu1 %v12728_v17 }
  0x8b   : >> { %10736 = vmatmul.mubr.msk.bf16.vlgmr.msra.gmra.mrb[0].mxu0 %vm312_vm1, %v12922_v21  ;;  %v269_v21 = vunpack.c.h.bf16 %v12979_v61 }
  0x8c   : >> { %10740 = vmatpush3.bf16.msra.mxu0 %v12939_v35  ;;  %10880 = vmatmul.mubr.msk.bf16.vlgmr.msra.gmra.mrb[0].mxu1 %vm312_vm1, %v12925_v23  ;;  %v15386_v23 = vpack.c.bf16 %v12959_v52, %v12957_v51 }
  0x8d   : >> { %10884 = vmatpush3.bf16.msra.mxu1 %v12939_v35  ;;  %10741 = vmatprep.mubr.msk.bf16.mxu0 %vm12729_vm0, %v12728_v17 }
  0x8e   : >> { %10745 = vmatprep.subr.bf16.mxu0 %v12728_v17  ;;  %10885 = vmatprep.mubr.msk.bf16.mxu1 %vm12729_vm0, %v12728_v17 }
  0x8f   : >> { %10889 = vmatprep.subr.bf16.mxu1 %v12728_v17 }
  0x97   : >> { %10742 = vmatmul.mubr.msk.bf16.vlgmr.msra.gmra.mrb[0].mxu0 %vm312_vm1, %v12935_v34  ;;  %v1510_v34 = vunpack.c.l.bf16 %v12989_v18 }
  0x98   : >> { %10746 = vmatpush3.bf16.msra.mxu0 %v12985_v63  ;;  %10886 = vmatmul.mubr.msk.bf16.vlgmr.msra.gmra.mrb[0].mxu1 %vm312_vm1, %v12941_v38  ;;  %v1511_v38 = vunpack.c.h.bf16 %v12989_v18  ;;  %v270_v18 = vunpack.c.l.bf16 %v13023_v36 }
  0x99   : >> { %10890 = vmatpush3.bf16.msra.mxu1 %v12985_v63  ;;  %10747 = vmatprep.mubr.msk.bf16.mxu0 %vm12729_vm0, %v12728_v17  ;;  %v1526_v51 = vsub.f32 %v12969_v55, %v1510_v34  ;;  %v15394_v34 = vld [vmem:[#allocation32_spill] sm:$0xff] }
  0x9a   : >> { %10751 = vmatprep.subr.bf16.mxu0 %v12728_v17  ;;  %10891 = vmatprep.mubr.msk.bf16.mxu1 %vm12729_vm0, %v12728_v17  ;;  %v1527_v52 = vsub.f32 %v12971_v56, %v1511_v38  ;;  %v286_v55 = vsub.f32 %v13009_v26, %v270_v18  ;;  %v1514_v26 = vunpack.c.l.bf16 %v13077_v30  ;;  %v276_v38 = vunpack.c.l.bf16 %v15394_v34  ;;  %v15397_v18 = vld [vmem:[#allocation29_spill] sm:$0xff] }
  0x9b   : >> { %10895 = vmatprep.subr.bf16.mxu1 %v12728_v17 }
  0xa3   : >> { %10748 = vmatmul.mubr.msk.bf16.vlgmr.msra.gmra.mrb[0].mxu0 %vm312_vm1, %v12981_v62  ;;  %v1541_v62 = vpack.c.bf16 %v1527_v52, %v1526_v51 }
  0xa4   : >> { %10752 = vmatpush3.bf16.msra.mxu0 %v13029_v39  ;;  %10892 = vmatmul.mubr.msk.bf16.vlgmr.msra.gmra.mrb[0].mxu1 %vm312_vm1, %v12991_v19  ;;  %v271_v19 = vunpack.c.h.bf16 %v13023_v36 }
  0xa5   : >> { %10896 = vmatpush3.bf16.msra.mxu1 %v13029_v39  ;;  %10753 = vmatprep.mubr.msk.bf16.mxu0 %vm12729_vm0, %v12728_v17 }
  0xa6   : >> { %10757 = vmatprep.subr.bf16.mxu0 %v12728_v17  ;;  %10897 = vmatprep.mubr.msk.bf16.mxu1 %vm12729_vm0, %v12728_v17  ;;  %v287_v56 = vsub.f32 %v13011_v27, %v271_v19  ;;  %v1515_v27 = vunpack.c.h.bf16 %v13077_v30 }
  0xa7   : >> { %10901 = vmatprep.subr.bf16.mxu1 %v12728_v17 }
  0xaf   : >> { %10754 = vmatmul.mubr.msk.bf16.vlgmr.msra.gmra.mrb[0].mxu0 %vm312_vm1, %v13025_v37 }
  0xb0   : >> { %10758 = vmatpush3.bf16.msra.mxu0 %v13073_v25  ;;  %10898 = vmatmul.mubr.msk.bf16.vlgmr.msra.gmra.mrb[0].mxu1 %vm312_vm1, %v13035_v41 }
  0xb1   : >> { %10902 = vmatpush3.bf16.msra.mxu1 %v13073_v25  ;;  %10759 = vmatprep.mubr.msk.bf16.mxu0 %vm12729_vm0, %v12728_v17 }
  0xb2   : >> { %10763 = vmatprep.subr.bf16.mxu0 %v12728_v17  ;;  %10903 = vmatprep.mubr.msk.bf16.mxu1 %vm12729_vm0, %v12728_v17 }
  0xb3   : >> { %10907 = vmatprep.subr.bf16.mxu1 %v12728_v17 }
  0xbb   : >> { %10760 = vmatmul.mubr.msk.bf16.vlgmr.msra.gmra.mrb[0].mxu0 %vm312_vm1, %v13069_v24  ;;  %v273_v24 = vunpack.c.h.bf16 %v13067_v22 }
  0xbc   : >> { %10764 = vmatpush3.bf16.msra.mxu0 %v13117_v58  ;;  %10904 = vmatmul.mubr.msk.bf16.vlgmr.msra.gmra.mrb[0].mxu1 %vm312_vm1, %v13079_v31  ;;  %v15387_v31 = vld [vmem:[#allocation21_spill] sm:$0xff] }
  0xbd   : >> { %10908 = vmatpush3.bf16.msra.mxu1 %v13117_v58  ;;  %10765 = vmatprep.mubr.msk.bf16.mxu0 %vm12729_vm0, %v12728_v17  ;;  %v1531_v30 = vsub.f32 %v15387_v31, %v1515_v27  ;;  %v15400_v27 = vld [vmem:[#allocation34_spill] sm:$0xff] }
  0xbe   : >> { %10769 = vmatprep.subr.bf16.mxu0 %v12728_v17  ;;  %10909 = vmatprep.mubr.msk.bf16.mxu1 %vm12729_vm0, %v12728_v17 }
  0xbf   : >> { %10913 = vmatprep.subr.bf16.mxu1 %v12728_v17 }
  0xc7   : >> { %10766 = vmatmul.mubr.msk.bf16.vlgmr.msra.gmra.mrb[0].mxu0 %vm312_vm1, %v13113_v7  ;;  %v15385_v7 = vpack.c.bf16 %v12952_v50, %v12950_v49  ;;  %v284_v49 = vsub.f32 %v12965_v53, %v268_v8  ;;  %v285_v50 = vsub.f32 %v12967_v54, %v269_v21  ;;  %v1512_v53 = vunpack.c.l.bf16 %v13033_v40 }
  0xc8   : >> { %10770 = vmatpush3.bf16.msra.mxu0 %v13163_v3  ;;  %10910 = vmatmul.mubr.msk.bf16.vlgmr.msra.gmra.mrb[0].mxu1 %vm312_vm1, %v13123_v60  ;;  %v1513_v54 = vunpack.c.h.bf16 %v13033_v40  ;;  %v300_v40 = vpack.c.bf16 %v287_v56, %v286_v55  ;;  %v15388_v60 = vld [vmem:[#allocation26_spill] sm:$0xff]  ;;  %v15399_v55 = vld [vmem:[#allocation31_spill] sm:$0xff] }
  0xc9   : >> { %10914 = vmatpush3.bf16.msra.mxu1 %v13163_v3  ;;  %10771 = vmatprep.mubr.msk.bf16.mxu0 %vm12729_vm0, %v12728_v17  ;;  %v299_v61 = vpack.c.bf16 %v285_v50, %v284_v49  ;;  %v1528_v36 = vsub.f32 %v13013_v28, %v1512_v53  ;;  %v274_v43 = vunpack.c.l.bf16 %v15388_v60  ;;  %v275_v4 = vunpack.c.h.bf16 %v15388_v60  ;;  %v15395_v50 = vld [vmem:[#allocation33_spill] sm:$0xff]  ;;  %v15398_v53 = vld [vmem:[#allocation30_spill] sm:$0xff] }
  0xca   : >> { %10775 = vmatprep.subr.bf16.mxu0 %v12728_v17  ;;  %10915 = vmatprep.mubr.msk.bf16.mxu1 %vm12729_vm0, %v12728_v17  ;;  %v1529_v37 = vsub.f32 %v13015_v29, %v1513_v54  ;;  %v289_v29 = vsub.f32 %v13055_v47, %v273_v24  ;;  %v277_v49 = vunpack.c.h.bf16 %v15394_v34  ;;  %v1518_v51 = vunpack.c.l.bf16 %v15395_v50  ;;  %v10034_v60 = vld [vmem:[%s12914_s5 + $0x108] sm:$0xff]  ;;  %v10078_v34 = vld [vmem:[%s12914_s5 + $0x198] sm:$0xff] }
  0xcb   : >> { %10919 = vmatprep.subr.bf16.mxu1 %v12728_v17  ;;  %v291_v20 = vsub.f32 %v15391_v45, %v275_v4  ;;  %v1519_v52 = vunpack.c.h.bf16 %v15395_v50  ;;  %v1521_v24 = vunpack.c.h.bf16 %v13213_v0  ;;  %v10076_v4 = vld [vmem:[%s12914_s5 + $0x188] sm:$0xff] }
  0xcc   : >> { %v1542_v41 = vpack.c.bf16 %v1529_v37, %v1528_v36  ;;  %v293_v19 = vsub.f32 %v15397_v18, %v277_v49  ;;  %v1534_v54 = vsub.f32 %v15398_v53, %v1518_v51 }
  0xcd   : >> { %v1535_v56 = vsub.f32 %v15399_v55, %v1519_v52 }
  0xcf   : >> { %v1545_v37 = vpack.c.bf16 %v1535_v56, %v1534_v54  ;;  %v10037_v56 = vld [vmem:[%s12914_s5 + $0x120] sm:$0xff] }
  0xd3   : >> { %10772 = vmatmul.mubr.msk.bf16.vlgmr.msra.gmra.mrb[0].mxu0 %vm312_vm1, %v13157_v59 }
  0xd4   : >> { %10776 = vmatpush3.bf16.msra.mxu0 %v13209_v11  ;;  %10916 = vmatmul.mubr.msk.bf16.vlgmr.msra.gmra.mrb[0].mxu1 %vm312_vm1, %v13169_v5  ;;  %v15389_v5 = vld [vmem:[#allocation27_spill] sm:$0xff] }
  0xd5   : >> { %10920 = vmatpush3.bf16.msra.mxu1 %v13209_v11  ;;  %10777 = vmatprep.mubr.msk.bf16.mxu0 %vm12729_vm0, %v12728_v17  ;;  %v1517_v47 = vunpack.c.h.bf16 %v15389_v5 }
  0xd6   : >> { %10781 = vmatprep.subr.bf16.mxu0 %v12728_v17  ;;  %10921 = vmatprep.mubr.msk.bf16.mxu1 %vm12729_vm0, %v12728_v17 }
  0xd7   : >> { %10925 = vmatprep.subr.bf16.mxu1 %v12728_v17 }
  0xdf   : >> { %10778 = vmatmul.mubr.msk.bf16.vlgmr.msra.gmra.mrb[0].mxu0 %vm312_vm1, %v13205_v57  ;;  %v272_v57 = vunpack.c.l.bf16 %v13067_v22  ;;  %v1530_v22 = vsub.f32 %v13057_v48, %v1514_v26  ;;  %v15390_v48 = vld [vmem:[#allocation22_spill] sm:$0xff] }
  0xe0   : >> { %10782 = vmatpush3.bf16.msra.mxu0 %v12903_v16  ;;  %10922 = vmatmul.mubr.msk.bf16.vlgmr.msra.gmra.mrb[0].mxu1 %vm312_vm1, %v13215_v1  ;;  %v290_v1 = vsub.f32 %v15390_v48, %v274_v43  ;;  %v10075_v43 = vld [vmem:[%s12914_s5 + $0x180] sm:$0xff] }
  0xe1   : >> { %10926 = vmatpush3.bf16.msra.mxu1 %v12903_v16  ;;  %10783 = vmatprep.mubr.msk.bf16.mxu0 %vm12729_vm0, %v12728_v17  ;;  %v288_v28 = vsub.f32 %v13053_v46, %v272_v57  ;;  %v1543_v59 = vpack.c.bf16 %v1531_v30, %v1530_v22  ;;  %v1516_v46 = vunpack.c.l.bf16 %v15389_v5  ;;  %v1520_v57 = vunpack.c.l.bf16 %v13213_v0 }
  0xe2   : >> { %10787 = vmatprep.subr.bf16.mxu0 %v12728_v17  ;;  %10927 = vmatprep.mubr.msk.bf16.mxu1 %vm12729_vm0, %v12728_v17  ;;  %v302_v21 = vpack.c.bf16 %v291_v20, %v290_v1  ;;  %v280_v30 = vunpack.c.l.bf16 %v13243_v9  ;;  %v13495_v48 = vpack.c.bf16 %v10076_v4, %v10075_v43 }
  0xe3   : >> { %10931 = vmatprep.subr.bf16.mxu1 %v12728_v17  ;;  %v301_v44 = vpack.c.bf16 %v289_v29, %v288_v28  ;;  %v1532_v33 = vsub.f32 %v15392_v32, %v1516_v46  ;;  %v1536_v0 = vsub.f32 %v15400_v27, %v1520_v57  ;;  %v15401_v28 = vld [vmem:[#allocation35_spill] sm:$0xff] }
  0xe4   : >> { %v1537_v29 = vsub.f32 %v15401_v28, %v1521_v24  ;;  %v3855_v32 = vunpack.c.h.bf16 %v13495_v48 }
  0xe6   : >> { %v1546_v31 = vpack.c.bf16 %v1537_v29, %v1536_v0 }
  0xeb   : >> { %10784 = vmatmul.mubr.msk.bf16.vlgmr.msra.gmra.mrb[0].mxu0 %vm312_vm1, %v15385_v7  ;;  %v15393_v7 = vld [vmem:[#allocation25_spill] sm:$0xff] }
  0xec   : >> { %10788 = vmatpush3.bf16.msra.mxu0 %v12939_v35  ;;  %10928 = vmatmul.mubr.msk.bf16.vlgmr.msra.gmra.mrb[0].mxu1 %vm312_vm1, %v15386_v23  ;;  %v1533_v8 = vsub.f32 %v15393_v7, %v1517_v47  ;;  %v13510_v7 = vsub.f32 %v10076_v4, %v3855_v32  ;;  %v10041_v32 = vld [vmem:[%s12914_s5 + $0x140] sm:$0xff] }
  0xed   : >> { %10932 = vmatpush3.bf16.msra.mxu1 %v12939_v35  ;;  %10789 = vmatprep.mubr.msk.bf16.mxu0 %vm12729_vm0, %v12728_v17 }
  0xee   : >> { %10793 = vmatprep.subr.bf16.mxu0 %v12728_v17  ;;  %10933 = vmatprep.mubr.msk.bf16.mxu1 %vm12729_vm0, %v12728_v17  ;;  %v1544_v23 = vpack.c.bf16 %v1533_v8, %v1532_v33  ;;  %v10035_v8 = vld [vmem:[%s12914_s5 + $0x110] sm:$0xff] }
  0xef   : >> { %10937 = vmatprep.subr.bf16.mxu1 %v12728_v17 }
  0xf7   : >> { %10790 = vmatmul.mubr.msk.bf16.vlgmr.msra.gmra.mrb[0].mxu0 %vm312_vm1, %v299_v61  ;;  %v15396_v61 = vld [vmem:[#allocation28_spill] sm:$0xff] }
  0xf8   : >> { %10794 = vmatpush3.bf16.msra.mxu0 %v12985_v63  ;;  %10934 = vmatmul.mubr.msk.bf16.vlgmr.msra.gmra.mrb[0].mxu1 %vm312_vm1, %v1541_v62  ;;  %v292_v62 = vsub.f32 %v15396_v61, %v276_v38 }
  0xf9   : >> { %10938 = vmatpush3.bf16.msra.mxu1 %v12985_v63  ;;  %10795 = vmatprep.mubr.msk.bf16.mxu0 %vm12729_vm0, %v12728_v17 }
  0xfa   : >> { %10799 = vmatprep.subr.bf16.mxu0 %v12728_v17  ;;  %10939 = vmatprep.mubr.msk.bf16.mxu1 %vm12729_vm0, %v12728_v17  ;;  %v303_v36 = vpack.c.bf16 %v293_v19, %v292_v62 }
  0xfb   : >> { %10943 = vmatprep.subr.bf16.mxu1 %v12728_v17 }
 0x103   : >> { %10796 = vmatmul.mubr.msk.bf16.vlgmr.msra.gmra.mrb[0].mxu0 %vm312_vm1, %v300_v40  ;;  %v278_v40 = vunpack.c.l.bf16 %v13203_v6 }
 0x104   : >> { %10800 = vmatpush3.bf16.msra.mxu0 %v13029_v39  ;;  %10940 = vmatmul.mubr.msk.bf16.vlgmr.msra.gmra.mrb[0].mxu1 %vm312_vm1, %v1542_v41  ;;  %v279_v41 = vunpack.c.h.bf16 %v13203_v6 }
 0x105   : >> { %10944 = vmatpush3.bf16.msra.mxu1 %v13029_v39  ;;  %10801 = vmatprep.mubr.msk.bf16.mxu0 %vm12729_vm0, %v12728_v17  ;;  %v294_v6 = vsub.f32 %v13189_v12, %v278_v40  ;;  %v1522_v12 = vunpack.c.l.bf16 %v13247_v10  ;;  %v10080_v40 = vld [vmem:[%s12914_s5 + $0x1a8] sm:$0xff] }
 0x106   : >> { %10805 = vmatprep.subr.bf16.mxu0 %v12728_v17  ;;  %10945 = vmatprep.mubr.msk.bf16.mxu1 %vm12729_vm0, %v12728_v17  ;;  %v295_v26 = vsub.f32 %v13191_v13, %v279_v41  ;;  %v1523_v13 = vunpack.c.h.bf16 %v13247_v10 }
 0x107   : >> { %10949 = vmatprep.subr.bf16.mxu1 %v12728_v17  ;;  %v1538_v46 = vsub.f32 %v13237_v14, %v1522_v12  ;;  %v10040_v12 = vld [vmem:[%s12914_s5 + $0x138] sm:$0xff] }
 0x108   : >> { %v304_v22 = vpack.c.bf16 %v295_v26, %v294_v6  ;;  %v1539_v47 = vsub.f32 %v13239_v15, %v1523_v13  ;;  %v10081_v13 = vld [vmem:[%s12914_s5 + $0x1b0] sm:$0xff] }
 0x10f   : >> { %10802 = vmatmul.mubr.msk.bf16.vlgmr.msra.gmra.mrb[0].mxu0 %vm312_vm1, %v301_v44  ;;  %v281_v44 = vunpack.c.h.bf16 %v13243_v9  ;;  %v296_v9 = vsub.f32 %v13233_v42, %v280_v30  ;;  %v1547_v42 = vpack.c.bf16 %v1539_v47, %v1538_v46 }
 0x110   : >> { %10806 = vmatpush3.bf16.msra.mxu0 %v13073_v25  ;;  %10946 = vmatmul.mubr.msk.bf16.vlgmr.msra.gmra.mrb[0].mxu1 %vm312_vm1, %v1543_v59  ;;  %v10033_v59 = vld [vmem:[%s12914_s5 + $0x100] sm:$0xff] }
 0x111   : >> { %10950 = vmatpush3.bf16.msra.mxu1 %v13073_v25  ;;  %10807 = vmatprep.mubr.msk.bf16.mxu0 %vm12729_vm0, %v12728_v17  ;;  %v297_v10 = vsub.f32 %v13235_v2, %v281_v44  ;;  %v13491_v5 = vpack.c.bf16 %v10034_v60, %v10033_v59  ;;  %v3854_v2 = vunpack.c.l.bf16 %v13495_v48  ;;  %v10039_v44 = vld [vmem:[%s12914_s5 + $0x130] sm:$0xff] }
 0x112   : >> { %10811 = vmatprep.subr.bf16.mxu0 %v12728_v17  ;;  %10951 = vmatprep.mubr.msk.bf16.mxu1 %vm12729_vm0, %v12728_v17 }
 0x113   : >> { %10955 = vmatprep.subr.bf16.mxu1 %v12728_v17  ;;  %v305_v1 = vpack.c.bf16 %v297_v10, %v296_v9  ;;  %v2661_v45 = vunpack.c.l.bf16 %v13491_v5  ;;  %v2662_v20 = vunpack.c.h.bf16 %v13491_v5  ;;  %v13508_v33 = vsub.f32 %v10075_v43, %v3854_v2 }
 0x114   : >> { %v13607_v43 = vpack.c.bf16 %v10040_v12, %v10039_v44 }
 0x115   : >> { %v13502_v14 = vsub.f32 %v10033_v59, %v2661_v45  ;;  %v13504_v15 = vsub.f32 %v10034_v60, %v2662_v20  ;;  %v13531_v50 = vpack.c.bf16 %v13510_v7, %v13508_v33  ;;  %v10082_v59 = vld [vmem:[%s12914_s5 + $0x1b8] sm:$0xff] }
 0x116   : >> { %v13613_v9 = vpack.c.bf16 %v10082_v59, %v10081_v13  ;;  %v2667_v10 = vunpack.c.l.bf16 %v13607_v43  ;;  %v2668_v46 = vunpack.c.h.bf16 %v13607_v43 }
 0x117   : >> { %v13525_v38 = vpack.c.bf16 %v13504_v15, %v13502_v14 }
 0x118   : >> { %v3860_v47 = vunpack.c.l.bf16 %v13613_v9  ;;  %v13631_v45 = vsub.f32 %v10039_v44, %v2667_v10  ;;  %v13633_v20 = vsub.f32 %v10040_v12, %v2668_v46  ;;  %v10044_v44 = vld [vmem:[%s12914_s5 + $0x158] sm:$0xff]  ;;  %v10085_v12 = vld [vmem:[%s12914_s5 + $0x1d0] sm:$0xff] }
 0x11b   : >> { %10808 = vmatmul.mubr.msk.bf16.vlgmr.msra.gmra.mrb[0].mxu0 %vm312_vm1, %v302_v21  ;;  %v10036_v21 = vld [vmem:[%s12914_s5 + $0x118] sm:$0xff] }
 0x11c   : >> { %10812 = vmatpush3.bf16.msra.mxu0 %v13117_v58  ;;  %10952 = vmatmul.mubr.msk.bf16.vlgmr.msra.gmra.mrb[0].mxu1 %vm312_vm1, %v1544_v23  ;;  %v10077_v23 = vld [vmem:[%s12914_s5 + $0x190] sm:$0xff]  ;;  %v13527_v49 = vpack.c.bf16 %v10036_v21, %v10035_v8 }
 0x11d   : >> { %10956 = vmatpush3.bf16.msra.mxu1 %v13117_v58  ;;  %10813 = vmatprep.mubr.msk.bf16.mxu0 %vm12729_vm0, %v12728_v17  ;;  %v13533_v51 = vpack.c.bf16 %v10078_v34, %v10077_v23 }
 0x11e   : >> { %10817 = vmatprep.subr.bf16.mxu0 %v12728_v17  ;;  %10957 = vmatprep.mubr.msk.bf16.mxu1 %vm12729_vm0, %v12728_v17  ;;  %v2663_v52 = vunpack.c.l.bf16 %v13527_v49  ;;  %v2664_v61 = vunpack.c.h.bf16 %v13527_v49 }
 0x11f   : >> { %10961 = vmatprep.subr.bf16.mxu1 %v12728_v17  ;;  %v3856_v62 = vunpack.c.l.bf16 %v13533_v51  ;;  %v3857_v18 = vunpack.c.h.bf16 %v13533_v51 }
 0x120   : >> { %v13551_v19 = vsub.f32 %v10035_v8, %v2663_v52  ;;  %v13553_v53 = vsub.f32 %v10036_v21, %v2664_v61  ;;  %v10042_v8 = vld [vmem:[%s12914_s5 + $0x148] sm:$0xff]  ;;  %v10083_v21 = vld [vmem:[%s12914_s5 + $0x1c0] sm:$0xff] }
 0x121   : >> { %v13555_v54 = vsub.f32 %v10077_v23, %v3856_v62  ;;  %v13557_v55 = vsub.f32 %v10078_v34, %v3857_v18  ;;  %v10084_v23 = vld [vmem:[%s12914_s5 + $0x1c8] sm:$0xff]  ;;  %v13645_v34 = vpack.c.bf16 %v13633_v20, %v13631_v45  ;;  %v13647_v52 = vpack.c.bf16 %v10042_v8, %v10041_v32 }
 0x122   : >> { %v13565_v41 = vpack.c.bf16 %v13553_v53, %v13551_v19  ;;  %v13653_v62 = vpack.c.bf16 %v10084_v23, %v10083_v21 }
 0x123   : >> { %v13571_v24 = vpack.c.bf16 %v13557_v55, %v13555_v54  ;;  %v2669_v18 = vunpack.c.l.bf16 %v13647_v52 }
 0x127   : >> { %10814 = vmatmul.mubr.msk.bf16.vlgmr.msra.gmra.mrb[0].mxu0 %vm312_vm1, %v303_v36  ;;  %v10038_v36 = vld [vmem:[%s12914_s5 + $0x128] sm:$0xff] }
 0x128   : >> { %10818 = vmatpush3.bf16.msra.mxu0 %v13163_v3  ;;  %10958 = vmatmul.mubr.msk.bf16.vlgmr.msra.gmra.mrb[0].mxu1 %vm312_vm1, %v1545_v37  ;;  %v10079_v37 = vld [vmem:[%s12914_s5 + $0x1a0] sm:$0xff]  ;;  %v13567_v57 = vpack.c.bf16 %v10038_v36, %v10037_v56 }
 0x129   : >> { %10962 = vmatpush3.bf16.msra.mxu1 %v13163_v3  ;;  %10819 = vmatprep.mubr.msk.bf16.mxu0 %vm12729_vm0, %v12728_v17  ;;  %v13573_v6 = vpack.c.bf16 %v10080_v40, %v10079_v37 }
 0x12a   : >> { %10823 = vmatprep.subr.bf16.mxu0 %v12728_v17  ;;  %10963 = vmatprep.mubr.msk.bf16.mxu1 %vm12729_vm0, %v12728_v17  ;;  %v2665_v26 = vunpack.c.l.bf16 %v13567_v57  ;;  %v2666_v27 = vunpack.c.h.bf16 %v13567_v57 }
 0x12b   : >> { %10967 = vmatprep.subr.bf16.mxu1 %v12728_v17  ;;  %v3858_v0 = vunpack.c.l.bf16 %v13573_v6  ;;  %v3859_v28 = vunpack.c.h.bf16 %v13573_v6 }
 0x12c   : >> { %v13591_v29 = vsub.f32 %v10037_v56, %v2665_v26  ;;  %v2670_v56 = vunpack.c.h.bf16 %v13647_v52 }
 0x12d   : >> { %v13597_v30 = vsub.f32 %v10080_v40, %v3859_v28  ;;  %v13671_v40 = vsub.f32 %v10041_v32, %v2669_v18  ;;  %v10043_v28 = vld [vmem:[%s12914_s5 + $0x150] sm:$0xff] }
 0x12e   : >> { %v13673_v26 = vsub.f32 %v10042_v8, %v2670_v56  ;;  %v13687_v10 = vpack.c.bf16 %v10044_v44, %v10043_v28 }
 0x12f   : >> { %15403 = vst [vmem:[#allocation26_spill] sm:$0xff] %v13671_v40 }
 0x130   : >> { %15404 = vst [vmem:[#allocation27_spill] sm:$0xff] %v13673_v26  ;;  %v2672_v32 = vunpack.c.h.bf16 %v13687_v10 }
 0x132   : >> { %v13713_v18 = vsub.f32 %v10044_v44, %v2672_v32 }
 0x133   : >> { %10820 = vmatmul.mubr.msk.bf16.vlgmr.msra.gmra.mrb[0].mxu0 %vm312_vm1, %v304_v22  ;;  %v13593_v22 = vsub.f32 %v10038_v36, %v2666_v27  ;;  %v3862_v36 = vunpack.c.l.bf16 %v13653_v62 }
 0x134   : >> { %10824 = vmatpush3.bf16.msra.mxu0 %v13209_v11  ;;  %10964 = vmatmul.mubr.msk.bf16.vlgmr.msra.gmra.mrb[0].mxu1 %vm312_vm1, %v1546_v31  ;;  %v13595_v31 = vsub.f32 %v10079_v37, %v3858_v0  ;;  %v3863_v37 = vunpack.c.h.bf16 %v13653_v62  ;;  %15410 = vst [vmem:[#allocation33_spill] sm:$0xff] %v13713_v18 }
 0x135   : >> { %10968 = vmatpush3.bf16.msra.mxu1 %v13209_v11  ;;  %10825 = vmatprep.mubr.msk.bf16.mxu0 %vm12729_vm0, %v12728_v17  ;;  %v13605_v60 = vpack.c.bf16 %v13593_v22, %v13591_v29  ;;  %v13675_v27 = vsub.f32 %v10083_v21, %v3862_v36 }
 0x136   : >> { %10969 = vmatprep.mubr.msk.bf16.mxu1 %vm12729_vm0, %v12728_v17  ;;  %10973 = vmatprep.subr.bf16.mxu0 %v12728_v17  ;;  %v13611_v4 = vpack.c.bf16 %v13597_v30, %v13595_v31  ;;  %v13677_v0 = vsub.f32 %v10084_v23, %v3863_v37  ;;  %v10045_v37 = vld [vmem:[%s12914_s5 + $0x160] sm:$0xff] }
 0x137   : >> { %11117 = vmatprep.subr.bf16.mxu1 %v12728_v17  ;;  %15405 = vst [vmem:[#allocation22_spill] sm:$0xff] %v13675_v27 }
 0x138   : >> { %15406 = vst [vmem:[#allocation23_spill] sm:$0xff] %v13677_v0  ;;  %v13691_v46 = vpack.c.bf16 %v13677_v0, %v13675_v27  ;;  %v10046_v0 = vld [vmem:[%s12914_s5 + $0x168] sm:$0xff]  ;;  %v10087_v27 = vld [vmem:[%s12914_s5 + $0x1e0] sm:$0xff] }
 0x13a   : >> { %15408 = vst [vmem:[#allocation25_spill] sm:$0xff] %v13691_v46 }
 0x13f   : >> { %10826 = vmatmul.mubr.msk.bf16.vlgmr.msra.gmra.mrb[0].mxu0 %vm312_vm1, %v305_v1  ;;  %v3861_v1 = vunpack.c.h.bf16 %v13613_v9 }
 0x140   : >> { %10970 = vmatmul.mubr.msk.bf16.vlgmr.msra.gmra.mrb[0].mxu1 %vm312_vm1, %v1547_v42  ;;  %10974 = vmatpush3.bf16.msra.mxu0 %v12903_v16  ;;  %v13635_v42 = vsub.f32 %v10081_v13, %v3860_v47  ;;  %v10086_v13 = vld [vmem:[%s12914_s5 + $0x1d8] sm:$0xff] }
 0x141   : >> { %11118 = vmatpush3.bf16.msra.mxu1 %v12903_v16  ;;  %10975 = vmatprep.mubr.msk.bf16.mxu0 %vm12729_vm0, %v12728_v17  ;;  %v13637_v2 = vsub.f32 %v10082_v59, %v3861_v1  ;;  %v13685_v59 = vpack.c.bf16 %v13673_v26, %v13671_v40  ;;  %v13693_v47 = vpack.c.bf16 %v10086_v13, %v10085_v12  ;;  %v2671_v1 = vunpack.c.l.bf16 %v13687_v10  ;;  %v10088_v26 = vld [vmem:[%s12914_s5 + $0x1e8] sm:$0xff] }
 0x142   : >> { %10979 = vmatprep.subr.bf16.mxu0 %v12728_v17  ;;  %11119 = vmatprep.mubr.msk.bf16.mxu1 %vm12729_vm0, %v12728_v17  ;;  %v13733_v44 = vpack.c.bf16 %v10088_v26, %v10087_v27 }
 0x143   : >> { %11123 = vmatprep.subr.bf16.mxu1 %v12728_v17  ;;  %15402 = vst [vmem:[#allocation21_spill] sm:$0xff] %v13637_v2  ;;  %v13651_v61 = vpack.c.bf16 %v13637_v2, %v13635_v42  ;;  %15407 = vst [vmem:[#allocation24_spill] sm:$0xff] %v13685_v59  ;;  %v3864_v8 = vunpack.c.l.bf16 %v13693_v47  ;;  %v3865_v21 = vunpack.c.h.bf16 %v13693_v47  ;;  %v13711_v23 = vsub.f32 %v10043_v28, %v2671_v1 }
 0x144   : >> { %v3866_v1 = vunpack.c.l.bf16 %v13733_v44  ;;  %v3867_v32 = vunpack.c.h.bf16 %v13733_v44 }
 0x145   : >> { %15409 = vst [vmem:[#allocation32_spill] sm:$0xff] %v13711_v23  ;;  %v13715_v56 = vsub.f32 %v10085_v12, %v3864_v8  ;;  %v13717_v36 = vsub.f32 %v10086_v13, %v3865_v21  ;;  %v13725_v40 = vpack.c.bf16 %v13713_v18, %v13711_v23  ;;  %v10047_v18 = vld [vmem:[%s12914_s5 + $0x170] sm:$0xff]  ;;  %v10048_v23 = vld [vmem:[%s12914_s5 + $0x178] sm:$0xff] }
 0x146   : >> { %v13767_v2 = vpack.c.bf16 %v10048_v23, %v10047_v18 }
 0x147   : >> { %10976 = vmatmul.mubr.msk.bf16.vlgmr.msra.gmra.mrb[4].mxu0 %vm312_vm1, %v13525_v38  ;;  %15411 = vst [vmem:[#allocation28_spill] sm:$0xff] %v13715_v56  ;;  %15412 = vst [vmem:[#allocation29_spill] sm:$0xff] %v13717_v36  ;;  %v13731_v28 = vpack.c.bf16 %v13717_v36, %v13715_v56  ;;  %v13755_v36 = vsub.f32 %v10087_v27, %v3866_v1  ;;  %v13757_v56 = vsub.f32 %v10088_v26, %v3867_v32 }
 0x148   : >> { %10980 = vmatpush3.bf16.msra.mxu0 %v12939_v35  ;;  %11120 = vmatmul.mubr.msk.bf16.vlgmr.msra.gmra.mrb[4].mxu1 %vm312_vm1, %v13531_v50  ;;  %15413 = vst [vmem:[#allocation30_spill] sm:$0xff] %v13725_v40  ;;  %v2675_v26 = vunpack.c.l.bf16 %v13767_v2  ;;  %v2676_v27 = vunpack.c.h.bf16 %v13767_v2 }
 0x149   : >> { %11124 = vmatpush3.bf16.msra.mxu1 %v12939_v35  ;;  %10981 = vmatprep.mubr.msk.bf16.mxu0 %vm12729_vm0, %v12728_v17  ;;  %15414 = vst [vmem:[#allocation31_spill] sm:$0xff] %v13731_v28  ;;  %15417 = vst [vmem:[#allocation36_spill] sm:$0xff] %v13755_v36 }
 0x14a   : >> { %10985 = vmatprep.subr.bf16.mxu0 %v12728_v17  ;;  %11125 = vmatprep.mubr.msk.bf16.mxu1 %vm12729_vm0, %v12728_v17  ;;  %15418 = vst [vmem:[#allocation37_spill] sm:$0xff] %v13757_v56  ;;  %v13791_v1 = vsub.f32 %v10047_v18, %v2675_v26  ;;  %v13793_v32 = vsub.f32 %v10048_v23, %v2676_v27  ;;  %v3898_v23 = vunpack.c.l.bf16 %v13611_v4  ;;  %v3899_v18 = vunpack.c.h.bf16 %v13611_v4 }
 0x14b   : >> { %11129 = vmatprep.subr.bf16.mxu1 %v12728_v17 }
 0x14c   : >> { %v3914_v26 = vsub.f32 %v13595_v31, %v3898_v23  ;;  %v3915_v27 = vsub.f32 %v13597_v30, %v3899_v18 }
 0x14e   : >> { %v15430_v18 = vld [vmem:[#allocation28_spill] sm:$0xff] }
 0x153   : >> { %10982 = vmatmul.mubr.msk.bf16.vlgmr.msra.gmra.mrb[4].mxu0 %vm312_vm1, %v13565_v41 }
 0x154   : >> { %10986 = vmatpush3.bf16.msra.mxu0 %v12985_v63  ;;  %11126 = vmatmul.mubr.msk.bf16.vlgmr.msra.gmra.mrb[4].mxu1 %vm312_vm1, %v13571_v24 }
 0x155   : >> { %11130 = vmatpush3.bf16.msra.mxu1 %v12985_v63  ;;  %10987 = vmatprep.mubr.msk.bf16.mxu0 %vm12729_vm0, %v12728_v17 }
 0x156   : >> { %10991 = vmatprep.subr.bf16.mxu0 %v12728_v17  ;;  %11131 = vmatprep.mubr.msk.bf16.mxu1 %vm12729_vm0, %v12728_v17 }
 0x157   : >> { %11135 = vmatprep.subr.bf16.mxu1 %v12728_v17 }
 0x15f   : >> { %10988 = vmatmul.mubr.msk.bf16.vlgmr.msra.gmra.mrb[4].mxu0 %vm312_vm1, %v13605_v60 }
 0x160   : >> { %10992 = vmatpush3.bf16.msra.mxu0 %v13029_v39  ;;  %11132 = vmatmul.mubr.msk.bf16.vlgmr.msra.gmra.mrb[4].mxu1 %vm312_vm1, %v13611_v4 }
 0x161   : >> { %11136 = vmatpush3.bf16.msra.mxu1 %v13029_v39  ;;  %10993 = vmatprep.mubr.msk.bf16.mxu0 %vm12729_vm0, %v12728_v17 }
 0x162   : >> { %10997 = vmatprep.subr.bf16.mxu0 %v12728_v17  ;;  %11137 = vmatprep.mubr.msk.bf16.mxu1 %vm12729_vm0, %v12728_v17 }
 0x163   : >> { %11141 = vmatprep.subr.bf16.mxu1 %v12728_v17 }
 0x16b   : >> { %10994 = vmatmul.mubr.msk.bf16.vlgmr.msra.gmra.mrb[4].mxu0 %vm312_vm1, %v13645_v34 }
 0x16c   : >> { %10998 = vmatpush3.bf16.msra.mxu0 %v13073_v25  ;;  %11138 = vmatmul.mubr.msk.bf16.vlgmr.msra.gmra.mrb[4].mxu1 %vm312_vm1, %v13651_v61 }
 0x16d   : >> { %11142 = vmatpush3.bf16.msra.mxu1 %v13073_v25  ;;  %10999 = vmatprep.mubr.msk.bf16.mxu0 %vm12729_vm0, %v12728_v17 }
 0x16e   : >> { %11003 = vmatprep.subr.bf16.mxu0 %v12728_v17  ;;  %11143 = vmatprep.mubr.msk.bf16.mxu1 %vm12729_vm0, %v12728_v17 }
 0x16f   : >> { %11147 = vmatprep.subr.bf16.mxu1 %v12728_v17 }
 0x177   : >> { %11000 = vmatmul.mubr.msk.bf16.vlgmr.msra.gmra.mrb[4].mxu0 %vm312_vm1, %v13685_v59 }
 0x178   : >> { %11004 = vmatpush3.bf16.msra.mxu0 %v13117_v58  ;;  %11144 = vmatmul.mubr.msk.bf16.vlgmr.msra.gmra.mrb[4].mxu1 %vm312_vm1, %v13691_v46  ;;  %v13727_v46 = vpack.c.bf16 %v10046_v0, %v10045_v37 }
 0x179   : >> { %11148 = vmatpush3.bf16.msra.mxu1 %v13117_v58  ;;  %11005 = vmatprep.mubr.msk.bf16.mxu0 %vm12729_vm0, %v12728_v17 }
 0x17a   : >> { %11009 = vmatprep.subr.bf16.mxu0 %v12728_v17  ;;  %11149 = vmatprep.mubr.msk.bf16.mxu1 %vm12729_vm0, %v12728_v17  ;;  %v2673_v12 = vunpack.c.l.bf16 %v13727_v46  ;;  %v2674_v13 = vunpack.c.h.bf16 %v13727_v46 }
 0x17b   : >> { %11153 = vmatprep.subr.bf16.mxu1 %v12728_v17 }
 0x17c   : >> { %v13751_v8 = vsub.f32 %v10045_v37, %v2673_v12  ;;  %v13753_v21 = vsub.f32 %v10046_v0, %v2674_v13  ;;  %v13771_v37 = vpack.c.bf16 %v13757_v56, %v13755_v36 }
 0x17e   : >> { %15415 = vst [vmem:[#allocation34_spill] sm:$0xff] %v13751_v8  ;;  %15416 = vst [vmem:[#allocation35_spill] sm:$0xff] %v13753_v21  ;;  %v13765_v59 = vpack.c.bf16 %v13753_v21, %v13751_v8  ;;  %v13801_v21 = vpack.c.bf16 %v13793_v32, %v13791_v1 }
 0x183   : >> { %11006 = vmatmul.mubr.msk.bf16.vlgmr.msra.gmra.mrb[4].mxu0 %vm312_vm1, %v13725_v40  ;;  %v10090_v40 = vld [vmem:[%s12914_s5 + $0x1f8] sm:$0xff] }
 0x184   : >> { %11010 = vmatpush3.bf16.msra.mxu0 %v13163_v3  ;;  %11150 = vmatmul.mubr.msk.bf16.vlgmr.msra.gmra.mrb[4].mxu1 %vm312_vm1, %v13731_v28  ;;  %v10089_v28 = vld [vmem:[%s12914_s5 + $0x1f0] sm:$0xff] }
 0x185   : >> { %11154 = vmatpush3.bf16.msra.mxu1 %v13163_v3  ;;  %11011 = vmatprep.mubr.msk.bf16.mxu0 %vm12729_vm0, %v12728_v17  ;;  %v13773_v0 = vpack.c.bf16 %v10090_v40, %v10089_v28 }
 0x186   : >> { %11015 = vmatprep.subr.bf16.mxu0 %v12728_v17  ;;  %11155 = vmatprep.mubr.msk.bf16.mxu1 %vm12729_vm0, %v12728_v17 }
 0x187   : >> { %11159 = vmatprep.subr.bf16.mxu1 %v12728_v17  ;;  %v3868_v12 = vunpack.c.l.bf16 %v13773_v0  ;;  %v3869_v13 = vunpack.c.h.bf16 %v13773_v0 }
 0x189   : >> { %v13795_v56 = vsub.f32 %v10089_v28, %v3868_v12  ;;  %v13797_v36 = vsub.f32 %v10090_v40, %v3869_v13  ;;  %v3928_v13 = vpack.c.bf16 %v3915_v27, %v3914_v26  ;;  %v2713_v26 = vunpack.c.l.bf16 %v13765_v59 }
 0x18a   : >> { %v2714_v27 = vunpack.c.h.bf16 %v13765_v59 }
 0x18b   : >> { %v13805_v8 = vpack.c.bf16 %v13797_v36, %v13795_v56 }
 0x18f   : >> { %11012 = vmatmul.mubr.msk.bf16.vlgmr.msra.gmra.mrb[4].mxu0 %vm312_vm1, %v13765_v59  ;;  %v15432_v59 = vld [vmem:[#allocation34_spill] sm:$0xff] }
 0x190   : >> { %11016 = vmatpush3.bf16.msra.mxu0 %v13209_v11  ;;  %11156 = vmatmul.mubr.msk.bf16.vlgmr.msra.gmra.mrb[4].mxu1 %vm312_vm1, %v13771_v37 }
 0x191   : >> { %11160 = vmatpush3.bf16.msra.mxu1 %v13209_v11  ;;  %11017 = vmatprep.mubr.msk.bf16.mxu0 %vm12729_vm0, %v12728_v17 }
 0x192   : >> { %11021 = vmatprep.subr.bf16.mxu0 %v12728_v17  ;;  %11161 = vmatprep.mubr.msk.bf16.mxu1 %vm12729_vm0, %v12728_v17 }
 0x193   : >> { %11165 = vmatprep.subr.bf16.mxu1 %v12728_v17 }
 0x19b   : >> { %11018 = vmatmul.mubr.msk.bf16.vlgmr.msra.gmra.mrb[4].mxu0 %vm312_vm1, %v13801_v21 }
 0x19c   : >> { %11022 = vmatpush3.bf16.msra.mxu0 %v12903_v16  ;;  %11162 = vmatmul.mubr.msk.bf16.vlgmr.msra.gmra.mrb[4].mxu1 %vm312_vm1, %v13805_v8 }
 0x19d   : >> { %11166 = vmatpush3.bf16.msra.mxu1 %v12903_v16  ;;  %11023 = vmatprep.mubr.msk.bf16.mxu0 %vm12729_vm0, %v12728_v17 }
 0x19e   : >> { %11027 = vmatprep.subr.bf16.mxu0 %v12728_v17  ;;  %11167 = vmatprep.mubr.msk.bf16.mxu1 %vm12729_vm0, %v12728_v17 }
 0x19f   : >> { %11171 = vmatprep.subr.bf16.mxu1 %v12728_v17 }
 0x1a7   : >> { %11024 = vmatmul.mubr.msk.bf16.vlgmr.msra.gmra.mrb[4].mxu0 %vm312_vm1, %v13491_v5  ;;  %v2701_v5 = vunpack.c.l.bf16 %v13525_v38 }
 0x1a8   : >> { %11028 = vmatpush3.bf16.msra.mxu0 %v12939_v35  ;;  %11168 = vmatmul.mubr.msk.bf16.vlgmr.msra.gmra.mrb[4].mxu1 %vm312_vm1, %v13495_v48  ;;  %v2702_v48 = vunpack.c.h.bf16 %v13525_v38 }
 0x1a9   : >> { %11172 = vmatpush3.bf16.msra.mxu1 %v12939_v35  ;;  %11029 = vmatprep.mubr.msk.bf16.mxu0 %vm12729_vm0, %v12728_v17  ;;  %v2717_v38 = vsub.f32 %v13502_v14, %v2701_v5  ;;  %v3896_v14 = vunpack.c.l.bf16 %v13571_v24  ;;  %v2707_v5 = vunpack.c.l.bf16 %v13645_v34 }
 0x1aa   : >> { %11033 = vmatprep.subr.bf16.mxu0 %v12728_v17  ;;  %11173 = vmatprep.mubr.msk.bf16.mxu1 %vm12729_vm0, %v12728_v17 }
 0x1ab   : >> { %11177 = vmatprep.subr.bf16.mxu1 %v12728_v17  ;;  %v2723_v31 = vsub.f32 %v13631_v45, %v2707_v5  ;;  %v2729_v5 = vsub.f32 %v15432_v59, %v2713_v26  ;;  %v10122_v26 = vld [vmem:[%s12914_s5 + $0x228] sm:$0xff] }
 0x1b3   : >> { %11030 = vmatmul.mubr.msk.bf16.vlgmr.msra.gmra.mrb[4].mxu0 %vm312_vm1, %v13527_v49  ;;  %v3894_v49 = vunpack.c.l.bf16 %v13531_v50 }
 0x1b4   : >> { %11034 = vmatpush3.bf16.msra.mxu0 %v12985_v63  ;;  %11174 = vmatmul.mubr.msk.bf16.vlgmr.msra.gmra.mrb[4].mxu1 %vm312_vm1, %v13533_v51  ;;  %v3895_v51 = vunpack.c.h.bf16 %v13531_v50 }
 0x1b5   : >> { %11178 = vmatpush3.bf16.msra.mxu1 %v12985_v63  ;;  %11035 = vmatprep.mubr.msk.bf16.mxu0 %vm12729_vm0, %v12728_v17 }
 0x1b6   : >> { %11039 = vmatprep.subr.bf16.mxu0 %v12728_v17  ;;  %11179 = vmatprep.mubr.msk.bf16.mxu1 %vm12729_vm0, %v12728_v17  ;;  %v3911_v50 = vsub.f32 %v13510_v7, %v3895_v51 }
 0x1b7   : >> { %11183 = vmatprep.subr.bf16.mxu1 %v12728_v17 }
 0x1bf   : >> { %11036 = vmatmul.mubr.msk.bf16.vlgmr.msra.gmra.mrb[4].mxu0 %vm312_vm1, %v13567_v57  ;;  %v2718_v57 = vsub.f32 %v13504_v15, %v2702_v48  ;;  %v3897_v15 = vunpack.c.h.bf16 %v13571_v24  ;;  %v2708_v48 = vunpack.c.h.bf16 %v13645_v34 }
 0x1c0   : >> { %11040 = vmatpush3.bf16.msra.mxu0 %v13029_v39  ;;  %11180 = vmatmul.mubr.msk.bf16.vlgmr.msra.gmra.mrb[4].mxu1 %vm312_vm1, %v13573_v6  ;;  %v3910_v6 = vsub.f32 %v13508_v33, %v3894_v49  ;;  %v15419_v49 = vld [vmem:[#allocation21_spill] sm:$0xff] }
 0x1c1   : >> { %11184 = vmatpush3.bf16.msra.mxu1 %v13029_v39  ;;  %11041 = vmatprep.mubr.msk.bf16.mxu0 %vm12729_vm0, %v12728_v17  ;;  %v3913_v24 = vsub.f32 %v13557_v55, %v3897_v15  ;;  %v2724_v30 = vsub.f32 %v13633_v20, %v2708_v48  ;;  %v15433_v48 = vld [vmem:[#allocation35_spill] sm:$0xff] }
 0x1c2   : >> { %11045 = vmatprep.subr.bf16.mxu0 %v12728_v17  ;;  %11185 = vmatprep.mubr.msk.bf16.mxu1 %vm12729_vm0, %v12728_v17 }
 0x1c3   : >> { %11189 = vmatprep.subr.bf16.mxu1 %v12728_v17  ;;  %v2736_v51 = vpack.c.bf16 %v2724_v30, %v2723_v31  ;;  %v15435_v31 = vld [vmem:[#allocation37_spill] sm:$0xff] }
 0x1cb   : >> { %11042 = vmatmul.mubr.msk.bf16.vlgmr.msra.gmra.mrb[4].mxu0 %vm312_vm1, %v13607_v43  ;;  %v2733_v43 = vpack.c.bf16 %v2718_v57, %v2717_v38  ;;  %v15420_v57 = vld [vmem:[#allocation24_spill] sm:$0xff] }
 0x1cc   : >> { %11046 = vmatpush3.bf16.msra.mxu0 %v13073_v25  ;;  %11186 = vmatmul.mubr.msk.bf16.vlgmr.msra.gmra.mrb[4].mxu1 %vm312_vm1, %v13613_v9  ;;  %v3926_v9 = vpack.c.bf16 %v3911_v50, %v3910_v6  ;;  %v2709_v6 = vunpack.c.l.bf16 %v15420_v57  ;;  %v2710_v50 = vunpack.c.h.bf16 %v15420_v57  ;;  %v3909_v57 = vunpack.c.h.bf16 %v13805_v8 }
 0x1cd   : >> { %11190 = vmatpush3.bf16.msra.mxu1 %v13073_v25  ;;  %11047 = vmatprep.mubr.msk.bf16.mxu0 %vm12729_vm0, %v12728_v17 }
 0x1ce   : >> { %11051 = vmatprep.subr.bf16.mxu0 %v12728_v17  ;;  %11191 = vmatprep.mubr.msk.bf16.mxu1 %vm12729_vm0, %v12728_v17 }
 0x1cf   : >> { %11195 = vmatprep.subr.bf16.mxu1 %v12728_v17 }
 0x1d7   : >> { %11048 = vmatmul.mubr.msk.bf16.vlgmr.msra.gmra.mrb[4].mxu0 %vm312_vm1, %v13647_v52  ;;  %v2704_v52 = vunpack.c.h.bf16 %v13565_v41 }
 0x1d8   : >> { %11052 = vmatpush3.bf16.msra.mxu0 %v13117_v58  ;;  %11192 = vmatmul.mubr.msk.bf16.vlgmr.msra.gmra.mrb[4].mxu1 %vm312_vm1, %v13653_v62 }
 0x1d9   : >> { %11196 = vmatpush3.bf16.msra.mxu1 %v13117_v58  ;;  %11053 = vmatprep.mubr.msk.bf16.mxu0 %vm12729_vm0, %v12728_v17  ;;  %v2720_v7 = vsub.f32 %v13553_v53, %v2704_v52  ;;  %v2706_v53 = vunpack.c.h.bf16 %v13605_v60 }
 0x1da   : >> { %11057 = vmatprep.subr.bf16.mxu0 %v12728_v17  ;;  %11197 = vmatprep.mubr.msk.bf16.mxu1 %vm12729_vm0, %v12728_v17 }
 0x1db   : >> { %11201 = vmatprep.subr.bf16.mxu1 %v12728_v17  ;;  %v2722_v4 = vsub.f32 %v13593_v22, %v2706_v53  ;;  %v3901_v22 = vunpack.c.h.bf16 %v13651_v61  ;;  %v15428_v53 = vld [vmem:[#allocation32_spill] sm:$0xff] }
 0x1e3   : >> { %11054 = vmatmul.mubr.msk.bf16.vlgmr.msra.gmra.mrb[4].mxu0 %vm312_vm1, %v13687_v10 }
 0x1e4   : >> { %11058 = vmatpush3.bf16.msra.mxu0 %v13163_v3  ;;  %11198 = vmatmul.mubr.msk.bf16.vlgmr.msra.gmra.mrb[4].mxu1 %vm312_vm1, %v13693_v47 }
 0x1e5   : >> { %11202 = vmatpush3.bf16.msra.mxu1 %v13163_v3  ;;  %11059 = vmatprep.mubr.msk.bf16.mxu0 %vm12729_vm0, %v12728_v17 }
 0x1e6   : >> { %11063 = vmatprep.subr.bf16.mxu0 %v12728_v17  ;;  %11203 = vmatprep.mubr.msk.bf16.mxu1 %vm12729_vm0, %v12728_v17 }
 0x1e7   : >> { %11207 = vmatprep.subr.bf16.mxu1 %v12728_v17 }
 0x1ef   : >> { %11060 = vmatmul.mubr.msk.bf16.vlgmr.msra.gmra.mrb[4].mxu0 %vm312_vm1, %v13727_v46 }
 0x1f0   : >> { %11064 = vmatpush3.bf16.msra.mxu0 %v13209_v11  ;;  %11204 = vmatmul.mubr.msk.bf16.vlgmr.msra.gmra.mrb[4].mxu1 %vm312_vm1, %v13733_v44 }
 0x1f1   : >> { %11208 = vmatpush3.bf16.msra.mxu1 %v13209_v11  ;;  %11065 = vmatprep.mubr.msk.bf16.mxu0 %vm12729_vm0, %v12728_v17 }
 0x1f2   : >> { %11069 = vmatprep.subr.bf16.mxu0 %v12728_v17  ;;  %11209 = vmatprep.mubr.msk.bf16.mxu1 %vm12729_vm0, %v12728_v17 }
 0x1f3   : >> { %11213 = vmatprep.subr.bf16.mxu1 %v12728_v17 }
 0x1fb   : >> { %11066 = vmatmul.mubr.msk.bf16.vlgmr.msra.gmra.mrb[4].mxu0 %vm312_vm1, %v13767_v2  ;;  %v2703_v2 = vunpack.c.l.bf16 %v13565_v41  ;;  %v3912_v41 = vsub.f32 %v13555_v54, %v3896_v14  ;;  %v15424_v14 = vld [vmem:[#allocation22_spill] sm:$0xff] }
 0x1fc   : >> { %11070 = vmatpush3.bf16.msra.mxu0 %v12903_v16  ;;  %11210 = vmatmul.mubr.msk.bf16.vlgmr.msra.gmra.mrb[4].mxu1 %vm312_vm1, %v13773_v0 }
 0x1fd   : >> { %11214 = vmatpush3.bf16.msra.mxu1 %v12903_v16  ;;  %11071 = vmatprep.mubr.msk.bf16.mxu0 %vm12729_vm0, %v12728_v17  ;;  %v2719_v33 = vsub.f32 %v13551_v19, %v2703_v2  ;;  %v3927_v40 = vpack.c.bf16 %v3913_v24, %v3912_v41  ;;  %v2705_v19 = vunpack.c.l.bf16 %v13605_v60  ;;  %v15423_v2 = vld [vmem:[#allocation27_spill] sm:$0xff] }
 0x1fe   : >> { %11075 = vmatprep.subr.bf16.mxu0 %v12728_v17  ;;  %11215 = vmatprep.mubr.msk.bf16.mxu1 %vm12729_vm0, %v12728_v17  ;;  %v2726_v52 = vsub.f32 %v15423_v2, %v2710_v50  ;;  %v10118_v50 = vld [vmem:[%s12914_s5 + $0x208] sm:$0xff] }
 0x1ff   : >> { %11219 = vmatprep.subr.bf16.mxu1 %v12728_v17  ;;  %v2734_v62 = vpack.c.bf16 %v2720_v7, %v2719_v33  ;;  %v2721_v0 = vsub.f32 %v13591_v29, %v2705_v19  ;;  %v3900_v29 = vunpack.c.l.bf16 %v13651_v61  ;;  %v3917_v61 = vsub.f32 %v15419_v49, %v3901_v22  ;;  %v15425_v33 = vld [vmem:[#allocation23_spill] sm:$0xff]  ;;  %v15434_v22 = vld [vmem:[#allocation36_spill] sm:$0xff] }
 0x201   : >> { %v2735_v12 = vpack.c.bf16 %v2722_v4, %v2721_v0  ;;  %v3916_v34 = vsub.f32 %v13635_v42, %v3900_v29  ;;  %v15422_v42 = vld [vmem:[#allocation26_spill] sm:$0xff]  ;;  %v2730_v29 = vsub.f32 %v15433_v48, %v2714_v27  ;;  %v10163_v27 = vld [vmem:[%s12914_s5 + $0x2a0] sm:$0xff] }
 0x203   : >> { %v3929_v38 = vpack.c.bf16 %v3917_v61, %v3916_v34  ;;  %v2739_v34 = vpack.c.bf16 %v2730_v29, %v2729_v5  ;;  %v2715_v61 = vunpack.c.l.bf16 %v13801_v21 }
 0x207   : >> { %11072 = vmatmul.mubr.msk.bf16.vlgmr.msra.gmra.mrb[4].mxu0 %vm312_vm1, %v2733_v43  ;;  %v15421_v43 = vld [vmem:[#allocation25_spill] sm:$0xff] }
 0x208   : >> { %11076 = vmatpush3.bf16.msra.mxu0 %v12939_v35  ;;  %11216 = vmatmul.mubr.msk.bf16.vlgmr.msra.gmra.mrb[4].mxu1 %vm312_vm1, %v3926_v9  ;;  %v3902_v45 = vunpack.c.l.bf16 %v15421_v43  ;;  %v3903_v20 = vunpack.c.h.bf16 %v15421_v43  ;;  %v2725_v9 = vsub.f32 %v15422_v42, %v2709_v6  ;;  %v10117_v6 = vld [vmem:[%s12914_s5 + $0x200] sm:$0xff] }
 0x209   : >> { %11220 = vmatpush3.bf16.msra.mxu1 %v12939_v35  ;;  %11077 = vmatprep.mubr.msk.bf16.mxu0 %vm12729_vm0, %v12728_v17  ;;  %v10159_v43 = vld [vmem:[%s12914_s5 + $0x280] sm:$0xff] }
 0x20a   : >> { %11081 = vmatprep.subr.bf16.mxu0 %v12728_v17  ;;  %11221 = vmatprep.mubr.msk.bf16.mxu1 %vm12729_vm0, %v12728_v17  ;;  %v3918_v15 = vsub.f32 %v15424_v14, %v3902_v45  ;;  %v3919_v7 = vsub.f32 %v15425_v33, %v3903_v20  ;;  %v2737_v41 = vpack.c.bf16 %v2726_v52, %v2725_v9  ;;  %v10160_v45 = vld [vmem:[%s12914_s5 + $0x288] sm:$0xff] }
 0x20b   : >> { %11225 = vmatprep.subr.bf16.mxu1 %v12728_v17  ;;  %v14060_v20 = vpack.c.bf16 %v10118_v50, %v10117_v6  ;;  %v3925_v9 = vsub.f32 %v13797_v36, %v3909_v57  ;;  %v14064_v2 = vpack.c.bf16 %v10160_v45, %v10159_v43  ;;  %v10165_v57 = vld [vmem:[%s12914_s5 + $0x2b0] sm:$0xff] }
 0x20c   : >> { %v3930_v24 = vpack.c.bf16 %v3919_v7, %v3918_v15 }
 0x20d   : >> { %v5047_v14 = vunpack.c.l.bf16 %v14060_v20  ;;  %v5048_v15 = vunpack.c.h.bf16 %v14060_v20  ;;  %v6241_v33 = vunpack.c.h.bf16 %v14064_v2 }
 0x20f   : >> { %v14073_v36 = vsub.f32 %v10118_v50, %v5048_v15 }
 0x212   : >> { %v1404_v10 = vpop.f32.mrb[0].mxu0 }
 0x213   : >> { %9795 = vst [vmem:[%s13944_s7] sm:$0xff] %v1404_v10  ;;  %v2597_v46 = vpop.f32.mrb[0].mxu1  ;;  %v10827_v47 = vpop.f32.mrb[1].mxu0  ;;  %11078 = vmatmul.mubr.msk.bf16.vlgmr.msra.gmra.mrb[4].mxu0 %vm312_vm1, %v2734_v62  ;;  %v15426_v62 = vld [vmem:[#allocation30_spill] sm:$0xff] }
 0x214   : >> { %9796 = vst [vmem:[%s13944_s7 + $0x8] sm:$0xff] %v2597_v46  ;;  %v10971_v54 = vpop.f32.mrb[1].mxu1  ;;  %11082 = vmatpush3.bf16.msra.mxu0 %v12985_v63  ;;  %11222 = vmatmul.mubr.msk.bf16.vlgmr.msra.gmra.mrb[4].mxu1 %vm312_vm1, %v3927_v40  ;;  %v1407_v55 = vpop.f32.mrb[2].mxu0  ;;  %v2711_v40 = vunpack.c.l.bf16 %v15426_v62  ;;  %v2712_v10 = vunpack.c.h.bf16 %v15426_v62  ;;  %v15427_v46 = vld [vmem:[#allocation31_spill] sm:$0xff]  ;;  %v10120_v62 = vld [vmem:[%s12914_s5 + $0x218] sm:$0xff] }
 0x215   : >> { %11226 = vmatpush3.bf16.msra.mxu1 %v12985_v63  ;;  %9803 = vst [vmem:[%s13944_s7 + $0x40] sm:$0xff] %v1407_v55  ;;  %v2600_v28 = vpop.f32.mrb[2].mxu1  ;;  %v10828_v44 = vpop.f32.mrb[3].mxu0  ;;  %11083 = vmatprep.mubr.msk.bf16.mxu0 %vm12729_vm0, %v12728_v17  ;;  %v3904_v47 = vunpack.c.l.bf16 %v15427_v46  ;;  %v3905_v19 = vunpack.c.h.bf16 %v15427_v46  ;;  %v15429_v55 = vld [vmem:[#allocation33_spill] sm:$0xff] }
 0x216   : >> { %9804 = vst [vmem:[%s13944_s7 + $0x48] sm:$0xff] %v2600_v28  ;;  %v10972_v60 = vpop.f32.mrb[3].mxu1  ;;  %11087 = vmatprep.subr.bf16.mxu0 %v12728_v17  ;;  %11227 = vmatprep.mubr.msk.bf16.mxu1 %vm12729_vm0, %v12728_v17  ;;  %v2727_v54 = vsub.f32 %v15428_v53, %v2711_v40  ;;  %v2728_v23 = vsub.f32 %v15429_v55, %v2712_v10  ;;  %v15431_v44 = vld [vmem:[#allocation29_spill] sm:$0xff]  ;;  %v10161_v40 = vld [vmem:[%s12914_s5 + $0x290] sm:$0xff]  ;;  %v10162_v10 = vld [vmem:[%s12914_s5 + $0x298] sm:$0xff] }
 0x217   : >> { %11231 = vmatprep.subr.bf16.mxu1 %v12728_v17  ;;  %v3920_v28 = vsub.f32 %v15430_v18, %v3904_v47  ;;  %v3921_v60 = vsub.f32 %v15431_v44, %v3905_v19  ;;  %v14102_v53 = vpack.c.bf16 %v10162_v10, %v10161_v40 }
 0x218   : >> { %v2738_v0 = vpack.c.bf16 %v2728_v23, %v2727_v54 }
 0x219   : >> { %v3931_v4 = vpack.c.bf16 %v3921_v60, %v3920_v28  ;;  %v6242_v23 = vunpack.c.l.bf16 %v14102_v53  ;;  %v6243_v18 = vunpack.c.h.bf16 %v14102_v53 }
 0x21b   : >> { %v14124_v60 = vsub.f32 %v10161_v40, %v6242_v23  ;;  %v10168_v40 = vld [vmem:[%s12914_s5 + $0x2c8] sm:$0xff] }
 0x21f   : >> { %11084 = vmatmul.mubr.msk.bf16.vlgmr.msra.gmra.mrb[4].mxu0 %vm312_vm1, %v2735_v12  ;;  %v3906_v12 = vunpack.c.l.bf16 %v13771_v37 }
 0x220   : >> { %11088 = vmatpush3.bf16.msra.mxu0 %v13029_v39  ;;  %11228 = vmatmul.mubr.msk.bf16.vlgmr.msra.gmra.mrb[4].mxu1 %vm312_vm1, %v3928_v13  ;;  %v3907_v13 = vunpack.c.h.bf16 %v13771_v37 }
 0x221   : >> { %11232 = vmatpush3.bf16.msra.mxu1 %v13029_v39  ;;  %11089 = vmatprep.mubr.msk.bf16.mxu0 %vm12729_vm0, %v12728_v17  ;;  %v3922_v37 = vsub.f32 %v15434_v22, %v3906_v12  ;;  %v10164_v12 = vld [vmem:[%s12914_s5 + $0x2a8] sm:$0xff] }
 0x222   : >> { %11093 = vmatprep.subr.bf16.mxu0 %v12728_v17  ;;  %11233 = vmatprep.mubr.msk.bf16.mxu1 %vm12729_vm0, %v12728_v17  ;;  %v3923_v30 = vsub.f32 %v15435_v31, %v3907_v13  ;;  %v14142_v48 = vpack.c.bf16 %v10164_v12, %v10163_v27 }
 0x223   : >> { %11237 = vmatprep.subr.bf16.mxu1 %v12728_v17 }
 0x224   : >> { %v3932_v49 = vpack.c.bf16 %v3923_v30, %v3922_v37  ;;  %v6244_v37 = vunpack.c.l.bf16 %v14142_v48  ;;  %v6245_v31 = vunpack.c.h.bf16 %v14142_v48 }
 0x22b   : >> { %11090 = vmatmul.mubr.msk.bf16.vlgmr.msra.gmra.mrb[4].mxu0 %vm312_vm1, %v2736_v51  ;;  %v2716_v51 = vunpack.c.h.bf16 %v13801_v21  ;;  %v2731_v21 = vsub.f32 %v13791_v1, %v2715_v61  ;;  %v14166_v61 = vsub.f32 %v10164_v12, %v6245_v31  ;;  %v10127_v31 = vld [vmem:[%s12914_s5 + $0x250] sm:$0xff] }
 0x22c   : >> { %11094 = vmatpush3.bf16.msra.mxu0 %v13073_v25  ;;  %11234 = vmatmul.mubr.msk.bf16.vlgmr.msra.gmra.mrb[4].mxu1 %vm312_vm1, %v3929_v38  ;;  %v3908_v38 = vunpack.c.l.bf16 %v13805_v8 }
 0x22d   : >> { %11238 = vmatpush3.bf16.msra.mxu1 %v13073_v25  ;;  %11095 = vmatprep.mubr.msk.bf16.mxu0 %vm12729_vm0, %v12728_v17  ;;  %v2732_v8 = vsub.f32 %v13793_v32, %v2716_v51  ;;  %v6240_v32 = vunpack.c.l.bf16 %v14064_v2  ;;  %v10123_v51 = vld [vmem:[%s12914_s5 + $0x230] sm:$0xff] }
 0x22e   : >> { %11099 = vmatprep.subr.bf16.mxu0 %v12728_v17  ;;  %11239 = vmatprep.mubr.msk.bf16.mxu1 %vm12729_vm0, %v12728_v17  ;;  %v3924_v42 = vsub.f32 %v13795_v56, %v3908_v38  ;;  %v14071_v56 = vsub.f32 %v10117_v6, %v5047_v14  ;;  %v10124_v38 = vld [vmem:[%s12914_s5 + $0x238] sm:$0xff] }
 0x22f   : >> { %11243 = vmatprep.subr.bf16.mxu1 %v12728_v17  ;;  %v2740_v52 = vpack.c.bf16 %v2732_v8, %v2731_v21  ;;  %v14077_v7 = vsub.f32 %v10159_v43, %v6240_v32  ;;  %v10166_v6 = vld [vmem:[%s12914_s5 + $0x2b8] sm:$0xff]  ;;  %v14176_v43 = vpack.c.bf16 %v10124_v38, %v10123_v51 }
 0x230   : >> { %v3933_v1 = vpack.c.bf16 %v3925_v9, %v3924_v42  ;;  %v14094_v46 = vpack.c.bf16 %v14073_v36, %v14071_v56  ;;  %v14182_v21 = vpack.c.bf16 %v10166_v6, %v10165_v57 }
 0x231   : >> { %v5053_v8 = vunpack.c.l.bf16 %v14176_v43  ;;  %v5054_v42 = vunpack.c.h.bf16 %v14176_v43 }
 0x232   : >> { %v6246_v9 = vunpack.c.l.bf16 %v14182_v21 }
 0x233   : >> { %v14200_v14 = vsub.f32 %v10123_v51, %v5053_v8  ;;  %v14202_v15 = vsub.f32 %v10124_v38, %v5054_v42  ;;  %v10128_v51 = vld [vmem:[%s12914_s5 + $0x258] sm:$0xff]  ;;  %v10169_v38 = vld [vmem:[%s12914_s5 + $0x2d0] sm:$0xff] }
 0x234   : >> { %v14256_v8 = vpack.c.bf16 %v10128_v51, %v10127_v31 }
 0x237   : >> { %11096 = vmatmul.mubr.msk.bf16.vlgmr.msra.gmra.mrb[4].mxu0 %vm312_vm1, %v2737_v41  ;;  %v14079_v41 = vsub.f32 %v10160_v45, %v6241_v33  ;;  %v10125_v33 = vld [vmem:[%s12914_s5 + $0x240] sm:$0xff] }
 0x238   : >> { %11100 = vmatpush3.bf16.msra.mxu0 %v13117_v58  ;;  %11240 = vmatmul.mubr.msk.bf16.vlgmr.msra.gmra.mrb[4].mxu1 %vm312_vm1, %v3930_v24  ;;  %v10119_v24 = vld [vmem:[%s12914_s5 + $0x210] sm:$0xff] }
 0x239   : >> { %11244 = vmatpush3.bf16.msra.mxu1 %v13117_v58  ;;  %11101 = vmatprep.mubr.msk.bf16.mxu0 %vm12729_vm0, %v12728_v17  ;;  %v14096_v47 = vpack.c.bf16 %v10120_v62, %v10119_v24  ;;  %v14100_v19 = vpack.c.bf16 %v14079_v41, %v14077_v7 }
 0x23a   : >> { %11105 = vmatprep.subr.bf16.mxu0 %v12728_v17  ;;  %11245 = vmatprep.mubr.msk.bf16.mxu1 %vm12729_vm0, %v12728_v17 }
 0x23b   : >> { %11249 = vmatprep.subr.bf16.mxu1 %v12728_v17  ;;  %v5049_v54 = vunpack.c.l.bf16 %v14096_v47  ;;  %v5050_v55 = vunpack.c.h.bf16 %v14096_v47 }
 0x23d   : >> { %v14120_v28 = vsub.f32 %v10119_v24, %v5049_v54  ;;  %v14122_v44 = vsub.f32 %v10120_v62, %v5050_v55  ;;  %v10126_v24 = vld [vmem:[%s12914_s5 + $0x248] sm:$0xff]  ;;  %v10167_v62 = vld [vmem:[%s12914_s5 + $0x2c0] sm:$0xff] }
 0x23e   : >> { %v14216_v54 = vpack.c.bf16 %v10126_v24, %v10125_v33  ;;  %v14222_v23 = vpack.c.bf16 %v10168_v40, %v10167_v62 }
 0x23f   : >> { %v14134_v13 = vpack.c.bf16 %v14122_v44, %v14120_v28 }
 0x243   : >> { %11102 = vmatmul.mubr.msk.bf16.vlgmr.msra.gmra.mrb[4].mxu0 %vm312_vm1, %v2738_v0  ;;  %v14126_v0 = vsub.f32 %v10162_v10, %v6243_v18  ;;  %v14214_v10 = vpack.c.bf16 %v14202_v15, %v14200_v14  ;;  %v5055_v18 = vunpack.c.l.bf16 %v14216_v54 }
 0x244   : >> { %11106 = vmatpush3.bf16.msra.mxu0 %v13163_v3  ;;  %11246 = vmatmul.mubr.msk.bf16.vlgmr.msra.gmra.mrb[4].mxu1 %vm312_vm1, %v3931_v4  ;;  %v10121_v4 = vld [vmem:[%s12914_s5 + $0x220] sm:$0xff] }
 0x245   : >> { %11250 = vmatpush3.bf16.msra.mxu1 %v13163_v3  ;;  %11107 = vmatprep.mubr.msk.bf16.mxu0 %vm12729_vm0, %v12728_v17  ;;  %v14136_v59 = vpack.c.bf16 %v10122_v26, %v10121_v4  ;;  %v14140_v5 = vpack.c.bf16 %v14126_v0, %v14124_v60  ;;  %v14240_v12 = vsub.f32 %v10125_v33, %v5055_v18  ;;  %v5058_v33 = vunpack.c.h.bf16 %v14256_v8 }
 0x246   : >> { %11111 = vmatprep.subr.bf16.mxu0 %v12728_v17  ;;  %11251 = vmatprep.mubr.msk.bf16.mxu1 %vm12729_vm0, %v12728_v17 }
 0x247   : >> { %11255 = vmatprep.subr.bf16.mxu1 %v12728_v17  ;;  %v5051_v29 = vunpack.c.l.bf16 %v14136_v59  ;;  %v5052_v22 = vunpack.c.h.bf16 %v14136_v59  ;;  %15437 = vst [vmem:[#allocation24_spill] sm:$0xff] %v14240_v12  ;;  %v14282_v18 = vsub.f32 %v10128_v51, %v5058_v33 }
 0x249   : >> { %v14160_v30 = vsub.f32 %v10121_v4, %v5051_v29  ;;  %v5056_v4 = vunpack.c.h.bf16 %v14216_v54  ;;  %15444 = vst [vmem:[#allocation31_spill] sm:$0xff] %v14282_v18 }
 0x24b   : >> { %v14242_v29 = vsub.f32 %v10126_v24, %v5056_v4 }
 0x24d   : >> { %15438 = vst [vmem:[#allocation25_spill] sm:$0xff] %v14242_v29 }
 0x24f   : >> { %11108 = vmatmul.mubr.msk.bf16.vlgmr.msra.gmra.mrb[4].mxu0 %vm312_vm1, %v2739_v34  ;;  %v14162_v34 = vsub.f32 %v10122_v26, %v5052_v22  ;;  %v6248_v26 = vunpack.c.l.bf16 %v14222_v23 }
 0x250   : >> { %11112 = vmatpush3.bf16.msra.mxu0 %v13209_v11  ;;  %11252 = vmatmul.mubr.msk.bf16.vlgmr.msra.gmra.mrb[4].mxu1 %vm312_vm1, %v3932_v49  ;;  %v14164_v49 = vsub.f32 %v10163_v27, %v6244_v37  ;;  %v6249_v27 = vunpack.c.h.bf16 %v14222_v23 }
 0x251   : >> { %11256 = vmatpush3.bf16.msra.mxu1 %v13209_v11  ;;  %11113 = vmatprep.mubr.msk.bf16.mxu0 %vm12729_vm0, %v12728_v17  ;;  %v14174_v50 = vpack.c.bf16 %v14162_v34, %v14160_v30  ;;  %v14244_v22 = vsub.f32 %v10167_v62, %v6248_v26 }
 0x252   : >> { %11257 = vmatprep.mubr.msk.bf16.mxu1 %vm12729_vm0, %v12728_v17  ;;  %11261 = vmatprep.subr.bf16.mxu0 %v12728_v17  ;;  %v14180_v45 = vpack.c.bf16 %v14166_v61, %v14164_v49  ;;  %v14246_v37 = vsub.f32 %v10168_v40, %v6249_v27  ;;  %v10129_v27 = vld [vmem:[%s12914_s5 + $0x260] sm:$0xff] }
 0x253   : >> { %11405 = vmatprep.subr.bf16.mxu1 %v12728_v17  ;;  %15439 = vst [vmem:[#allocation26_spill] sm:$0xff] %v14244_v22 }
 0x254   : >> { %15440 = vst [vmem:[#allocation27_spill] sm:$0xff] %v14246_v37  ;;  %v14260_v42 = vpack.c.bf16 %v14246_v37, %v14244_v22  ;;  %v10130_v37 = vld [vmem:[%s12914_s5 + $0x268] sm:$0xff]  ;;  %v10171_v22 = vld [vmem:[%s12914_s5 + $0x2e0] sm:$0xff] }
 0x256   : >> { %15442 = vst [vmem:[#allocation23_spill] sm:$0xff] %v14260_v42 }
 0x25b   : >> { %11114 = vmatmul.mubr.msk.bf16.vlgmr.msra.gmra.mrb[4].mxu0 %vm312_vm1, %v2740_v52  ;;  %v6247_v52 = vunpack.c.h.bf16 %v14182_v21 }
 0x25c   : >> { %11258 = vmatmul.mubr.msk.bf16.vlgmr.msra.gmra.mrb[4].mxu1 %vm312_vm1, %v3933_v1  ;;  %11262 = vmatpush3.bf16.msra.mxu0 %v12903_v16  ;;  %v14204_v1 = vsub.f32 %v10165_v57, %v6246_v9  ;;  %v10170_v57 = vld [vmem:[%s12914_s5 + $0x2d8] sm:$0xff] }
 0x25d   : >> { %11406 = vmatpush3.bf16.msra.mxu1 %v12903_v16  ;;  %11263 = vmatprep.mubr.msk.bf16.mxu0 %vm12729_vm0, %v12728_v17  ;;  %v14206_v32 = vsub.f32 %v10166_v6, %v6247_v52  ;;  %v14254_v6 = vpack.c.bf16 %v14242_v29, %v14240_v12  ;;  %v14262_v9 = vpack.c.bf16 %v10170_v57, %v10169_v38  ;;  %v5057_v52 = vunpack.c.l.bf16 %v14256_v8  ;;  %v10172_v29 = vld [vmem:[%s12914_s5 + $0x2e8] sm:$0xff] }
 0x25e   : >> { %11267 = vmatprep.subr.bf16.mxu0 %v12728_v17  ;;  %11407 = vmatprep.mubr.msk.bf16.mxu1 %vm12729_vm0, %v12728_v17  ;;  %v14302_v51 = vpack.c.bf16 %v10172_v29, %v10171_v22 }
 0x25f   : >> { %11411 = vmatprep.subr.bf16.mxu1 %v12728_v17  ;;  %15436 = vst [vmem:[#allocation21_spill] sm:$0xff] %v14206_v32  ;;  %v14220_v55 = vpack.c.bf16 %v14206_v32, %v14204_v1  ;;  %15441 = vst [vmem:[#allocation22_spill] sm:$0xff] %v14254_v6  ;;  %v6250_v24 = vunpack.c.l.bf16 %v14262_v9  ;;  %v6251_v62 = vunpack.c.h.bf16 %v14262_v9  ;;  %v14280_v40 = vsub.f32 %v10127_v31, %v5057_v52 }
 0x260   : >> { %v6252_v52 = vunpack.c.l.bf16 %v14302_v51  ;;  %v6253_v33 = vunpack.c.h.bf16 %v14302_v51 }
 0x261   : >> { %15443 = vst [vmem:[#allocation30_spill] sm:$0xff] %v14280_v40  ;;  %v14284_v4 = vsub.f32 %v10169_v38, %v6250_v24  ;;  %v14286_v26 = vsub.f32 %v10170_v57, %v6251_v62  ;;  %v14294_v12 = vpack.c.bf16 %v14282_v18, %v14280_v40  ;;  %v10131_v18 = vld [vmem:[%s12914_s5 + $0x270] sm:$0xff]  ;;  %v10132_v40 = vld [vmem:[%s12914_s5 + $0x278] sm:$0xff] }
 0x262   : >> { %v14336_v32 = vpack.c.bf16 %v10132_v40, %v10131_v18 }
 0x263   : >> { %11264 = vmatmul.mubr.msk.bf16.vlgmr.msra.gmra.mrb[8].mxu0 %vm312_vm1, %v14094_v46  ;;  %15445 = vst [vmem:[#allocation32_spill] sm:$0xff] %v14284_v4  ;;  %15446 = vst [vmem:[#allocation33_spill] sm:$0xff] %v14286_v26  ;;  %v14300_v31 = vpack.c.bf16 %v14286_v26, %v14284_v4  ;;  %v14324_v26 = vsub.f32 %v10171_v22, %v6252_v52  ;;  %v14326_v4 = vsub.f32 %v10172_v29, %v6253_v33 }
 0x264   : >> { %11268 = vmatpush3.bf16.msra.mxu0 %v12939_v35  ;;  %11408 = vmatmul.mubr.msk.bf16.vlgmr.msra.gmra.mrb[8].mxu1 %vm312_vm1, %v14100_v19  ;;  %15447 = vst [vmem:[#allocation28_spill] sm:$0xff] %v14294_v12  ;;  %v5061_v29 = vunpack.c.l.bf16 %v14336_v32  ;;  %v5062_v22 = vunpack.c.h.bf16 %v14336_v32 }
 0x265   : >> { %11412 = vmatpush3.bf16.msra.mxu1 %v12939_v35  ;;  %11269 = vmatprep.mubr.msk.bf16.mxu0 %vm12729_vm0, %v12728_v17  ;;  %15448 = vst [vmem:[#allocation29_spill] sm:$0xff] %v14300_v31  ;;  %15451 = vst [vmem:[#allocation36_spill] sm:$0xff] %v14324_v26 }
 0x266   : >> { %11273 = vmatprep.subr.bf16.mxu0 %v12728_v17  ;;  %11413 = vmatprep.mubr.msk.bf16.mxu1 %vm12729_vm0, %v12728_v17  ;;  %15452 = vst [vmem:[#allocation37_spill] sm:$0xff] %v14326_v4  ;;  %v14360_v52 = vsub.f32 %v10131_v18, %v5061_v29  ;;  %v14362_v33 = vsub.f32 %v10132_v40, %v5062_v22  ;;  %v5091_v40 = vunpack.c.l.bf16 %v14174_v50  ;;  %v6285_v18 = vunpack.c.h.bf16 %v14180_v45 }
 0x267   : >> { %11417 = vmatprep.subr.bf16.mxu1 %v12728_v17 }
 0x268   : >> { %v6301_v22 = vsub.f32 %v14166_v61, %v6285_v18 }
 0x26a   : >> { %v15464_v18 = vld [vmem:[#allocation32_spill] sm:$0xff] }
 0x26f   : >> { %11270 = vmatmul.mubr.msk.bf16.vlgmr.msra.gmra.mrb[8].mxu0 %vm312_vm1, %v14134_v13 }
 0x270   : >> { %11274 = vmatpush3.bf16.msra.mxu0 %v12985_v63  ;;  %11414 = vmatmul.mubr.msk.bf16.vlgmr.msra.gmra.mrb[8].mxu1 %vm312_vm1, %v14140_v5 }
 0x271   : >> { %11418 = vmatpush3.bf16.msra.mxu1 %v12985_v63  ;;  %11275 = vmatprep.mubr.msk.bf16.mxu0 %vm12729_vm0, %v12728_v17 }
 0x272   : >> { %11279 = vmatprep.subr.bf16.mxu0 %v12728_v17  ;;  %11419 = vmatprep.mubr.msk.bf16.mxu1 %vm12729_vm0, %v12728_v17 }
 0x273   : >> { %11423 = vmatprep.subr.bf16.mxu1 %v12728_v17 }
 0x27b   : >> { %11276 = vmatmul.mubr.msk.bf16.vlgmr.msra.gmra.mrb[8].mxu0 %vm312_vm1, %v14174_v50 }
 0x27c   : >> { %11280 = vmatpush3.bf16.msra.mxu0 %v13029_v39  ;;  %11420 = vmatmul.mubr.msk.bf16.vlgmr.msra.gmra.mrb[8].mxu1 %vm312_vm1, %v14180_v45 }
 0x27d   : >> { %11424 = vmatpush3.bf16.msra.mxu1 %v13029_v39  ;;  %11281 = vmatprep.mubr.msk.bf16.mxu0 %vm12729_vm0, %v12728_v17 }
 0x27e   : >> { %11285 = vmatprep.subr.bf16.mxu0 %v12728_v17  ;;  %11425 = vmatprep.mubr.msk.bf16.mxu1 %vm12729_vm0, %v12728_v17 }
 0x27f   : >> { %11429 = vmatprep.subr.bf16.mxu1 %v12728_v17 }
 0x287   : >> { %11282 = vmatmul.mubr.msk.bf16.vlgmr.msra.gmra.mrb[8].mxu0 %vm312_vm1, %v14214_v10 }
 0x288   : >> { %11286 = vmatpush3.bf16.msra.mxu0 %v13073_v25  ;;  %11426 = vmatmul.mubr.msk.bf16.vlgmr.msra.gmra.mrb[8].mxu1 %vm312_vm1, %v14220_v55 }
 0x289   : >> { %11430 = vmatpush3.bf16.msra.mxu1 %v13073_v25  ;;  %11287 = vmatprep.mubr.msk.bf16.mxu0 %vm12729_vm0, %v12728_v17 }
 0x28a   : >> { %11291 = vmatprep.subr.bf16.mxu0 %v12728_v17  ;;  %11431 = vmatprep.mubr.msk.bf16.mxu1 %vm12729_vm0, %v12728_v17 }
 0x28b   : >> { %11435 = vmatprep.subr.bf16.mxu1 %v12728_v17 }
 0x293   : >> { %11288 = vmatmul.mubr.msk.bf16.vlgmr.msra.gmra.mrb[8].mxu0 %vm312_vm1, %v14254_v6 }
 0x294   : >> { %11292 = vmatpush3.bf16.msra.mxu0 %v13117_v58  ;;  %11432 = vmatmul.mubr.msk.bf16.vlgmr.msra.gmra.mrb[8].mxu1 %vm312_vm1, %v14260_v42  ;;  %v14296_v42 = vpack.c.bf16 %v10130_v37, %v10129_v27 }
 0x295   : >> { %11436 = vmatpush3.bf16.msra.mxu1 %v13117_v58  ;;  %11293 = vmatprep.mubr.msk.bf16.mxu0 %vm12729_vm0, %v12728_v17 }
 0x296   : >> { %11297 = vmatprep.subr.bf16.mxu0 %v12728_v17  ;;  %11437 = vmatprep.mubr.msk.bf16.mxu1 %vm12729_vm0, %v12728_v17  ;;  %v5059_v38 = vunpack.c.l.bf16 %v14296_v42  ;;  %v5060_v57 = vunpack.c.h.bf16 %v14296_v42 }
 0x297   : >> { %11441 = vmatprep.subr.bf16.mxu1 %v12728_v17 }
 0x298   : >> { %v14320_v24 = vsub.f32 %v10129_v27, %v5059_v38  ;;  %v14322_v62 = vsub.f32 %v10130_v37, %v5060_v57  ;;  %v14340_v27 = vpack.c.bf16 %v14326_v4, %v14324_v26 }
 0x29a   : >> { %15449 = vst [vmem:[#allocation34_spill] sm:$0xff] %v14320_v24  ;;  %15450 = vst [vmem:[#allocation35_spill] sm:$0xff] %v14322_v62  ;;  %v14334_v6 = vpack.c.bf16 %v14322_v62, %v14320_v24  ;;  %v14370_v62 = vpack.c.bf16 %v14362_v33, %v14360_v52 }
 0x29f   : >> { %11294 = vmatmul.mubr.msk.bf16.vlgmr.msra.gmra.mrb[8].mxu0 %vm312_vm1, %v14294_v12  ;;  %v10174_v12 = vld [vmem:[%s12914_s5 + $0x2f8] sm:$0xff] }
 0x2a0   : >> { %11298 = vmatpush3.bf16.msra.mxu0 %v13163_v3  ;;  %11438 = vmatmul.mubr.msk.bf16.vlgmr.msra.gmra.mrb[8].mxu1 %vm312_vm1, %v14300_v31  ;;  %v10173_v31 = vld [vmem:[%s12914_s5 + $0x2f0] sm:$0xff] }
 0x2a1   : >> { %11442 = vmatpush3.bf16.msra.mxu1 %v13163_v3  ;;  %11299 = vmatprep.mubr.msk.bf16.mxu0 %vm12729_vm0, %v12728_v17  ;;  %v14342_v37 = vpack.c.bf16 %v10174_v12, %v10173_v31 }
 0x2a2   : >> { %11303 = vmatprep.subr.bf16.mxu0 %v12728_v17  ;;  %11443 = vmatprep.mubr.msk.bf16.mxu1 %vm12729_vm0, %v12728_v17 }
 0x2a3   : >> { %11447 = vmatprep.subr.bf16.mxu1 %v12728_v17  ;;  %v6254_v38 = vunpack.c.l.bf16 %v14342_v37  ;;  %v6255_v57 = vunpack.c.h.bf16 %v14342_v37 }
 0x2a5   : >> { %v14364_v4 = vsub.f32 %v10173_v31, %v6254_v38  ;;  %v14366_v26 = vsub.f32 %v10174_v12, %v6255_v57 }
 0x2a7   : >> { %v14374_v24 = vpack.c.bf16 %v14366_v26, %v14364_v4 }
 0x2ab   : >> { %11300 = vmatmul.mubr.msk.bf16.vlgmr.msra.gmra.mrb[8].mxu0 %vm312_vm1, %v14334_v6 }
 0x2ac   : >> { %11304 = vmatpush3.bf16.msra.mxu0 %v13209_v11  ;;  %11444 = vmatmul.mubr.msk.bf16.vlgmr.msra.gmra.mrb[8].mxu1 %vm312_vm1, %v14340_v27 }
 0x2ad   : >> { %11448 = vmatpush3.bf16.msra.mxu1 %v13209_v11  ;;  %11305 = vmatprep.mubr.msk.bf16.mxu0 %vm12729_vm0, %v12728_v17 }
 0x2ae   : >> { %11309 = vmatprep.subr.bf16.mxu0 %v12728_v17  ;;  %11449 = vmatprep.mubr.msk.bf16.mxu1 %vm12729_vm0, %v12728_v17 }
 0x2af   : >> { %11453 = vmatprep.subr.bf16.mxu1 %v12728_v17 }
 0x2b7   : >> { %11306 = vmatmul.mubr.msk.bf16.vlgmr.msra.gmra.mrb[8].mxu0 %vm312_vm1, %v14370_v62 }
 0x2b8   : >> { %11310 = vmatpush3.bf16.msra.mxu0 %v12903_v16  ;;  %11450 = vmatmul.mubr.msk.bf16.vlgmr.msra.gmra.mrb[8].mxu1 %vm312_vm1, %v14374_v24 }
 0x2b9   : >> { %11454 = vmatpush3.bf16.msra.mxu1 %v12903_v16  ;;  %11311 = vmatprep.mubr.msk.bf16.mxu0 %vm12729_vm0, %v12728_v17 }
 0x2ba   : >> { %11315 = vmatprep.subr.bf16.mxu0 %v12728_v17  ;;  %11455 = vmatprep.mubr.msk.bf16.mxu1 %vm12729_vm0, %v12728_v17 }
 0x2bb   : >> { %11459 = vmatprep.subr.bf16.mxu1 %v12728_v17 }
 0x2c3   : >> { %11312 = vmatmul.mubr.msk.bf16.vlgmr.msra.gmra.mrb[8].mxu0 %vm312_vm1, %v14060_v20  ;;  %v5087_v20 = vunpack.c.l.bf16 %v14094_v46 }
 0x2c4   : >> { %11316 = vmatpush3.bf16.msra.mxu0 %v12939_v35  ;;  %11456 = vmatmul.mubr.msk.bf16.vlgmr.msra.gmra.mrb[8].mxu1 %vm312_vm1, %v14064_v2  ;;  %v5088_v2 = vunpack.c.h.bf16 %v14094_v46 }
 0x2c5   : >> { %11460 = vmatpush3.bf16.msra.mxu1 %v12939_v35  ;;  %11317 = vmatprep.mubr.msk.bf16.mxu0 %vm12729_vm0, %v12728_v17  ;;  %v5103_v46 = vsub.f32 %v14071_v56, %v5087_v20  ;;  %v6282_v56 = vunpack.c.l.bf16 %v14140_v5  ;;  %v5093_v20 = vunpack.c.l.bf16 %v14214_v10 }
 0x2c6   : >> { %11321 = vmatprep.subr.bf16.mxu0 %v12728_v17  ;;  %11461 = vmatprep.mubr.msk.bf16.mxu1 %vm12729_vm0, %v12728_v17 }
 0x2c7   : >> { %11465 = vmatprep.subr.bf16.mxu1 %v12728_v17 }
 0x2cf   : >> { %11318 = vmatmul.mubr.msk.bf16.vlgmr.msra.gmra.mrb[8].mxu0 %vm312_vm1, %v14096_v47  ;;  %v6280_v47 = vunpack.c.l.bf16 %v14100_v19 }
 0x2d0   : >> { %11322 = vmatpush3.bf16.msra.mxu0 %v12985_v63  ;;  %11462 = vmatmul.mubr.msk.bf16.vlgmr.msra.gmra.mrb[8].mxu1 %vm312_vm1, %v14102_v53  ;;  %v6281_v53 = vunpack.c.h.bf16 %v14100_v19 }
 0x2d1   : >> { %11466 = vmatpush3.bf16.msra.mxu1 %v12985_v63  ;;  %11323 = vmatprep.mubr.msk.bf16.mxu0 %vm12729_vm0, %v12728_v17 }
 0x2d2   : >> { %11327 = vmatprep.subr.bf16.mxu0 %v12728_v17  ;;  %11467 = vmatprep.mubr.msk.bf16.mxu1 %vm12729_vm0, %v12728_v17  ;;  %v6297_v19 = vsub.f32 %v14079_v41, %v6281_v53 }
 0x2d3   : >> { %11471 = vmatprep.subr.bf16.mxu1 %v12728_v17 }
 0x2db   : >> { %11324 = vmatmul.mubr.msk.bf16.vlgmr.msra.gmra.mrb[8].mxu0 %vm312_vm1, %v14136_v59  ;;  %v5104_v59 = vsub.f32 %v14073_v36, %v5088_v2  ;;  %v6283_v36 = vunpack.c.h.bf16 %v14140_v5  ;;  %v5094_v2 = vunpack.c.h.bf16 %v14214_v10 }
 0x2dc   : >> { %11328 = vmatpush3.bf16.msra.mxu0 %v13029_v39  ;;  %11468 = vmatmul.mubr.msk.bf16.vlgmr.msra.gmra.mrb[8].mxu1 %vm312_vm1, %v14142_v48  ;;  %v6296_v48 = vsub.f32 %v14077_v7, %v6280_v47  ;;  %v15453_v47 = vld [vmem:[#allocation21_spill] sm:$0xff] }
 0x2dd   : >> { %11472 = vmatpush3.bf16.msra.mxu1 %v13029_v39  ;;  %11329 = vmatprep.mubr.msk.bf16.mxu0 %vm12729_vm0, %v12728_v17  ;;  %v6299_v5 = vsub.f32 %v14126_v0, %v6283_v36  ;;  %v6284_v0 = vunpack.c.l.bf16 %v14180_v45  ;;  %v5110_v61 = vsub.f32 %v14202_v15, %v5094_v2  ;;  %v15467_v2 = vld [vmem:[#allocation35_spill] sm:$0xff] }
 0x2de   : >> { %11333 = vmatprep.subr.bf16.mxu0 %v12728_v17  ;;  %11473 = vmatprep.mubr.msk.bf16.mxu1 %vm12729_vm0, %v12728_v17 }
 0x2df   : >> { %11477 = vmatprep.subr.bf16.mxu1 %v12728_v17  ;;  %v6300_v29 = vsub.f32 %v14164_v49, %v6284_v0  ;;  %v5109_v49 = vsub.f32 %v14200_v14, %v5093_v20 }
 0x2e1   : >> { %v6314_v57 = vpack.c.bf16 %v6301_v22, %v6300_v29  ;;  %v5122_v53 = vpack.c.bf16 %v5110_v61, %v5109_v49  ;;  %v5099_v29 = vunpack.c.l.bf16 %v14334_v6  ;;  %v5100_v22 = vunpack.c.h.bf16 %v14334_v6  ;;  %v15466_v6 = vld [vmem:[#allocation34_spill] sm:$0xff]  ;;  %v15469_v49 = vld [vmem:[#allocation37_spill] sm:$0xff] }
 0x2e3   : >> { %v5115_v20 = vsub.f32 %v15466_v6, %v5099_v29  ;;  %v10206_v29 = vld [vmem:[%s12914_s5 + $0x328] sm:$0xff] }
 0x2e7   : >> { %11330 = vmatmul.mubr.msk.bf16.vlgmr.msra.gmra.mrb[8].mxu0 %vm312_vm1, %v14176_v43  ;;  %v5119_v43 = vpack.c.bf16 %v5104_v59, %v5103_v46  ;;  %v15454_v59 = vld [vmem:[#allocation22_spill] sm:$0xff] }
 0x2e8   : >> { %11334 = vmatpush3.bf16.msra.mxu0 %v13073_v25  ;;  %11474 = vmatmul.mubr.msk.bf16.vlgmr.msra.gmra.mrb[8].mxu1 %vm312_vm1, %v14182_v21  ;;  %v6312_v21 = vpack.c.bf16 %v6297_v19, %v6296_v48  ;;  %v5095_v48 = vunpack.c.l.bf16 %v15454_v59  ;;  %v5096_v19 = vunpack.c.h.bf16 %v15454_v59  ;;  %v6295_v59 = vunpack.c.h.bf16 %v14374_v24 }
 0x2e9   : >> { %11478 = vmatpush3.bf16.msra.mxu1 %v13073_v25  ;;  %11335 = vmatprep.mubr.msk.bf16.mxu0 %vm12729_vm0, %v12728_v17 }
 0x2ea   : >> { %11339 = vmatprep.subr.bf16.mxu0 %v12728_v17  ;;  %11479 = vmatprep.mubr.msk.bf16.mxu1 %vm12729_vm0, %v12728_v17 }
 0x2eb   : >> { %11483 = vmatprep.subr.bf16.mxu1 %v12728_v17 }
 0x2f3   : >> { %11336 = vmatmul.mubr.msk.bf16.vlgmr.msra.gmra.mrb[8].mxu0 %vm312_vm1, %v14216_v54  ;;  %v5090_v54 = vunpack.c.h.bf16 %v14134_v13 }
 0x2f4   : >> { %11340 = vmatpush3.bf16.msra.mxu0 %v13117_v58  ;;  %11480 = vmatmul.mubr.msk.bf16.vlgmr.msra.gmra.mrb[8].mxu1 %vm312_vm1, %v14222_v23 }
 0x2f5   : >> { %11484 = vmatpush3.bf16.msra.mxu1 %v13117_v58  ;;  %11341 = vmatprep.mubr.msk.bf16.mxu0 %vm12729_vm0, %v12728_v17  ;;  %v5106_v41 = vsub.f32 %v14122_v44, %v5090_v54 }
 0x2f6   : >> { %11345 = vmatprep.subr.bf16.mxu0 %v12728_v17  ;;  %11485 = vmatprep.mubr.msk.bf16.mxu1 %vm12729_vm0, %v12728_v17 }
 0x2f7   : >> { %11489 = vmatprep.subr.bf16.mxu1 %v12728_v17 }
 0x2ff   : >> { %11342 = vmatmul.mubr.msk.bf16.vlgmr.msra.gmra.mrb[8].mxu0 %vm312_vm1, %v14256_v8 }
 0x300   : >> { %11346 = vmatpush3.bf16.msra.mxu0 %v13163_v3  ;;  %11486 = vmatmul.mubr.msk.bf16.vlgmr.msra.gmra.mrb[8].mxu1 %vm312_vm1, %v14262_v9 }
 0x301   : >> { %11490 = vmatpush3.bf16.msra.mxu1 %v13163_v3  ;;  %11347 = vmatprep.mubr.msk.bf16.mxu0 %vm12729_vm0, %v12728_v17 }
 0x302   : >> { %11351 = vmatprep.subr.bf16.mxu0 %v12728_v17  ;;  %11491 = vmatprep.mubr.msk.bf16.mxu1 %vm12729_vm0, %v12728_v17 }
 0x303   : >> { %11495 = vmatprep.subr.bf16.mxu1 %v12728_v17 }
 0x30b   : >> { %11348 = vmatmul.mubr.msk.bf16.vlgmr.msra.gmra.mrb[8].mxu0 %vm312_vm1, %v14296_v42 }
 0x30c   : >> { %11352 = vmatpush3.bf16.msra.mxu0 %v13209_v11  ;;  %11492 = vmatmul.mubr.msk.bf16.vlgmr.msra.gmra.mrb[8].mxu1 %vm312_vm1, %v14302_v51 }
 0x30d   : >> { %11496 = vmatpush3.bf16.msra.mxu1 %v13209_v11  ;;  %11353 = vmatprep.mubr.msk.bf16.mxu0 %vm12729_vm0, %v12728_v17 }
 0x30e   : >> { %11357 = vmatprep.subr.bf16.mxu0 %v12728_v17  ;;  %11497 = vmatprep.mubr.msk.bf16.mxu1 %vm12729_vm0, %v12728_v17 }
 0x30f   : >> { %11501 = vmatprep.subr.bf16.mxu1 %v12728_v17 }
 0x317   : >> { %11354 = vmatmul.mubr.msk.bf16.vlgmr.msra.gmra.mrb[8].mxu0 %vm312_vm1, %v14336_v32  ;;  %v5089_v32 = vunpack.c.l.bf16 %v14134_v13  ;;  %v6298_v13 = vsub.f32 %v14124_v60, %v6282_v56  ;;  %v15458_v56 = vld [vmem:[#allocation26_spill] sm:$0xff] }
 0x318   : >> { %11358 = vmatpush3.bf16.msra.mxu0 %v12903_v16  ;;  %11498 = vmatmul.mubr.msk.bf16.vlgmr.msra.gmra.mrb[8].mxu1 %vm312_vm1, %v14342_v37  ;;  %v5107_v37 = vsub.f32 %v14160_v30, %v5091_v40  ;;  %v6286_v30 = vunpack.c.l.bf16 %v14220_v55 }
 0x319   : >> { %11502 = vmatpush3.bf16.msra.mxu1 %v12903_v16  ;;  %11359 = vmatprep.mubr.msk.bf16.mxu0 %vm12729_vm0, %v12728_v17  ;;  %v5105_v7 = vsub.f32 %v14120_v28, %v5089_v32  ;;  %v6313_v12 = vpack.c.bf16 %v6299_v5, %v6298_v13  ;;  %v5092_v28 = vunpack.c.h.bf16 %v14174_v50  ;;  %v15457_v32 = vld [vmem:[#allocation25_spill] sm:$0xff] }
 0x31a   : >> { %11363 = vmatprep.subr.bf16.mxu0 %v12728_v17  ;;  %11503 = vmatprep.mubr.msk.bf16.mxu1 %vm12729_vm0, %v12728_v17  ;;  %v6302_v10 = vsub.f32 %v14204_v1, %v6286_v30  ;;  %v15456_v1 = vld [vmem:[#allocation24_spill] sm:$0xff]  ;;  %v5112_v54 = vsub.f32 %v15457_v32, %v5096_v19  ;;  %v5116_v30 = vsub.f32 %v15467_v2, %v5100_v22  ;;  %v10202_v19 = vld [vmem:[%s12914_s5 + $0x308] sm:$0xff]  ;;  %v10247_v22 = vld [vmem:[%s12914_s5 + $0x3a0] sm:$0xff] }
 0x31b   : >> { %11507 = vmatprep.subr.bf16.mxu1 %v12728_v17  ;;  %v5120_v23 = vpack.c.bf16 %v5106_v41, %v5105_v7  ;;  %v5108_v45 = vsub.f32 %v14162_v34, %v5092_v28  ;;  %v6287_v34 = vunpack.c.h.bf16 %v14220_v55  ;;  %v15459_v7 = vld [vmem:[#allocation27_spill] sm:$0xff]  ;;  %v15462_v28 = vld [vmem:[#allocation30_spill] sm:$0xff] }
 0x31d   : >> { %v5121_v38 = vpack.c.bf16 %v5108_v45, %v5107_v37  ;;  %v6303_v55 = vsub.f32 %v15453_v47, %v6287_v34  ;;  %v15468_v34 = vld [vmem:[#allocation36_spill] sm:$0xff] }
 0x31f   : >> { %v6315_v46 = vpack.c.bf16 %v6303_v55, %v6302_v10  ;;  %v5125_v10 = vpack.c.bf16 %v5116_v30, %v5115_v20  ;;  %v5101_v55 = vunpack.c.l.bf16 %v14370_v62 }
 0x323   : >> { %11360 = vmatmul.mubr.msk.bf16.vlgmr.msra.gmra.mrb[8].mxu0 %vm312_vm1, %v5119_v43  ;;  %v15455_v43 = vld [vmem:[#allocation23_spill] sm:$0xff] }
 0x324   : >> { %11364 = vmatpush3.bf16.msra.mxu0 %v12939_v35  ;;  %11504 = vmatmul.mubr.msk.bf16.vlgmr.msra.gmra.mrb[8].mxu1 %vm312_vm1, %v6312_v21  ;;  %v6288_v14 = vunpack.c.l.bf16 %v15455_v43  ;;  %v6289_v15 = vunpack.c.h.bf16 %v15455_v43  ;;  %v5111_v21 = vsub.f32 %v15456_v1, %v5095_v48  ;;  %v10201_v48 = vld [vmem:[%s12914_s5 + $0x300] sm:$0xff] }
 0x325   : >> { %11508 = vmatpush3.bf16.msra.mxu1 %v12939_v35  ;;  %11365 = vmatprep.mubr.msk.bf16.mxu0 %vm12729_vm0, %v12728_v17  ;;  %v10243_v43 = vld [vmem:[%s12914_s5 + $0x380] sm:$0xff] }
 0x326   : >> { %11369 = vmatprep.subr.bf16.mxu0 %v12728_v17  ;;  %11509 = vmatprep.mubr.msk.bf16.mxu1 %vm12729_vm0, %v12728_v17  ;;  %v6304_v36 = vsub.f32 %v15458_v56, %v6288_v14  ;;  %v6305_v41 = vsub.f32 %v15459_v7, %v6289_v15  ;;  %v5123_v13 = vpack.c.bf16 %v5112_v54, %v5111_v21  ;;  %v10244_v14 = vld [vmem:[%s12914_s5 + $0x388] sm:$0xff] }
 0x327   : >> { %11513 = vmatprep.subr.bf16.mxu1 %v12728_v17  ;;  %v14624_v15 = vpack.c.bf16 %v10202_v19, %v10201_v48  ;;  %v6311_v21 = vsub.f32 %v14366_v26, %v6295_v59  ;;  %v14628_v32 = vpack.c.bf16 %v10244_v14, %v10243_v43  ;;  %v10249_v59 = vld [vmem:[%s12914_s5 + $0x3b0] sm:$0xff] }
 0x328   : >> { %v6316_v5 = vpack.c.bf16 %v6305_v41, %v6304_v36 }
 0x329   : >> { %v7433_v56 = vunpack.c.l.bf16 %v14624_v15  ;;  %v7434_v36 = vunpack.c.h.bf16 %v14624_v15  ;;  %v8627_v7 = vunpack.c.h.bf16 %v14628_v32 }
 0x32b   : >> { %v14637_v26 = vsub.f32 %v10202_v19, %v7434_v36 }
 0x32e   : >> { %v3790_v8 = vpop.f32.mrb[4].mxu0 }
 0x32f   : >> { %9797 = vst [vmem:[%s13944_s7 + $0x10] sm:$0xff] %v3790_v8  ;;  %v4983_v42 = vpop.f32.mrb[4].mxu1  ;;  %v11115_v9 = vpop.f32.mrb[5].mxu0  ;;  %11366 = vmatmul.mubr.msk.bf16.vlgmr.msra.gmra.mrb[8].mxu0 %vm312_vm1, %v5120_v23  ;;  %v15460_v23 = vld [vmem:[#allocation28_spill] sm:$0xff] }
 0x330   : >> { %9798 = vst [vmem:[%s13944_s7 + $0x18] sm:$0xff] %v4983_v42  ;;  %v11259_v44 = vpop.f32.mrb[5].mxu1  ;;  %11370 = vmatpush3.bf16.msra.mxu0 %v12985_v63  ;;  %11510 = vmatmul.mubr.msk.bf16.vlgmr.msra.gmra.mrb[8].mxu1 %vm312_vm1, %v6313_v12  ;;  %v3793_v60 = vpop.f32.mrb[6].mxu0  ;;  %v5097_v12 = vunpack.c.l.bf16 %v15460_v23  ;;  %v5098_v8 = vunpack.c.h.bf16 %v15460_v23  ;;  %v15461_v42 = vld [vmem:[#allocation29_spill] sm:$0xff]  ;;  %v10204_v23 = vld [vmem:[%s12914_s5 + $0x318] sm:$0xff] }
 0x331   : >> { %11514 = vmatpush3.bf16.msra.mxu1 %v12985_v63  ;;  %9805 = vst [vmem:[%s13944_s7 + $0x50] sm:$0xff] %v3793_v60  ;;  %v4986_v31 = vpop.f32.mrb[6].mxu1  ;;  %v11116_v51 = vpop.f32.mrb[7].mxu0  ;;  %11371 = vmatprep.mubr.msk.bf16.mxu0 %vm12729_vm0, %v12728_v17  ;;  %v6290_v9 = vunpack.c.l.bf16 %v15461_v42  ;;  %v6291_v40 = vunpack.c.h.bf16 %v15461_v42  ;;  %v15463_v60 = vld [vmem:[#allocation31_spill] sm:$0xff] }
 0x332   : >> { %9806 = vst [vmem:[%s13944_s7 + $0x58] sm:$0xff] %v4986_v31  ;;  %v11260_v50 = vpop.f32.mrb[7].mxu1  ;;  %11375 = vmatprep.subr.bf16.mxu0 %v12728_v17  ;;  %11515 = vmatprep.mubr.msk.bf16.mxu1 %vm12729_vm0, %v12728_v17  ;;  %v5113_v44 = vsub.f32 %v15462_v28, %v5097_v12  ;;  %v5114_v0 = vsub.f32 %v15463_v60, %v5098_v8  ;;  %v15465_v51 = vld [vmem:[#allocation33_spill] sm:$0xff]  ;;  %v10245_v12 = vld [vmem:[%s12914_s5 + $0x390] sm:$0xff]  ;;  %v10246_v8 = vld [vmem:[%s12914_s5 + $0x398] sm:$0xff] }
 0x333   : >> { %11519 = vmatprep.subr.bf16.mxu1 %v12728_v17  ;;  %v6306_v31 = vsub.f32 %v15464_v18, %v6290_v9  ;;  %v6307_v50 = vsub.f32 %v15465_v51, %v6291_v40  ;;  %v14666_v28 = vpack.c.bf16 %v10246_v8, %v10245_v12 }
 0x334   : >> { %v5124_v37 = vpack.c.bf16 %v5114_v0, %v5113_v44 }
 0x335   : >> { %v6317_v45 = vpack.c.bf16 %v6307_v50, %v6306_v31  ;;  %v8628_v0 = vunpack.c.l.bf16 %v14666_v28  ;;  %v8629_v18 = vunpack.c.h.bf16 %v14666_v28 }
 0x337   : >> { %v14688_v50 = vsub.f32 %v10245_v12, %v8628_v0  ;;  %v10252_v12 = vld [vmem:[%s12914_s5 + $0x3c8] sm:$0xff] }
 0x33b   : >> { %11372 = vmatmul.mubr.msk.bf16.vlgmr.msra.gmra.mrb[8].mxu0 %vm312_vm1, %v5121_v38  ;;  %v6292_v38 = vunpack.c.l.bf16 %v14340_v27 }
 0x33c   : >> { %11376 = vmatpush3.bf16.msra.mxu0 %v13029_v39  ;;  %11516 = vmatmul.mubr.msk.bf16.vlgmr.msra.gmra.mrb[8].mxu1 %vm312_vm1, %v6314_v57  ;;  %v6293_v57 = vunpack.c.h.bf16 %v14340_v27 }
 0x33d   : >> { %11520 = vmatpush3.bf16.msra.mxu1 %v13029_v39  ;;  %11377 = vmatprep.mubr.msk.bf16.mxu0 %vm12729_vm0, %v12728_v17  ;;  %v6308_v27 = vsub.f32 %v15468_v34, %v6292_v38  ;;  %v10248_v38 = vld [vmem:[%s12914_s5 + $0x3a8] sm:$0xff] }
 0x33e   : >> { %11381 = vmatprep.subr.bf16.mxu0 %v12728_v17  ;;  %11521 = vmatprep.mubr.msk.bf16.mxu1 %vm12729_vm0, %v12728_v17  ;;  %v6309_v61 = vsub.f32 %v15469_v49, %v6293_v57  ;;  %v14706_v2 = vpack.c.bf16 %v10248_v38, %v10247_v22 }
 0x33f   : >> { %11525 = vmatprep.subr.bf16.mxu1 %v12728_v17 }
 0x340   : >> { %v6318_v47 = vpack.c.bf16 %v6309_v61, %v6308_v27  ;;  %v8630_v27 = vunpack.c.l.bf16 %v14706_v2  ;;  %v8631_v49 = vunpack.c.h.bf16 %v14706_v2 }
 0x347   : >> { %11378 = vmatmul.mubr.msk.bf16.vlgmr.msra.gmra.mrb[8].mxu0 %vm312_vm1, %v5122_v53  ;;  %v5102_v53 = vunpack.c.h.bf16 %v14370_v62  ;;  %v5117_v62 = vsub.f32 %v14360_v52, %v5101_v55  ;;  %v14730_v55 = vsub.f32 %v10248_v38, %v8631_v49  ;;  %v10211_v49 = vld [vmem:[%s12914_s5 + $0x350] sm:$0xff] }
 0x348   : >> { %11382 = vmatpush3.bf16.msra.mxu0 %v13073_v25  ;;  %11522 = vmatmul.mubr.msk.bf16.vlgmr.msra.gmra.mrb[8].mxu1 %vm312_vm1, %v6315_v46  ;;  %v6294_v46 = vunpack.c.l.bf16 %v14374_v24 }
 0x349   : >> { %11526 = vmatpush3.bf16.msra.mxu1 %v13073_v25  ;;  %11383 = vmatprep.mubr.msk.bf16.mxu0 %vm12729_vm0, %v12728_v17  ;;  %v5118_v24 = vsub.f32 %v14362_v33, %v5102_v53  ;;  %v8626_v33 = vunpack.c.l.bf16 %v14628_v32  ;;  %v10207_v53 = vld [vmem:[%s12914_s5 + $0x330] sm:$0xff] }
 0x34a   : >> { %11387 = vmatprep.subr.bf16.mxu0 %v12728_v17  ;;  %11527 = vmatprep.mubr.msk.bf16.mxu1 %vm12729_vm0, %v12728_v17  ;;  %v6310_v1 = vsub.f32 %v14364_v4, %v6294_v46  ;;  %v14635_v4 = vsub.f32 %v10201_v48, %v7433_v56  ;;  %v10208_v46 = vld [vmem:[%s12914_s5 + $0x338] sm:$0xff] }
 0x34b   : >> { %11531 = vmatprep.subr.bf16.mxu1 %v12728_v17  ;;  %v5126_v54 = vpack.c.bf16 %v5118_v24, %v5117_v62  ;;  %v14641_v41 = vsub.f32 %v10243_v43, %v8626_v33  ;;  %v10250_v48 = vld [vmem:[%s12914_s5 + $0x3b8] sm:$0xff]  ;;  %v14740_v43 = vpack.c.bf16 %v10208_v46, %v10207_v53 }
 0x34c   : >> { %v6319_v52 = vpack.c.bf16 %v6311_v21, %v6310_v1  ;;  %v14658_v42 = vpack.c.bf16 %v14637_v26, %v14635_v4  ;;  %v14746_v62 = vpack.c.bf16 %v10250_v48, %v10249_v59 }
 0x34d   : >> { %v7439_v24 = vunpack.c.l.bf16 %v14740_v43  ;;  %v7440_v1 = vunpack.c.h.bf16 %v14740_v43 }
 0x34e   : >> { %v8632_v21 = vunpack.c.l.bf16 %v14746_v62 }
 0x34f   : >> { %v14764_v56 = vsub.f32 %v10207_v53, %v7439_v24  ;;  %v14766_v36 = vsub.f32 %v10208_v46, %v7440_v1  ;;  %v10212_v53 = vld [vmem:[%s12914_s5 + $0x358] sm:$0xff]  ;;  %v10253_v46 = vld [vmem:[%s12914_s5 + $0x3d0] sm:$0xff] }
 0x350   : >> { %v14820_v24 = vpack.c.bf16 %v10212_v53, %v10211_v49 }
 0x353   : >> { %11384 = vmatmul.mubr.msk.bf16.vlgmr.msra.gmra.mrb[8].mxu0 %vm312_vm1, %v5123_v13  ;;  %v14643_v13 = vsub.f32 %v10244_v14, %v8627_v7  ;;  %v10209_v7 = vld [vmem:[%s12914_s5 + $0x340] sm:$0xff] }
 0x354   : >> { %11388 = vmatpush3.bf16.msra.mxu0 %v13117_v58  ;;  %11528 = vmatmul.mubr.msk.bf16.vlgmr.msra.gmra.mrb[8].mxu1 %vm312_vm1, %v6316_v5  ;;  %v10203_v5 = vld [vmem:[%s12914_s5 + $0x310] sm:$0xff] }
 0x355   : >> { %11532 = vmatpush3.bf16.msra.mxu1 %v13117_v58  ;;  %11389 = vmatprep.mubr.msk.bf16.mxu0 %vm12729_vm0, %v12728_v17  ;;  %v14660_v9 = vpack.c.bf16 %v10204_v23, %v10203_v5  ;;  %v14664_v40 = vpack.c.bf16 %v14643_v13, %v14641_v41 }
 0x356   : >> { %11393 = vmatprep.subr.bf16.mxu0 %v12728_v17  ;;  %11533 = vmatprep.mubr.msk.bf16.mxu1 %vm12729_vm0, %v12728_v17 }
 0x357   : >> { %11537 = vmatprep.subr.bf16.mxu1 %v12728_v17  ;;  %v7435_v44 = vunpack.c.l.bf16 %v14660_v9  ;;  %v7436_v60 = vunpack.c.h.bf16 %v14660_v9 }
 0x359   : >> { %v14684_v31 = vsub.f32 %v10203_v5, %v7435_v44  ;;  %v14686_v51 = vsub.f32 %v10204_v23, %v7436_v60  ;;  %v10210_v5 = vld [vmem:[%s12914_s5 + $0x348] sm:$0xff]  ;;  %v10251_v23 = vld [vmem:[%s12914_s5 + $0x3c0] sm:$0xff] }
 0x35a   : >> { %v14780_v44 = vpack.c.bf16 %v10210_v5, %v10209_v7  ;;  %v14786_v0 = vpack.c.bf16 %v10252_v12, %v10251_v23 }
 0x35b   : >> { %v14698_v57 = vpack.c.bf16 %v14686_v51, %v14684_v31 }
 0x35f   : >> { %11390 = vmatmul.mubr.msk.bf16.vlgmr.msra.gmra.mrb[8].mxu0 %vm312_vm1, %v5124_v37  ;;  %v14690_v37 = vsub.f32 %v10246_v8, %v8629_v18  ;;  %v14778_v8 = vpack.c.bf16 %v14766_v36, %v14764_v56  ;;  %v7441_v18 = vunpack.c.l.bf16 %v14780_v44 }
 0x360   : >> { %11394 = vmatpush3.bf16.msra.mxu0 %v13163_v3  ;;  %11534 = vmatmul.mubr.msk.bf16.vlgmr.msra.gmra.mrb[8].mxu1 %vm312_vm1, %v6317_v45  ;;  %v10205_v45 = vld [vmem:[%s12914_s5 + $0x320] sm:$0xff] }
 0x361   : >> { %11538 = vmatpush3.bf16.msra.mxu1 %v13163_v3  ;;  %11395 = vmatprep.mubr.msk.bf16.mxu0 %vm12729_vm0, %v12728_v17  ;;  %v14700_v6 = vpack.c.bf16 %v10206_v29, %v10205_v45  ;;  %v14704_v20 = vpack.c.bf16 %v14690_v37, %v14688_v50  ;;  %v14804_v38 = vsub.f32 %v10209_v7, %v7441_v18  ;;  %v7444_v7 = vunpack.c.h.bf16 %v14820_v24 }
 0x362   : >> { %11399 = vmatprep.subr.bf16.mxu0 %v12728_v17  ;;  %11539 = vmatprep.mubr.msk.bf16.mxu1 %vm12729_vm0, %v12728_v17 }
 0x363   : >> { %11543 = vmatprep.subr.bf16.mxu1 %v12728_v17  ;;  %v7437_v30 = vunpack.c.l.bf16 %v14700_v6  ;;  %v7438_v34 = vunpack.c.h.bf16 %v14700_v6  ;;  %15471 = vst [vmem:[#allocation22_spill] sm:$0xff] %v14804_v38  ;;  %v14846_v18 = vsub.f32 %v10212_v53, %v7444_v7 }
 0x365   : >> { %v14724_v61 = vsub.f32 %v10205_v45, %v7437_v30  ;;  %v7442_v45 = vunpack.c.h.bf16 %v14780_v44  ;;  %15478 = vst [vmem:[#allocation29_spill] sm:$0xff] %v14846_v18 }
 0x367   : >> { %v14806_v30 = vsub.f32 %v10210_v5, %v7442_v45 }
 0x369   : >> { %15472 = vst [vmem:[#allocation23_spill] sm:$0xff] %v14806_v30 }
 0x36b   : >> { %11396 = vmatmul.mubr.msk.bf16.vlgmr.msra.gmra.mrb[8].mxu0 %vm312_vm1, %v5125_v10  ;;  %v14726_v10 = vsub.f32 %v10206_v29, %v7438_v34  ;;  %v8634_v29 = vunpack.c.l.bf16 %v14786_v0 }
 0x36c   : >> { %11400 = vmatpush3.bf16.msra.mxu0 %v13209_v11  ;;  %11540 = vmatmul.mubr.msk.bf16.vlgmr.msra.gmra.mrb[8].mxu1 %vm312_vm1, %v6318_v47  ;;  %v14728_v47 = vsub.f32 %v10247_v22, %v8630_v27  ;;  %v8635_v22 = vunpack.c.h.bf16 %v14786_v0 }
 0x36d   : >> { %11544 = vmatpush3.bf16.msra.mxu1 %v13209_v11  ;;  %11401 = vmatprep.mubr.msk.bf16.mxu0 %vm12729_vm0, %v12728_v17  ;;  %v14738_v19 = vpack.c.bf16 %v14726_v10, %v14724_v61  ;;  %v14808_v34 = vsub.f32 %v10251_v23, %v8634_v29 }
 0x36e   : >> { %11545 = vmatprep.mubr.msk.bf16.mxu1 %vm12729_vm0, %v12728_v17  ;;  %11549 = vmatprep.subr.bf16.mxu0 %v12728_v17  ;;  %v14744_v14 = vpack.c.bf16 %v14730_v55, %v14728_v47  ;;  %v14810_v27 = vsub.f32 %v10252_v12, %v8635_v22  ;;  %v10213_v22 = vld [vmem:[%s12914_s5 + $0x360] sm:$0xff] }
 0x36f   : >> { %11693 = vmatprep.subr.bf16.mxu1 %v12728_v17  ;;  %15473 = vst [vmem:[#allocation24_spill] sm:$0xff] %v14808_v34 }
 0x370   : >> { %15474 = vst [vmem:[#allocation25_spill] sm:$0xff] %v14810_v27  ;;  %v14824_v1 = vpack.c.bf16 %v14810_v27, %v14808_v34  ;;  %v10214_v27 = vld [vmem:[%s12914_s5 + $0x368] sm:$0xff]  ;;  %v10255_v34 = vld [vmem:[%s12914_s5 + $0x3e0] sm:$0xff] }
 0x372   : >> { %15476 = vst [vmem:[#allocation27_spill] sm:$0xff] %v14824_v1 }
 0x377   : >> { %11402 = vmatmul.mubr.msk.bf16.vlgmr.msra.gmra.mrb[8].mxu0 %vm312_vm1, %v5126_v54  ;;  %v8633_v54 = vunpack.c.h.bf16 %v14746_v62 }
 0x378   : >> { %11546 = vmatmul.mubr.msk.bf16.vlgmr.msra.gmra.mrb[8].mxu1 %vm312_vm1, %v6319_v52  ;;  %11550 = vmatpush3.bf16.msra.mxu0 %v12903_v16  ;;  %v14768_v52 = vsub.f32 %v10249_v59, %v8632_v21  ;;  %v10254_v59 = vld [vmem:[%s12914_s5 + $0x3d8] sm:$0xff] }
 0x379   : >> { %11694 = vmatpush3.bf16.msra.mxu1 %v12903_v16  ;;  %11551 = vmatprep.mubr.msk.bf16.mxu0 %vm12729_vm0, %v12728_v17  ;;  %v14770_v33 = vsub.f32 %v10250_v48, %v8633_v54  ;;  %v14818_v48 = vpack.c.bf16 %v14806_v30, %v14804_v38  ;;  %v14826_v21 = vpack.c.bf16 %v10254_v59, %v10253_v46  ;;  %v7443_v54 = vunpack.c.l.bf16 %v14820_v24  ;;  %v10256_v30 = vld [vmem:[%s12914_s5 + $0x3e8] sm:$0xff] }
 0x37a   : >> { %11555 = vmatprep.subr.bf16.mxu0 %v12728_v17  ;;  %11695 = vmatprep.mubr.msk.bf16.mxu1 %vm12729_vm0, %v12728_v17  ;;  %v14866_v53 = vpack.c.bf16 %v10256_v30, %v10255_v34 }
 0x37b   : >> { %11699 = vmatprep.subr.bf16.mxu1 %v12728_v17  ;;  %15470 = vst [vmem:[#allocation21_spill] sm:$0xff] %v14770_v33  ;;  %v14784_v60 = vpack.c.bf16 %v14770_v33, %v14768_v52  ;;  %15475 = vst [vmem:[#allocation26_spill] sm:$0xff] %v14818_v48  ;;  %v8636_v5 = vunpack.c.l.bf16 %v14826_v21  ;;  %v8637_v23 = vunpack.c.h.bf16 %v14826_v21  ;;  %v14844_v12 = vsub.f32 %v10211_v49, %v7443_v54 }
 0x37c   : >> { %v8638_v54 = vunpack.c.l.bf16 %v14866_v53  ;;  %v8639_v7 = vunpack.c.h.bf16 %v14866_v53 }
 0x37d   : >> { %15477 = vst [vmem:[#allocation28_spill] sm:$0xff] %v14844_v12  ;;  %v14848_v45 = vsub.f32 %v10253_v46, %v8636_v5  ;;  %v14850_v29 = vsub.f32 %v10254_v59, %v8637_v23  ;;  %v14858_v38 = vpack.c.bf16 %v14846_v18, %v14844_v12  ;;  %v10215_v18 = vld [vmem:[%s12914_s5 + $0x370] sm:$0xff]  ;;  %v10216_v12 = vld [vmem:[%s12914_s5 + $0x378] sm:$0xff] }
 0x37e   : >> { %v14900_v33 = vpack.c.bf16 %v10216_v12, %v10215_v18 }
 0x37f   : >> { %11552 = vmatmul.mubr.msk.bf16.vlgmr.msra.gmra.mrb[12].mxu0 %vm312_vm1, %v14658_v42  ;;  %15479 = vst [vmem:[#allocation30_spill] sm:$0xff] %v14848_v45  ;;  %15480 = vst [vmem:[#allocation31_spill] sm:$0xff] %v14850_v29  ;;  %v14864_v49 = vpack.c.bf16 %v14850_v29, %v14848_v45  ;;  %v14888_v29 = vsub.f32 %v10255_v34, %v8638_v54  ;;  %v14890_v45 = vsub.f32 %v10256_v30, %v8639_v7 }
 0x380   : >> { %11556 = vmatpush3.bf16.msra.mxu0 %v12939_v35  ;;  %11696 = vmatmul.mubr.msk.bf16.vlgmr.msra.gmra.mrb[12].mxu1 %vm312_vm1, %v14664_v40  ;;  %15481 = vst [vmem:[#allocation32_spill] sm:$0xff] %v14858_v38  ;;  %v7447_v30 = vunpack.c.l.bf16 %v14900_v33  ;;  %v7448_v34 = vunpack.c.h.bf16 %v14900_v33 }
 0x381   : >> { %11700 = vmatpush3.bf16.msra.mxu1 %v12939_v35  ;;  %11557 = vmatprep.mubr.msk.bf16.mxu0 %vm12729_vm0, %v12728_v17  ;;  %15482 = vst [vmem:[#allocation33_spill] sm:$0xff] %v14864_v49  ;;  %15485 = vst [vmem:[#allocation36_spill] sm:$0xff] %v14888_v29 }
 0x382   : >> { %11561 = vmatprep.subr.bf16.mxu0 %v12728_v17  ;;  %11701 = vmatprep.mubr.msk.bf16.mxu1 %vm12729_vm0, %v12728_v17  ;;  %15486 = vst [vmem:[#allocation37_spill] sm:$0xff] %v14890_v45  ;;  %v14924_v54 = vsub.f32 %v10215_v18, %v7447_v30  ;;  %v14926_v7 = vsub.f32 %v10216_v12, %v7448_v34  ;;  %v7479_v34 = vunpack.c.l.bf16 %v14778_v8 }
 0x383   : >> { %11705 = vmatprep.subr.bf16.mxu1 %v12728_v17 }
 0x38b   : >> { %11558 = vmatmul.mubr.msk.bf16.vlgmr.msra.gmra.mrb[12].mxu0 %vm312_vm1, %v14698_v57 }
 0x38c   : >> { %11562 = vmatpush3.bf16.msra.mxu0 %v12985_v63  ;;  %11702 = vmatmul.mubr.msk.bf16.vlgmr.msra.gmra.mrb[12].mxu1 %vm312_vm1, %v14704_v20 }
 0x38d   : >> { %11706 = vmatpush3.bf16.msra.mxu1 %v12985_v63  ;;  %11563 = vmatprep.mubr.msk.bf16.mxu0 %vm12729_vm0, %v12728_v17 }
 0x38e   : >> { %11567 = vmatprep.subr.bf16.mxu0 %v12728_v17  ;;  %11707 = vmatprep.mubr.msk.bf16.mxu1 %vm12729_vm0, %v12728_v17 }
 0x38f   : >> { %11711 = vmatprep.subr.bf16.mxu1 %v12728_v17 }
 0x397   : >> { %11564 = vmatmul.mubr.msk.bf16.vlgmr.msra.gmra.mrb[12].mxu0 %vm312_vm1, %v14738_v19 }
 0x398   : >> { %11568 = vmatpush3.bf16.msra.mxu0 %v13029_v39  ;;  %11708 = vmatmul.mubr.msk.bf16.vlgmr.msra.gmra.mrb[12].mxu1 %vm312_vm1, %v14744_v14 }
 0x399   : >> { %11712 = vmatpush3.bf16.msra.mxu1 %v13029_v39  ;;  %11569 = vmatprep.mubr.msk.bf16.mxu0 %vm12729_vm0, %v12728_v17 }
 0x39a   : >> { %11573 = vmatprep.subr.bf16.mxu0 %v12728_v17  ;;  %11713 = vmatprep.mubr.msk.bf16.mxu1 %vm12729_vm0, %v12728_v17 }
 0x39b   : >> { %11717 = vmatprep.subr.bf16.mxu1 %v12728_v17 }
 0x3a3   : >> { %11570 = vmatmul.mubr.msk.bf16.vlgmr.msra.gmra.mrb[12].mxu0 %vm312_vm1, %v14778_v8 }
 0x3a4   : >> { %11574 = vmatpush3.bf16.msra.mxu0 %v13073_v25  ;;  %11714 = vmatmul.mubr.msk.bf16.vlgmr.msra.gmra.mrb[12].mxu1 %vm312_vm1, %v14784_v60 }
 0x3a5   : >> { %11718 = vmatpush3.bf16.msra.mxu1 %v13073_v25  ;;  %11575 = vmatprep.mubr.msk.bf16.mxu0 %vm12729_vm0, %v12728_v17 }
 0x3a6   : >> { %11579 = vmatprep.subr.bf16.mxu0 %v12728_v17  ;;  %11719 = vmatprep.mubr.msk.bf16.mxu1 %vm12729_vm0, %v12728_v17 }
 0x3a7   : >> { %11723 = vmatprep.subr.bf16.mxu1 %v12728_v17 }
 0x3af   : >> { %11576 = vmatmul.mubr.msk.bf16.vlgmr.msra.gmra.mrb[12].mxu0 %vm312_vm1, %v14818_v48 }
 0x3b0   : >> { %11580 = vmatpush3.bf16.msra.mxu0 %v13117_v58  ;;  %11720 = vmatmul.mubr.msk.bf16.vlgmr.msra.gmra.mrb[12].mxu1 %vm312_vm1, %v14824_v1  ;;  %v14860_v1 = vpack.c.bf16 %v10214_v27, %v10213_v22 }
 0x3b1   : >> { %11724 = vmatpush3.bf16.msra.mxu1 %v13117_v58  ;;  %11581 = vmatprep.mubr.msk.bf16.mxu0 %vm12729_vm0, %v12728_v17 }
 0x3b2   : >> { %11585 = vmatprep.subr.bf16.mxu0 %v12728_v17  ;;  %11725 = vmatprep.mubr.msk.bf16.mxu1 %vm12729_vm0, %v12728_v17  ;;  %v7445_v46 = vunpack.c.l.bf16 %v14860_v1  ;;  %v7446_v59 = vunpack.c.h.bf16 %v14860_v1 }
 0x3b3   : >> { %11729 = vmatprep.subr.bf16.mxu1 %v12728_v17 }
 0x3b4   : >> { %v14884_v5 = vsub.f32 %v10213_v22, %v7445_v46  ;;  %v14886_v23 = vsub.f32 %v10214_v27, %v7446_v59  ;;  %v14904_v22 = vpack.c.bf16 %v14890_v45, %v14888_v29 }
 0x3b6   : >> { %15483 = vst [vmem:[#allocation34_spill] sm:$0xff] %v14884_v5  ;;  %15484 = vst [vmem:[#allocation35_spill] sm:$0xff] %v14886_v23  ;;  %v14898_v48 = vpack.c.bf16 %v14886_v23, %v14884_v5  ;;  %v14934_v23 = vpack.c.bf16 %v14926_v7, %v14924_v54 }
 0x3bb   : >> { %11582 = vmatmul.mubr.msk.bf16.vlgmr.msra.gmra.mrb[12].mxu0 %vm312_vm1, %v14858_v38  ;;  %v10258_v38 = vld [vmem:[%s12914_s5 + $0x3f8] sm:$0xff] }
 0x3bc   : >> { %11586 = vmatpush3.bf16.msra.mxu0 %v13163_v3  ;;  %11726 = vmatmul.mubr.msk.bf16.vlgmr.msra.gmra.mrb[12].mxu1 %vm312_vm1, %v14864_v49  ;;  %v10257_v49 = vld [vmem:[%s12914_s5 + $0x3f0] sm:$0xff] }
 0x3bd   : >> { %11730 = vmatpush3.bf16.msra.mxu1 %v13163_v3  ;;  %11587 = vmatprep.mubr.msk.bf16.mxu0 %vm12729_vm0, %v12728_v17  ;;  %v14906_v27 = vpack.c.bf16 %v10258_v38, %v10257_v49 }
 0x3be   : >> { %11591 = vmatprep.subr.bf16.mxu0 %v12728_v17  ;;  %11731 = vmatprep.mubr.msk.bf16.mxu1 %vm12729_vm0, %v12728_v17 }
 0x3bf   : >> { %11735 = vmatprep.subr.bf16.mxu1 %v12728_v17  ;;  %v8640_v46 = vunpack.c.l.bf16 %v14906_v27  ;;  %v8641_v59 = vunpack.c.h.bf16 %v14906_v27 }
 0x3c1   : >> { %v14928_v45 = vsub.f32 %v10257_v49, %v8640_v46  ;;  %v14930_v29 = vsub.f32 %v10258_v38, %v8641_v59  ;;  %v7480_v46 = vunpack.c.h.bf16 %v14778_v8  ;;  %v15487_v59 = vld [vmem:[#allocation21_spill] sm:$0xff] }
 0x3c3   : >> { %v14938_v5 = vpack.c.bf16 %v14930_v29, %v14928_v45 }
 0x3c7   : >> { %11588 = vmatmul.mubr.msk.bf16.vlgmr.msra.gmra.mrb[12].mxu0 %vm312_vm1, %v14898_v48 }
 0x3c8   : >> { %11592 = vmatpush3.bf16.msra.mxu0 %v13209_v11  ;;  %11732 = vmatmul.mubr.msk.bf16.vlgmr.msra.gmra.mrb[12].mxu1 %vm312_vm1, %v14904_v22 }
 0x3c9   : >> { %11736 = vmatpush3.bf16.msra.mxu1 %v13209_v11  ;;  %11593 = vmatprep.mubr.msk.bf16.mxu0 %vm12729_vm0, %v12728_v17 }
 0x3ca   : >> { %11597 = vmatprep.subr.bf16.mxu0 %v12728_v17  ;;  %11737 = vmatprep.mubr.msk.bf16.mxu1 %vm12729_vm0, %v12728_v17 }
 0x3cb   : >> { %11741 = vmatprep.subr.bf16.mxu1 %v12728_v17 }
 0x3d3   : >> { %11594 = vmatmul.mubr.msk.bf16.vlgmr.msra.gmra.mrb[12].mxu0 %vm312_vm1, %v14934_v23 }
 0x3d4   : >> { %11598 = vmatpush3.bf16.msra.mxu0 %v12903_v16  ;;  %11738 = vmatmul.mubr.msk.bf16.vlgmr.msra.gmra.mrb[12].mxu1 %vm312_vm1, %v14938_v5 }
 0x3d5   : >> { %11742 = vmatpush3.bf16.msra.mxu1 %v12903_v16  ;;  %11599 = vmatprep.mubr.msk.bf16.mxu0 %vm12729_vm0, %v12728_v17 }
 0x3d6   : >> { %11603 = vmatprep.subr.bf16.mxu0 %v12728_v17  ;;  %11743 = vmatprep.mubr.msk.bf16.mxu1 %vm12729_vm0, %v12728_v17 }
 0x3d7   : >> { %11747 = vmatprep.subr.bf16.mxu1 %v12728_v17 }
 0x3df   : >> { %11600 = vmatmul.mubr.msk.bf16.vlgmr.msra.gmra.mrb[12].mxu0 %vm312_vm1, %v14624_v15  ;;  %v7473_v15 = vunpack.c.l.bf16 %v14658_v42 }
 0x3e0   : >> { %11604 = vmatpush3.bf16.msra.mxu0 %v12939_v35  ;;  %11744 = vmatmul.mubr.msk.bf16.vlgmr.msra.gmra.mrb[12].mxu1 %vm312_vm1, %v14628_v32  ;;  %v7474_v32 = vunpack.c.h.bf16 %v14658_v42 }
 0x3e1   : >> { %11748 = vmatpush3.bf16.msra.mxu1 %v12939_v35  ;;  %11605 = vmatprep.mubr.msk.bf16.mxu0 %vm12729_vm0, %v12728_v17  ;;  %v7489_v42 = vsub.f32 %v14635_v4, %v7473_v15  ;;  %v8668_v4 = vunpack.c.l.bf16 %v14704_v20 }
 0x3e2   : >> { %11609 = vmatprep.subr.bf16.mxu0 %v12728_v17  ;;  %11749 = vmatprep.mubr.msk.bf16.mxu1 %vm12729_vm0, %v12728_v17 }
 0x3e3   : >> { %11753 = vmatprep.subr.bf16.mxu1 %v12728_v17 }
 0x3eb   : >> { %11606 = vmatmul.mubr.msk.bf16.vlgmr.msra.gmra.mrb[12].mxu0 %vm312_vm1, %v14660_v9  ;;  %v8666_v9 = vunpack.c.l.bf16 %v14664_v40 }
 0x3ec   : >> { %11610 = vmatpush3.bf16.msra.mxu0 %v12985_v63  ;;  %11750 = vmatmul.mubr.msk.bf16.vlgmr.msra.gmra.mrb[12].mxu1 %vm312_vm1, %v14666_v28  ;;  %v8667_v28 = vunpack.c.h.bf16 %v14664_v40 }
 0x3ed   : >> { %11754 = vmatpush3.bf16.msra.mxu1 %v12985_v63  ;;  %11611 = vmatprep.mubr.msk.bf16.mxu0 %vm12729_vm0, %v12728_v17 }
 0x3ee   : >> { %11615 = vmatprep.subr.bf16.mxu0 %v12728_v17  ;;  %11755 = vmatprep.mubr.msk.bf16.mxu1 %vm12729_vm0, %v12728_v17  ;;  %v8683_v40 = vsub.f32 %v14643_v13, %v8667_v28 }
 0x3ef   : >> { %11759 = vmatprep.subr.bf16.mxu1 %v12728_v17 }
 0x3f7   : >> { %11612 = vmatmul.mubr.msk.bf16.vlgmr.msra.gmra.mrb[12].mxu0 %vm312_vm1, %v14700_v6  ;;  %v7490_v6 = vsub.f32 %v14637_v26, %v7474_v32  ;;  %v8669_v26 = vunpack.c.h.bf16 %v14704_v20  ;;  %v15488_v32 = vld [vmem:[#allocation26_spill] sm:$0xff] }
 0x3f8   : >> { %11616 = vmatpush3.bf16.msra.mxu0 %v13029_v39  ;;  %11756 = vmatmul.mubr.msk.bf16.vlgmr.msra.gmra.mrb[12].mxu1 %vm312_vm1, %v14706_v2  ;;  %v8682_v2 = vsub.f32 %v14641_v41, %v8666_v9  ;;  %v7481_v9 = vunpack.c.l.bf16 %v15488_v32  ;;  %v7482_v28 = vunpack.c.h.bf16 %v15488_v32 }
 0x3f9   : >> { %11760 = vmatpush3.bf16.msra.mxu1 %v13029_v39  ;;  %11617 = vmatprep.mubr.msk.bf16.mxu0 %vm12729_vm0, %v12728_v17  ;;  %v8685_v20 = vsub.f32 %v14690_v37, %v8669_v26  ;;  %v8670_v37 = vunpack.c.l.bf16 %v14744_v14  ;;  %v15494_v26 = vld [vmem:[#allocation32_spill] sm:$0xff] }
 0x3fa   : >> { %11621 = vmatprep.subr.bf16.mxu0 %v12728_v17  ;;  %11761 = vmatprep.mubr.msk.bf16.mxu1 %vm12729_vm0, %v12728_v17 }
 0x3fb   : >> { %11765 = vmatprep.subr.bf16.mxu1 %v12728_v17 }
 0x403   : >> { %11618 = vmatmul.mubr.msk.bf16.vlgmr.msra.gmra.mrb[12].mxu0 %vm312_vm1, %v14740_v43  ;;  %v7505_v43 = vpack.c.bf16 %v7490_v6, %v7489_v42  ;;  %v15489_v42 = vld [vmem:[#allocation27_spill] sm:$0xff] }
 0x404   : >> { %11622 = vmatpush3.bf16.msra.mxu0 %v13073_v25  ;;  %11762 = vmatmul.mubr.msk.bf16.vlgmr.msra.gmra.mrb[12].mxu1 %vm312_vm1, %v14746_v62  ;;  %v7475_v62 = vunpack.c.l.bf16 %v14698_v57 }
 0x405   : >> { %11766 = vmatpush3.bf16.msra.mxu1 %v13073_v25  ;;  %11623 = vmatprep.mubr.msk.bf16.mxu0 %vm12729_vm0, %v12728_v17 }
 0x406   : >> { %11627 = vmatprep.subr.bf16.mxu0 %v12728_v17  ;;  %11767 = vmatprep.mubr.msk.bf16.mxu1 %vm12729_vm0, %v12728_v17  ;;  %v7491_v41 = vsub.f32 %v14684_v31, %v7475_v62  ;;  %v7478_v31 = vunpack.c.h.bf16 %v14738_v19  ;;  %v15493_v62 = vld [vmem:[#allocation25_spill] sm:$0xff] }
 0x407   : >> { %11771 = vmatprep.subr.bf16.mxu1 %v12728_v17 }
 0x40f   : >> { %11624 = vmatmul.mubr.msk.bf16.vlgmr.msra.gmra.mrb[12].mxu0 %vm312_vm1, %v14780_v44 }
 0x410   : >> { %11628 = vmatpush3.bf16.msra.mxu0 %v13117_v58  ;;  %11768 = vmatmul.mubr.msk.bf16.vlgmr.msra.gmra.mrb[12].mxu1 %vm312_vm1, %v14786_v0 }
 0x411   : >> { %11772 = vmatpush3.bf16.msra.mxu1 %v13117_v58  ;;  %11629 = vmatprep.mubr.msk.bf16.mxu0 %vm12729_vm0, %v12728_v17 }
 0x412   : >> { %11633 = vmatprep.subr.bf16.mxu0 %v12728_v17  ;;  %11773 = vmatprep.mubr.msk.bf16.mxu1 %vm12729_vm0, %v12728_v17 }
 0x413   : >> { %11777 = vmatprep.subr.bf16.mxu1 %v12728_v17 }
 0x41b   : >> { %11630 = vmatmul.mubr.msk.bf16.vlgmr.msra.gmra.mrb[12].mxu0 %vm312_vm1, %v14820_v24 }
 0x41c   : >> { %11634 = vmatpush3.bf16.msra.mxu0 %v13163_v3  ;;  %11774 = vmatmul.mubr.msk.bf16.vlgmr.msra.gmra.mrb[12].mxu1 %vm312_vm1, %v14826_v21  ;;  %v8671_v21 = vunpack.c.h.bf16 %v14744_v14  ;;  %v7494_v14 = vsub.f32 %v14726_v10, %v7478_v31  ;;  %v8673_v10 = vunpack.c.h.bf16 %v14784_v60 }
 0x41d   : >> { %11778 = vmatpush3.bf16.msra.mxu1 %v13163_v3  ;;  %11635 = vmatprep.mubr.msk.bf16.mxu0 %vm12729_vm0, %v12728_v17 }
 0x41e   : >> { %11639 = vmatprep.subr.bf16.mxu0 %v12728_v17  ;;  %11779 = vmatprep.mubr.msk.bf16.mxu1 %vm12729_vm0, %v12728_v17 }
 0x41f   : >> { %11783 = vmatprep.subr.bf16.mxu1 %v12728_v17 }
 0x427   : >> { %11636 = vmatmul.mubr.msk.bf16.vlgmr.msra.gmra.mrb[12].mxu0 %vm312_vm1, %v14860_v1  ;;  %v7477_v1 = vunpack.c.l.bf16 %v14738_v19 }
 0x428   : >> { %11640 = vmatpush3.bf16.msra.mxu0 %v13209_v11  ;;  %11780 = vmatmul.mubr.msk.bf16.vlgmr.msra.gmra.mrb[12].mxu1 %vm312_vm1, %v14866_v53  ;;  %v8687_v53 = vsub.f32 %v14730_v55, %v8671_v21  ;;  %v7496_v55 = vsub.f32 %v14766_v36, %v7480_v46  ;;  %v8675_v36 = vunpack.c.h.bf16 %v15489_v42  ;;  %v7485_v21 = vunpack.c.l.bf16 %v14898_v48 }
 0x429   : >> { %11784 = vmatpush3.bf16.msra.mxu1 %v13209_v11  ;;  %11641 = vmatprep.mubr.msk.bf16.mxu0 %vm12729_vm0, %v12728_v17  ;;  %v7493_v49 = vsub.f32 %v14724_v61, %v7477_v1  ;;  %v8672_v61 = vunpack.c.l.bf16 %v14784_v60  ;;  %v8689_v60 = vsub.f32 %v15487_v59, %v8673_v10  ;;  %v15498_v1 = vld [vmem:[#allocation30_spill] sm:$0xff]  ;;  %v7487_v46 = vunpack.c.l.bf16 %v14934_v23 }
 0x42a   : >> { %11645 = vmatprep.subr.bf16.mxu0 %v12728_v17  ;;  %11785 = vmatprep.mubr.msk.bf16.mxu1 %vm12729_vm0, %v12728_v17  ;;  %v8680_v10 = vunpack.c.l.bf16 %v14938_v5 }
 0x42b   : >> { %11789 = vmatprep.subr.bf16.mxu1 %v12728_v17  ;;  %v8688_v8 = vsub.f32 %v14768_v52, %v8672_v61  ;;  %v15490_v52 = vld [vmem:[#allocation22_spill] sm:$0xff]  ;;  %v7488_v61 = vunpack.c.h.bf16 %v14934_v23  ;;  %v7503_v23 = vsub.f32 %v14924_v54, %v7487_v46 }
 0x42c   : >> { %v7497_v6 = vsub.f32 %v15490_v52, %v7481_v9 }
 0x433   : >> { %11642 = vmatmul.mubr.msk.bf16.vlgmr.msra.gmra.mrb[12].mxu0 %vm312_vm1, %v14900_v33  ;;  %v7476_v33 = vunpack.c.h.bf16 %v14698_v57  ;;  %v8684_v57 = vsub.f32 %v14688_v50, %v8668_v4 }
 0x434   : >> { %11646 = vmatpush3.bf16.msra.mxu0 %v12903_v16  ;;  %11786 = vmatmul.mubr.msk.bf16.vlgmr.msra.gmra.mrb[12].mxu1 %vm312_vm1, %v14906_v27  ;;  %v7507_v27 = vpack.c.bf16 %v7494_v14, %v7493_v49  ;;  %v15501_v14 = vld [vmem:[#allocation35_spill] sm:$0xff] }
 0x435   : >> { %11790 = vmatpush3.bf16.msra.mxu1 %v12903_v16  ;;  %11647 = vmatprep.mubr.msk.bf16.mxu0 %vm12729_vm0, %v12728_v17  ;;  %v8698_v16 = vpack.c.bf16 %v8683_v40, %v8682_v2  ;;  %v7492_v13 = vsub.f32 %v14686_v51, %v7476_v33  ;;  %v8699_v44 = vpack.c.bf16 %v8685_v20, %v8684_v57  ;;  %v15491_v2 = vld [vmem:[#allocation23_spill] sm:$0xff]  ;;  %v15495_v57 = vld [vmem:[#allocation33_spill] sm:$0xff] }
 0x436   : >> { %11651 = vmatprep.subr.bf16.mxu0 %v12728_v17  ;;  %11791 = vmatprep.mubr.msk.bf16.mxu1 %vm12729_vm0, %v12728_v17  ;;  %v7498_v40 = vsub.f32 %v15491_v2, %v7482_v28  ;;  %v8691_v33 = vsub.f32 %v15493_v62, %v8675_v36  ;;  %v8676_v20 = vunpack.c.l.bf16 %v15495_v57 }
 0x437   : >> { %11795 = vmatprep.subr.bf16.mxu1 %v12728_v17 }
 0x438   : >> { %v7509_v4 = vpack.c.bf16 %v7498_v40, %v7497_v6  ;;  %v8692_v31 = vsub.f32 %v15498_v1, %v8676_v20 }
 0x43f   : >> { %11648 = vmatmul.mubr.msk.bf16.vlgmr.msra.gmra.mrb[12].mxu0 %vm312_vm1, %v7505_v43  ;;  %v15492_v43 = vld [vmem:[#allocation24_spill] sm:$0xff] }
 0x440   : >> { %11652 = vmatpush3.bf16.msra.mxu0 %v12939_v35  ;;  %11792 = vmatmul.mubr.msk.bf16.vlgmr.msra.gmra.mrb[12].mxu1 %vm312_vm1, %v8698_v16 }
 0x441   : >> { %11796 = vmatpush3.bf16.msra.mxu1 %v12939_v35  ;;  %11653 = vmatprep.mubr.msk.bf16.mxu0 %vm12729_vm0, %v12728_v17  ;;  %v7506_v35 = vpack.c.bf16 %v7492_v13, %v7491_v41  ;;  %v7483_v41 = vunpack.c.l.bf16 %v15494_v26  ;;  %v7484_v13 = vunpack.c.h.bf16 %v15494_v26 }
 0x442   : >> { %11657 = vmatprep.subr.bf16.mxu0 %v12728_v17  ;;  %11797 = vmatprep.mubr.msk.bf16.mxu1 %vm12729_vm0, %v12728_v17 }
 0x443   : >> { %11801 = vmatprep.subr.bf16.mxu1 %v12728_v17 }
 0x44a   : >> { %v6176_v0 = vpop.f32.mrb[8].mxu0 }
 0x44b   : >> { %9799 = vst [vmem:[%s13944_s7 + $0x20] sm:$0xff] %v6176_v0  ;;  %v7369_v38 = vpop.f32.mrb[8].mxu1  ;;  %v11403_v24 = vpop.f32.mrb[9].mxu0  ;;  %11654 = vmatmul.mubr.msk.bf16.vlgmr.msra.gmra.mrb[12].mxu0 %vm312_vm1, %v7506_v35  ;;  %v8677_v35 = vunpack.c.h.bf16 %v15495_v57 }
 0x44c   : >> { %9800 = vst [vmem:[%s13944_s7 + $0x28] sm:$0xff] %v7369_v38  ;;  %v11547_v51 = vpop.f32.mrb[9].mxu1  ;;  %11658 = vmatpush3.bf16.msra.mxu0 %v12985_v63  ;;  %11798 = vmatmul.mubr.msk.bf16.vlgmr.msra.gmra.mrb[12].mxu1 %vm312_vm1, %v8699_v44  ;;  %v6179_v50 = vpop.f32.mrb[10].mxu0  ;;  %v15496_v44 = vld [vmem:[#allocation28_spill] sm:$0xff]  ;;  %v15497_v38 = vld [vmem:[#allocation29_spill] sm:$0xff] }
 0x44d   : >> { %11802 = vmatpush3.bf16.msra.mxu1 %v12985_v63  ;;  %9807 = vst [vmem:[%s13944_s7 + $0x60] sm:$0xff] %v6179_v50  ;;  %v7372_v12 = vpop.f32.mrb[10].mxu1  ;;  %v11404_v18 = vpop.f32.mrb[11].mxu0  ;;  %11659 = vmatprep.mubr.msk.bf16.mxu0 %vm12729_vm0, %v12728_v17  ;;  %v8686_v63 = vsub.f32 %v14728_v47, %v8670_v37  ;;  %v7495_v47 = vsub.f32 %v14764_v56, %v7479_v34  ;;  %v8674_v56 = vunpack.c.l.bf16 %v15489_v42  ;;  %v15499_v51 = vld [vmem:[#allocation31_spill] sm:$0xff] }
 0x44e   : >> { %9808 = vst [vmem:[%s13944_s7 + $0x68] sm:$0xff] %v7372_v12  ;;  %v11548_v19 = vpop.f32.mrb[11].mxu1  ;;  %11663 = vmatprep.subr.bf16.mxu0 %v12728_v17  ;;  %11803 = vmatprep.mubr.msk.bf16.mxu1 %vm12729_vm0, %v12728_v17  ;;  %v7499_v0 = vsub.f32 %v15496_v44, %v7483_v41  ;;  %v7500_v24 = vsub.f32 %v15497_v38, %v7484_v13  ;;  %v7486_v12 = vunpack.c.h.bf16 %v14898_v48  ;;  %v8678_v18 = vunpack.c.l.bf16 %v14904_v22  ;;  %v15500_v48 = vld [vmem:[#allocation34_spill] sm:$0xff] }
 0x44f   : >> { %11807 = vmatprep.subr.bf16.mxu1 %v12728_v17  ;;  %v8700_v30 = vpack.c.bf16 %v8687_v53, %v8686_v63  ;;  %v7508_v15 = vpack.c.bf16 %v7496_v55, %v7495_v47  ;;  %v8690_v16 = vsub.f32 %v15492_v43, %v8674_v56  ;;  %v8693_v50 = vsub.f32 %v15499_v51, %v8677_v35  ;;  %v15502_v53 = vld [vmem:[#allocation36_spill] sm:$0xff] }
 0x450   : >> { %v7510_v37 = vpack.c.bf16 %v7500_v24, %v7499_v0  ;;  %v8679_v19 = vunpack.c.h.bf16 %v14904_v22  ;;  %v7501_v49 = vsub.f32 %v15500_v48, %v7485_v21  ;;  %v7502_v63 = vsub.f32 %v15501_v14, %v7486_v12 }
 0x451   : >> { %v8681_v47 = vunpack.c.h.bf16 %v14938_v5  ;;  %v7504_v55 = vsub.f32 %v14926_v7, %v7488_v61 }
 0x452   : >> { %v7511_v34 = vpack.c.bf16 %v7502_v63, %v7501_v49 }
 0x453   : >> { %v8697_v59 = vsub.f32 %v14930_v29, %v8681_v47  ;;  %v7512_v5 = vpack.c.bf16 %v7504_v55, %v7503_v23 }
 0x457   : >> { %11660 = vmatmul.mubr.msk.bf16.vlgmr.msra.gmra.mrb[12].mxu0 %vm312_vm1, %v7507_v27  ;;  %v8694_v27 = vsub.f32 %v15502_v53, %v8678_v18 }
 0x458   : >> { %11664 = vmatpush3.bf16.msra.mxu0 %v13029_v39  ;;  %11804 = vmatmul.mubr.msk.bf16.vlgmr.msra.gmra.mrb[12].mxu1 %vm312_vm1, %v8700_v30  ;;  %v15503_v30 = vld [vmem:[#allocation37_spill] sm:$0xff] }
 0x459   : >> { %11808 = vmatpush3.bf16.msra.mxu1 %v13029_v39  ;;  %11665 = vmatprep.mubr.msk.bf16.mxu0 %vm12729_vm0, %v12728_v17  ;;  %v8701_v39 = vpack.c.bf16 %v8689_v60, %v8688_v8  ;;  %v8695_v22 = vsub.f32 %v15503_v30, %v8679_v19  ;;  %v8696_v8 = vsub.f32 %v14928_v45, %v8680_v10 }
 0x45a   : >> { %11669 = vmatprep.subr.bf16.mxu0 %v12728_v17  ;;  %11809 = vmatprep.mubr.msk.bf16.mxu1 %vm12729_vm0, %v12728_v17 }
 0x45b   : >> { %11813 = vmatprep.subr.bf16.mxu1 %v12728_v17  ;;  %v8705_v60 = vpack.c.bf16 %v8697_v59, %v8696_v8 }
 0x463   : >> { %11666 = vmatmul.mubr.msk.bf16.vlgmr.msra.gmra.mrb[12].mxu0 %vm312_vm1, %v7508_v15 }
 0x464   : >> { %11670 = vmatpush3.bf16.msra.mxu0 %v13073_v25  ;;  %11810 = vmatmul.mubr.msk.bf16.vlgmr.msra.gmra.mrb[12].mxu1 %vm312_vm1, %v8701_v39 }
 0x465   : >> { %11814 = vmatpush3.bf16.msra.mxu1 %v13073_v25  ;;  %11671 = vmatprep.mubr.msk.bf16.mxu0 %vm12729_vm0, %v12728_v17  ;;  %v8702_v25 = vpack.c.bf16 %v8691_v33, %v8690_v16 }
 0x466   : >> { %11675 = vmatprep.subr.bf16.mxu0 %v12728_v17  ;;  %11815 = vmatprep.mubr.msk.bf16.mxu1 %vm12729_vm0, %v12728_v17 }
 0x467   : >> { %11819 = vmatprep.subr.bf16.mxu1 %v12728_v17 }
 0x46f   : >> { %11672 = vmatmul.mubr.msk.bf16.vlgmr.msra.gmra.mrb[12].mxu0 %vm312_vm1, %v7509_v4 }
 0x470   : >> { %11676 = vmatpush3.bf16.msra.mxu0 %v13117_v58  ;;  %11816 = vmatmul.mubr.msk.bf16.vlgmr.msra.gmra.mrb[12].mxu1 %vm312_vm1, %v8702_v25 }
 0x471   : >> { %11820 = vmatpush3.bf16.msra.mxu1 %v13117_v58  ;;  %11677 = vmatprep.mubr.msk.bf16.mxu0 %vm12729_vm0, %v12728_v17  ;;  %v8703_v58 = vpack.c.bf16 %v8693_v50, %v8692_v31 }
 0x472   : >> { %11681 = vmatprep.subr.bf16.mxu0 %v12728_v17  ;;  %11821 = vmatprep.mubr.msk.bf16.mxu1 %vm12729_vm0, %v12728_v17 }
 0x473   : >> { %11825 = vmatprep.subr.bf16.mxu1 %v12728_v17 }
 0x47b   : >> { %11678 = vmatmul.mubr.msk.bf16.vlgmr.msra.gmra.mrb[12].mxu0 %vm312_vm1, %v7510_v37 }
 0x47c   : >> { %11682 = vmatpush3.bf16.msra.mxu0 %v13163_v3  ;;  %11822 = vmatmul.mubr.msk.bf16.vlgmr.msra.gmra.mrb[12].mxu1 %vm312_vm1, %v8703_v58 }
 0x47d   : >> { %11826 = vmatpush3.bf16.msra.mxu1 %v13163_v3  ;;  %11683 = vmatprep.mubr.msk.bf16.mxu0 %vm12729_vm0, %v12728_v17  ;;  %v8704_v3 = vpack.c.bf16 %v8695_v22, %v8694_v27 }
 0x47e   : >> { %11687 = vmatprep.subr.bf16.mxu0 %v12728_v17  ;;  %11827 = vmatprep.mubr.msk.bf16.mxu1 %vm12729_vm0, %v12728_v17 }
 0x47f   : >> { %11831 = vmatprep.subr.bf16.mxu1 %v12728_v17 }
 0x487   : >> { %11684 = vmatmul.mubr.msk.bf16.vlgmr.msra.gmra.mrb[12].mxu0 %vm312_vm1, %v7511_v34 }
 0x488   : >> { %11688 = vmatpush3.bf16.msra.mxu0 %v13209_v11  ;;  %11828 = vmatmul.mubr.msk.bf16.vlgmr.msra.gmra.mrb[12].mxu1 %vm312_vm1, %v8704_v3 }
 0x489   : >> { %11832 = vmatpush3.bf16.msra.mxu1 %v13209_v11  ;;  %11689 = vmatprep.mubr.msk.bf16.mxu0 %vm12729_vm0, %v12728_v17 }
 0x48a   : >> { %11833 = vmatprep.mubr.msk.bf16.mxu1 %vm12729_vm0, %v12728_v17 }
 0x493   : >> { %11690 = vmatmul.mubr.msk.bf16.vlgmr.msra.gmra.mrb[12].mxu0 %vm312_vm1, %v7512_v5 }
 0x494   : >> { %11834 = vmatmul.mubr.msk.bf16.vlgmr.msra.gmra.mrb[12].mxu1 %vm312_vm1, %v8705_v60 }
 0x564   : > { %197 = sbr.rel (!%p195_p12) target bundleno = 32 (0x20), region = 79 }
 0x566   : >> { %v8562_v11 = vpop.f32.mrb[12].mxu0 }
 0x567   : >> { %9801 = vst [vmem:[%s13944_s7 + $0x30] sm:$0xff] %v8562_v11  ;;  %v9755_v15 = vpop.f32.mrb[12].mxu1  ;;  %v11691_v17 = vpop.f32.mrb[13].mxu0 }
 0x568   : >> { %9802 = vst [vmem:[%s13944_s7 + $0x38] sm:$0xff] %v9755_v15  ;;  %v11835_v39 = vpop.f32.mrb[13].mxu1  ;;  %v8565_v54 = vpop.f32.mrb[14].mxu0 }
 0x569   : >> { %9809 = vst [vmem:[%s13944_s7 + $0x70] sm:$0xff] %v8565_v54  ;;  %v9758_v7 = vpop.f32.mrb[14].mxu1  ;;  %v11692_v32 = vpop.f32.mrb[15].mxu0 }
 0x56a   : >> { %9810 = vst [vmem:[%s13944_s7 + $0x78] sm:$0xff] %v9758_v7  ;;  %v11836_v45 = vpop.f32.mrb[15].mxu1 }
 0x56b   : > { %12653 = shalt.err (!%p12650_p6)
}
 0x56c   : > { %s12654_s23 = scalar_lea.hbm %s15197_s24, 4096  ;;  %s12658_s30 = scalar_lea.hbm %s15253_s2, 8192 }
 0x56d   : > { %p12655_p7 = scmp.ne.s32.totalorder %s15197_s24, %s12654_s23  ;;  %p12659_p11 = scmp.lt.u32.totalorder %s15197_s24, %s15253_s2 }
 0x56e   : > { %p12660_p12 = scmp.lt.u32.totalorder %s12658_s30, %s12654_s23  ;;  %p12662_p0 = scmp.lt.u32.totalorder %s12654_s23, %s15197_s24 }
 0x56f   : > { %p12656_p9 = pnand %p12655_p7, %p12788_p4 }
 0x570   : > { %p12661_p13 = por %p12660_p12, %p12659_p11 }
 0x571   : > { %p12657_p10 = pneg %p12656_p9 }
 0x572   : > { %p12663_p1 = por %p12662_p0, %p12661_p13 }
 0x574   : > { %p12664_p2 = pnand %p12663_p1, %p12657_p10 }
 0x576   : > { %12667 = shalt.err (!%p12664_p2)
}
 0x577   : > { %s12731_s5 = smov 1024   ;;  %s12732_s6 = smov 64  }
 0x578   : > { %12573 = dma.vmem_to_hbm [thread:$0]  (%p12788_p4), %s15201_s25, 4096, %s15197_s24, %s15205_s15, %s12731_s5, %s12731_s5, %s12732_s6  }
 0x579 PF: > { %p12579_p3 = scmp.ge.s32.totalorder %s12722_s14, 2  ;;  %s9843_s7 = sand.u32 1, %s12702_s9  }
 0x57a   : > { %s9844_s8 = scalar_lea.sflag [#allocation3], %s9843_s7 }
 0x57b   : > { %p12576_p5 = pnand %p12579_p3, %p12795_p8 }
 0x57d   : > { %12697 = dma.done.wait (!%p12576_p5), %s9844_s8, 4096  }
 0x57e   : > { %12699 = vsyncadd (!%p12576_p5), %s9844_s8, 4294963200  ;;  %s15_s14 = sadd.s32 1, %s12722_s14   ;;  %s15504_s9 = smov %s12706_s10 }
 0x57f   : > { %p12_p6 = scmp.ge.s32.totalorder %s15_s14, 4   ;;  %s15505_s10 = smov %s12710_s11 }
 0x580   : > { %s15506_s11 = smov %s12801_s22  ;;  %s15507_s12 = smov %s12718_s13 }
 0x581   : > { %s15508_s13 = smov %s15510_s17  ;;  %14 = sbr.rel (!%p12_p6) target bundleno = 4 (0x4), region = 90 }
 0x588   :  { %9849 = vsyncpa [#allocation3], 1 }
 0x589   :  { %9851 = vsyncpa [#allocation3 + $0x1], 1 }

</bundles_post_ra>
